<compile_context>
chip_gen: v7x
topology: tpu7x:2x2x1
jax: 0.10.0
libtpu: 0.0.40
codegen_flags: <defaults>
</compile_context>

<pallas_src>
import jax
import jax.numpy as jnp
from jax.experimental import pallas as pl
from jax.experimental.pallas import tpu as pltpu

EPS = 1e-8


def _recip(x):
    # EUP approximate reciprocal -- keeps divides off the VPU slot.
    return pl.reciprocal(x, approx=True)


def _make_kernel(iteration_step, lambda_softmax, no_imram_norm, D, mm_dtype):
    """Per-(caption, image-block) IMRAM kernel (raw_feature_norm == 'clipped_l2norm')."""
    T = iteration_step

    def kernel(images_ref, cap_ref,
               wl_t2i_ref, bl_t2i_ref, wg_t2i_ref, bg_t2i_ref,
               wl_i2t_ref, bl_i2t_ref, wg_i2t_ref, bg_i2t_ref,
               out_t2i_ref, out_i2t_ref):
        imgs_mm = images_ref[...]                 # (TB, R, D)  matmul dtype
        cap_mm = cap_ref[0]                       # (L, D)      matmul dtype
        imgs = imgs_mm.astype(jnp.float32)        # f32 copies for VPU/EUP work
        cap = cap_mm.astype(jnp.float32)
        TB, R, _ = imgs.shape
        L = cap.shape[0]

        wl_t2i = wl_t2i_ref[...]; bl_t2i = bl_t2i_ref[...]
        wg_t2i = wg_t2i_ref[...]; bg_t2i = bg_t2i_ref[...]
        wl_i2t = wl_i2t_ref[...]; bl_i2t = bl_i2t_ref[...]
        wg_i2t = wg_i2t_ref[...]; bg_i2t = bg_i2t_ref[...]

        # Cosine-similarity "x1" operands never change -> precompute their norms once.
        cap_norm = jnp.sqrt(jnp.sum(cap * cap, axis=1))       # (L,)
        img_norm = jnp.sqrt(jnp.sum(imgs * imgs, axis=2))     # (TB, R)

        def l2norm_last(x):
            # torch l2norm: x / (sqrt(sum x^2) + eps)
            return x * _recip(jnp.sqrt(jnp.sum(x * x, axis=-1, keepdims=True)) + EPS)

        def attention_t2i(q):
            # query = caption features (TB, L, D); context = images (TB, R, D).
            s = jnp.einsum('bld,brd->blr', q.astype(mm_dtype), imgs_mm,
                           preferred_element_type=jnp.float32)          # (TB, L, R)
            s = jnp.where(s > 0.0, s, 0.1 * s)                           # LeakyReLU(0.1)
            # clipped_l2norm: l2-normalize over queryL (axis 1) per (image, region).
            s = s * _recip(jnp.sqrt(jnp.sum(s * s, axis=1, keepdims=True)) + EPS)
            # softmax over sourceL (regions); |s| <= 1 after l2norm so exp(s*lambda)
            # is bounded -> max-subtraction safely dropped.
            e = jnp.exp(s * lambda_softmax)
            a = e * _recip(jnp.sum(e, axis=2, keepdims=True))
            return jnp.einsum('blr,brd->bld', a.astype(mm_dtype), imgs_mm,
                              preferred_element_type=jnp.float32)        # (TB, L, D)

        def attention_i2t(q):
            # query = image features (TB, R, D); context = caption (shared across batch).
            # Flatten the batch into the matmul M dimension -> one big MXU pass.
            qf = q.reshape(TB * R, D).astype(mm_dtype)
            s = jnp.einsum('nd,ld->nl', qf, cap_mm,
                           preferred_element_type=jnp.float32)           # (TB*R, L)
            s = jnp.where(s > 0.0, s, 0.1 * s)
            s3 = s.reshape(TB, R, L)
            # clipped_l2norm: normalize over queryL (= regions, axis 1).
            s3 = s3 * _recip(jnp.sqrt(jnp.sum(s3 * s3, axis=1, keepdims=True)) + EPS)
            e = jnp.exp(s3 * lambda_softmax)                             # softmax over words
            a = e * _recip(jnp.sum(e, axis=2, keepdims=True))
            wc = jnp.dot(a.reshape(TB * R, L).astype(mm_dtype), cap_mm,
                         preferred_element_type=jnp.float32)             # (TB*R, D)
            return wc.reshape(TB, R, D)

        def gated_memory(q, wc, wl, bl, wg, bg):
            # cat([q, wc], -1) @ W == q @ W[:D] + wc @ W[D:]; flatten batch into M.
            n, s, _ = q.shape
            qf = q.reshape(n * s, D)
            wf = wc.reshape(n * s, D)
            qm = qf.astype(mm_dtype)
            wm = wf.astype(mm_dtype)
            lin = jnp.tanh(
                jnp.dot(qm, wl[:D], preferred_element_type=jnp.float32)
                + jnp.dot(wm, wl[D:], preferred_element_type=jnp.float32) + bl)
            gate = jax.nn.sigmoid(
                jnp.dot(qm, wg[:D], preferred_element_type=jnp.float32)
                + jnp.dot(wm, wg[D:], preferred_element_type=jnp.float32) + bg)
            out = qf * gate + lin * (1.0 - gate)
            return out.reshape(n, s, D)

        def cos_mean_vs_cap(wc):
            # cosine_similarity(cap_i_expand, wc, dim=2).mean(dim=1) -> (1, TB)
            w12 = jnp.sum(cap[None] * wc, axis=2)                        # (TB, L)
            w2 = jnp.sqrt(jnp.sum(wc * wc, axis=2))
            row = w12 * _recip(jnp.maximum(cap_norm[None] * w2, EPS))
            return jnp.mean(row, axis=1).reshape(1, TB)

        def cos_mean_vs_img(wc):
            # cosine_similarity(images, wc, dim=2).mean(dim=1) -> (1, TB)
            w12 = jnp.sum(imgs * wc, axis=2)                             # (TB, R)
            w2 = jnp.sqrt(jnp.sum(wc * wc, axis=2))
            row = w12 * _recip(jnp.maximum(img_norm * w2, EPS))
            return jnp.mean(row, axis=1).reshape(1, TB)

        # ---------- Text-IMRAM: query = caption (broadcast over images), context = images
        rows = []
        q = jnp.broadcast_to(cap[None], (TB, L, D))
        for j in range(T):
            wc = attention_t2i(q)
            rows.append(cos_mean_vs_cap(wc))
            if j + 1 < T:   # last query update is dead in the reference module
                q = gated_memory(q, wc, wl_t2i, bl_t2i, wg_t2i, bg_t2i)
                if not no_imram_norm:
                    q = l2norm_last(q)
        out_t2i_ref[0, :, :] = jnp.concatenate(rows, axis=0)   # (T, TB) one lane-dense store

        # ---------- Image-IMRAM: query = images, context = caption
        rows = []
        q = imgs
        for j in range(T):
            wc = attention_i2t(q)
            rows.append(cos_mean_vs_img(wc))
            if j + 1 < T:
                q = gated_memory(q, wc, wl_i2t, bl_i2t, wg_i2t, bg_i2t)
                if not no_imram_norm:
                    q = l2norm_last(q)
        out_i2t_ref[0, :, :] = jnp.concatenate(rows, axis=0)

    return kernel


def init_params(key, D):
    """Deterministic synthetic weights for the four nn.Linear(2D -> D) layers.
    Weights are stored already transposed: (2D, D); biases as (1, D)."""
    ks = jax.random.split(key, 8)
    w = lambda k: 0.05 * jax.random.normal(k, (2 * D, D), jnp.float32)
    b = lambda k: 0.05 * jax.random.normal(k, (1, D), jnp.float32)
    return {
        "wl_t2i": w(ks[0]), "bl_t2i": b(ks[1]),
        "wg_t2i": w(ks[2]), "bg_t2i": b(ks[3]),
        "wl_i2t": w(ks[4]), "bl_i2t": b(ks[5]),
        "wg_i2t": w(ks[6]), "bg_i2t": b(ks[7]),
    }


def imram_forward(images, captions, cap_lens, params, *, iteration_step=2,
                  lambda_softmax=4.0, no_imram_norm=False, training=True,
                  matmul_dtype=jnp.bfloat16, image_block=None):
    """Equivalent of IMRAM.forward(img_emb, cap_emb, cap_lens).

    matmul_dtype: dtype fed to the MXU (bf16 halves HBM/VMEM traffic and ~2x MXU
                  throughput on v6e/v7x; accumulation and all elementwise math stay f32).
                  Use jnp.float32 for bit-faithful f32 behaviour.
    image_block:  optional tile over n_image (must divide n_image; multiple of 128 unless
                  it equals n_image) to bound per-step VMEM at large sizes (v7x: 64 MiB).
    """
    del cap_lens  # the reference module reads cap_lens but never slices with it
    B, R, D = images.shape
    Bc, L, Dc = captions.shape
    assert Bc == B and Dc == D, "reference code implicitly requires n_caption == n_image"
    T = iteration_step

    TB = B if image_block is None else image_block
    assert B % TB == 0 and (TB == B or TB % 128 == 0), \
        "image_block must divide n_image and be a multiple of 128 (lane constraint)"
    n_blk = B // TB

    mm = jnp.dtype(matmul_dtype)
    kernel = _make_kernel(T, lambda_softmax, no_imram_norm, D, matmul_dtype)

    def const2d(shape):
        return pl.BlockSpec(shape, lambda i, j: (0, 0))

    in_specs = [
        pl.BlockSpec((TB, R, D), lambda i, j: (j, 0, 0)),   # image block j
        pl.BlockSpec((1, L, D), lambda i, j: (i, 0, 0)),    # caption i
        const2d((2 * D, D)), const2d((1, D)),               # linear_t2i W^T, b
        const2d((2 * D, D)), const2d((1, D)),               # gate_t2i   W^T, b
        const2d((2 * D, D)), const2d((1, D)),               # linear_i2t W^T, b
        const2d((2 * D, D)), const2d((1, D)),               # gate_i2t   W^T, b
    ]
    # Lane-dense output: n_image is the last (lane) axis, written once per grid step.
    out_specs = (
        pl.BlockSpec((1, T, TB), lambda i, j: (i, 0, j)),   # t2i sims: [cap, iter, img]
        pl.BlockSpec((1, T, TB), lambda i, j: (i, 0, j)),   # i2t sims: [cap, iter, img]
    )
    out_shape = (
        jax.ShapeDtypeStruct((B, T, B), jnp.float32),
        jax.ShapeDtypeStruct((B, T, B), jnp.float32),
    )

    # Crude VMEM re-budget for large shapes (v7x has only 64 MiB physical VMEM):
    # double-buffered inputs + outputs + f32 intermediates; only raise the limit if needed.
    est = (2 * (TB * R * D + L * D + 4 * 2 * D * D + 4 * D) * mm.itemsize
           + 2 * 2 * T * TB * 4
           + 8 * TB * max(R, L) * D * 4)
    vmem_limit = int(min(est, 100 * 1024 * 1024)) if est > 16 * 1024 * 1024 else None
    # TODO(synk): at very large n_image*D, also stream images via image_block instead of
    # keeping them fully resident (single-buffering constant blocks is a further option).

    out_t2i, out_i2t = pl.pallas_call(
        kernel,
        grid=(B, n_blk),
        in_specs=in_specs,
        out_specs=out_specs,
        out_shape=out_shape,
        compiler_params=pltpu.CompilerParams(
            dimension_semantics=("parallel", "parallel"),
            vmem_limit_bytes=vmem_limit),
    )(images.astype(matmul_dtype), captions.astype(matmul_dtype),
      params["wl_t2i"].astype(matmul_dtype), params["bl_t2i"].astype(jnp.float32),
      params["wg_t2i"].astype(matmul_dtype), params["bg_t2i"].astype(jnp.float32),
      params["wl_i2t"].astype(matmul_dtype), params["bl_i2t"].astype(jnp.float32),
      params["wg_i2t"].astype(matmul_dtype), params["bg_i2t"].astype(jnp.float32))

    # same_word mask: caption k elementwise-equal to caption i, k != i -> force -1.
    # lax.map keeps the temporary at O(B*L*D) instead of a (B,B,L,D) broadcast compare.
    capf = captions.astype(jnp.float32)
    same = jax.lax.map(lambda c: jnp.all(capf == c[None], axis=(1, 2)), capf)   # (B, B)
    same = same & (~jnp.eye(B, dtype=bool))

    out_t2i = jnp.where(same[:, None, :], -1.0, out_t2i)
    out_i2t = jnp.where(same[:, None, :], -1.0, out_i2t)

    # sum over iteration steps, then t2i + i2t.  Training orientation is
    # (n_caption, n_image); eval keeps torch's untransposed (n_image, n_caption).
    scores = out_t2i.sum(axis=1) + out_i2t.sum(axis=1)
    if not training:
        scores = scores.T
    # TODO(synk): torch casts the final scores to float64; kept float32 (no native f64 on TPU).
    return scores


if __name__ == "__main__":
    key = jax.random.PRNGKey(0)
    k_img, k_cap, k_par = jax.random.split(key, 3)

    B, R, L, D = 4, 8, 8, 32          # n_image == n_caption = 4, regions=8, words=8, embed=32
    images = jax.random.normal(k_img, (B, R, D), dtype=jnp.float32)
    captions = jax.random.normal(k_cap, (B, L, D), dtype=jnp.float32)
    cap_lens = jnp.full((B,), L, dtype=jnp.int32)

    params = init_params(k_par, D)

    score = imram_forward(images, captions, cap_lens, params,
                          iteration_step=2, lambda_softmax=4.0,
                          no_imram_norm=False, training=True)
    jax.block_until_ready(score)
    assert score.shape == (B, B)
    print("KERNEL_OK")
</pallas_src>

<mosaic_0001>
module attributes {stable_mosaic.version = 11 : i64} {
  func.func @kernel(%arg0: i32, %arg1: i32, %arg2: memref<4x8x32xbf16, #tpu.memory_space<vmem>>, %arg3: memref<1x8x32xbf16, #tpu.memory_space<vmem>>, %arg4: memref<64x32xbf16, #tpu.memory_space<vmem>>, %arg5: memref<1x32xf32, #tpu.memory_space<vmem>>, %arg6: memref<64x32xbf16, #tpu.memory_space<vmem>>, %arg7: memref<1x32xf32, #tpu.memory_space<vmem>>, %arg8: memref<64x32xbf16, #tpu.memory_space<vmem>>, %arg9: memref<1x32xf32, #tpu.memory_space<vmem>>, %arg10: memref<64x32xbf16, #tpu.memory_space<vmem>>, %arg11: memref<1x32xf32, #tpu.memory_space<vmem>>, %arg12: memref<1x2x4xf32, #tpu.memory_space<vmem>>, %arg13: memref<1x2x4xf32, #tpu.memory_space<vmem>>) attributes {dimension_semantics = [#tpu.dimension_semantics<parallel>, #tpu.dimension_semantics<parallel>], iteration_bounds = array<i64: 4, 1>, scalar_prefetch = 0 : i64, scratch_operands = 0 : i64, tpu.core_type = #tpu.core_type<tc>, window_params = [{transform_indices = @transform_0, window_bounds = array<i64: 4, 8, 32>}, {transform_indices = @transform_1, window_bounds = array<i64: 1, 8, 32>}, {pipeline_mode = #tpu.pipeline_mode<synchronous>, transform_indices = @transform_2, window_bounds = array<i64: 64, 32>}, {pipeline_mode = #tpu.pipeline_mode<synchronous>, transform_indices = @transform_3, window_bounds = array<i64: 1, 32>}, {pipeline_mode = #tpu.pipeline_mode<synchronous>, transform_indices = @transform_4, window_bounds = array<i64: 64, 32>}, {pipeline_mode = #tpu.pipeline_mode<synchronous>, transform_indices = @transform_5, window_bounds = array<i64: 1, 32>}, {pipeline_mode = #tpu.pipeline_mode<synchronous>, transform_indices = @transform_6, window_bounds = array<i64: 64, 32>}, {pipeline_mode = #tpu.pipeline_mode<synchronous>, transform_indices = @transform_7, window_bounds = array<i64: 1, 32>}, {pipeline_mode = #tpu.pipeline_mode<synchronous>, transform_indices = @transform_8, window_bounds = array<i64: 64, 32>}, {pipeline_mode = #tpu.pipeline_mode<synchronous>, transform_indices = @transform_9, window_bounds = array<i64: 1, 32>}, {transform_indices = @transform_10, window_bounds = array<i64: 1, 2, 4>}, {transform_indices = @transform_11, window_bounds = array<i64: 1, 2, 4>}]} {
    %c0 = arith.constant 0 : index
    %c0_0 = arith.constant 0 : index
    %c0_1 = arith.constant 0 : index
    %0 = vector.load %arg2[%c0, %c0_0, %c0_1] : memref<4x8x32xbf16, #tpu.memory_space<vmem>>, vector<4x8x32xbf16>
    %c0_2 = arith.constant 0 : index
    %c0_3 = arith.constant 0 : index
    %c0_4 = arith.constant 0 : index
    %1 = vector.load %arg3[%c0_2, %c0_3, %c0_4] : memref<1x8x32xbf16, #tpu.memory_space<vmem>>, vector<1x8x32xbf16>
    %2 = vector.shape_cast %1 : vector<1x8x32xbf16> to vector<8x32xbf16>
    %3 = arith.extf %0 : vector<4x8x32xbf16> to vector<4x8x32xf32>
    %4 = arith.extf %2 : vector<8x32xbf16> to vector<8x32xf32>
    %c0_5 = arith.constant 0 : index
    %c0_6 = arith.constant 0 : index
    %5 = vector.load %arg4[%c0_5, %c0_6] : memref<64x32xbf16, #tpu.memory_space<vmem>>, vector<64x32xbf16>
    %c0_7 = arith.constant 0 : index
    %c0_8 = arith.constant 0 : index
    %6 = vector.load %arg5[%c0_7, %c0_8] : memref<1x32xf32, #tpu.memory_space<vmem>>, vector<1x32xf32>
    %c0_9 = arith.constant 0 : index
    %c0_10 = arith.constant 0 : index
    %7 = vector.load %arg6[%c0_9, %c0_10] : memref<64x32xbf16, #tpu.memory_space<vmem>>, vector<64x32xbf16>
    %c0_11 = arith.constant 0 : index
    %c0_12 = arith.constant 0 : index
    %8 = vector.load %arg7[%c0_11, %c0_12] : memref<1x32xf32, #tpu.memory_space<vmem>>, vector<1x32xf32>
    %c0_13 = arith.constant 0 : index
    %c0_14 = arith.constant 0 : index
    %9 = vector.load %arg8[%c0_13, %c0_14] : memref<64x32xbf16, #tpu.memory_space<vmem>>, vector<64x32xbf16>
    %c0_15 = arith.constant 0 : index
    %c0_16 = arith.constant 0 : index
    %10 = vector.load %arg9[%c0_15, %c0_16] : memref<1x32xf32, #tpu.memory_space<vmem>>, vector<1x32xf32>
    %c0_17 = arith.constant 0 : index
    %c0_18 = arith.constant 0 : index
    %11 = vector.load %arg10[%c0_17, %c0_18] : memref<64x32xbf16, #tpu.memory_space<vmem>>, vector<64x32xbf16>
    %c0_19 = arith.constant 0 : index
    %c0_20 = arith.constant 0 : index
    %12 = vector.load %arg11[%c0_19, %c0_20] : memref<1x32xf32, #tpu.memory_space<vmem>>, vector<1x32xf32>
    %13 = arith.mulf %4, %4 : vector<8x32xf32>
    %cst = arith.constant dense<0.000000e+00> : vector<8xf32>
    %14 = vector.multi_reduction <add>, %13, %cst [1] : vector<8x32xf32> to vector<8xf32>
    %15 = math.sqrt %14 : vector<8xf32>
    %16 = arith.mulf %3, %3 : vector<4x8x32xf32>
    %cst_21 = arith.constant dense<0.000000e+00> : vector<4x8xf32>
    %17 = vector.multi_reduction <add>, %16, %cst_21 [2] : vector<4x8x32xf32> to vector<4x8xf32>
    %18 = math.sqrt %17 : vector<4x8xf32>
    %19 = vector.shape_cast %4 : vector<8x32xf32> to vector<1x8x32xf32>
    %20 = vector.shape_cast %19 : vector<1x8x32xf32> to vector<1x8x32xf32>
    %21 = vector.broadcast %20 : vector<1x8x32xf32> to vector<4x8x32xf32>
    %22 = arith.truncf %21 : vector<4x8x32xf32> to vector<4x8x32xbf16>
    "tpu.trace_start"() <{level = 10 : i32, message = "bld,brd->blr"}> : () -> ()
    %cst_22 = arith.constant dense<0.000000e+00> : vector<4x8x8xf32>
    %23 = tpu.matmul %22, %0, %cst_22 {dimension_numbers = #tpu.dot_dimension_numbers<[2], [2], [1], [1], [0, 0, 0, 1, 1, 1], [0], [0]>} : vector<4x8x32xbf16>, vector<4x8x32xbf16>, vector<4x8x8xf32> -> vector<4x8x8xf32>
    %cst_23 = arith.constant 0.000000e+00 : f32
    "tpu.trace_stop"() : () -> ()
    %24 = vector.broadcast %cst_23 : f32 to vector<4x8x8xf32>
    %25 = arith.cmpf ogt, %23, %24 : vector<4x8x8xf32>
    %cst_24 = arith.constant 1.000000e-01 : f32
    %26 = vector.broadcast %cst_24 : f32 to vector<4x8x8xf32>
    %27 = arith.mulf %26, %23 : vector<4x8x8xf32>
    %28 = arith.select %25, %23, %27 : vector<4x8x8xi1>, vector<4x8x8xf32>
    %29 = arith.mulf %28, %28 : vector<4x8x8xf32>
    %cst_25 = arith.constant dense<0.000000e+00> : vector<4x8xf32>
    %30 = vector.multi_reduction <add>, %29, %cst_25 [1] : vector<4x8x8xf32> to vector<4x8xf32>
    %31 = vector.shape_cast %30 : vector<4x8xf32> to vector<4x1x8xf32>
    %32 = math.sqrt %31 : vector<4x1x8xf32>
    %cst_26 = arith.constant 9.99999993E-9 : f32
    %33 = vector.broadcast %cst_26 : f32 to vector<4x1x8xf32>
    %34 = arith.addf %32, %33 : vector<4x1x8xf32>
    %35 = tpu.reciprocal %34 {approx = true} : vector<4x1x8xf32> -> vector<4x1x8xf32>
    %36 = vector.broadcast %35 : vector<4x1x8xf32> to vector<4x8x8xf32>
    %37 = arith.mulf %28, %36 : vector<4x8x8xf32>
    %cst_27 = arith.constant 4.000000e+00 : f32
    %38 = vector.broadcast %cst_27 : f32 to vector<4x8x8xf32>
    %39 = arith.mulf %37, %38 : vector<4x8x8xf32>
    %40 = math.exp %39 : vector<4x8x8xf32>
    %cst_28 = arith.constant dense<0.000000e+00> : vector<4x8xf32>
    %41 = vector.multi_reduction <add>, %40, %cst_28 [2] : vector<4x8x8xf32> to vector<4x8xf32>
    %42 = vector.shape_cast %41 : vector<4x8xf32> to vector<4x8x1xf32>
    %43 = tpu.reciprocal %42 {approx = true} : vector<4x8x1xf32> -> vector<4x8x1xf32>
    %44 = vector.broadcast %43 : vector<4x8x1xf32> to vector<4x8x8xf32>
    %45 = arith.mulf %40, %44 : vector<4x8x8xf32>
    %46 = arith.truncf %45 : vector<4x8x8xf32> to vector<4x8x8xbf16>
    "tpu.trace_start"() <{level = 10 : i32, message = "blr,brd->bld"}> : () -> ()
    %cst_29 = arith.constant dense<0.000000e+00> : vector<4x8x32xf32>
    %47 = tpu.matmul %46, %0, %cst_29 {dimension_numbers = #tpu.dot_dimension_numbers<[2], [1], [1], [2], [0, 0, 0, 1, 1, 2], [0], [0]>} : vector<4x8x8xbf16>, vector<4x8x32xbf16>, vector<4x8x32xf32> -> vector<4x8x32xf32>
    "tpu.trace_stop"() : () -> ()
    %48 = vector.shape_cast %4 : vector<8x32xf32> to vector<1x8x32xf32>
    %49 = vector.broadcast %48 : vector<1x8x32xf32> to vector<4x8x32xf32>
    %50 = arith.mulf %49, %47 : vector<4x8x32xf32>
    %cst_30 = arith.constant dense<0.000000e+00> : vector<4x8xf32>
    %51 = vector.multi_reduction <add>, %50, %cst_30 [2] : vector<4x8x32xf32> to vector<4x8xf32>
    %52 = arith.mulf %47, %47 : vector<4x8x32xf32>
    %cst_31 = arith.constant dense<0.000000e+00> : vector<4x8xf32>
    %53 = vector.multi_reduction <add>, %52, %cst_31 [2] : vector<4x8x32xf32> to vector<4x8xf32>
    %54 = math.sqrt %53 : vector<4x8xf32>
    %55 = vector.shape_cast %15 : vector<8xf32> to vector<1x8xf32>
    %56 = vector.broadcast %55 : vector<1x8xf32> to vector<4x8xf32>
    %57 = arith.mulf %56, %54 : vector<4x8xf32>
    %cst_32 = arith.constant 9.99999993E-9 : f32
    %58 = vector.broadcast %cst_32 : f32 to vector<4x8xf32>
    %59 = arith.maximumf %57, %58 : vector<4x8xf32>
    %60 = tpu.reciprocal %59 {approx = true} : vector<4x8xf32> -> vector<4x8xf32>
    %61 = arith.mulf %51, %60 : vector<4x8xf32>
    %cst_33 = arith.constant dense<0.000000e+00> : vector<4xf32>
    %62 = vector.multi_reduction <add>, %61, %cst_33 [1] : vector<4x8xf32> to vector<4xf32>
    %cst_34 = arith.constant 8.000000e+00 : f32
    %63 = vector.broadcast %cst_34 : f32 to vector<4xf32>
    %64 = arith.divf %62, %63 : vector<4xf32>
    %65 = vector.shape_cast %64 : vector<4xf32> to vector<1x4xf32>
    %66 = vector.shape_cast %21 : vector<4x8x32xf32> to vector<32x32xf32>
    %67 = vector.shape_cast %47 : vector<4x8x32xf32> to vector<32x32xf32>
    %68 = arith.truncf %66 : vector<32x32xf32> to vector<32x32xbf16>
    %69 = arith.truncf %67 : vector<32x32xf32> to vector<32x32xbf16>
    %70 = vector.extract_strided_slice %5 {offsets = [0, 0], sizes = [32, 32], strides = [1, 1]} : vector<64x32xbf16> to vector<32x32xbf16>
    %cst_35 = arith.constant dense<0.000000e+00> : vector<32x32xf32>
    %71 = tpu.matmul %68, %70, %cst_35 {dimension_numbers = #tpu.dot_dimension_numbers<[1], [0], [0], [1], [0, 0, 1, 1], [], []>} : vector<32x32xbf16>, vector<32x32xbf16>, vector<32x32xf32> -> vector<32x32xf32>
    %72 = vector.extract_strided_slice %5 {offsets = [32, 0], sizes = [32, 32], strides = [1, 1]} : vector<64x32xbf16> to vector<32x32xbf16>
    %cst_36 = arith.constant dense<0.000000e+00> : vector<32x32xf32>
    %73 = tpu.matmul %69, %72, %cst_36 {dimension_numbers = #tpu.dot_dimension_numbers<[1], [0], [0], [1], [0, 0, 1, 1], [], []>} : vector<32x32xbf16>, vector<32x32xbf16>, vector<32x32xf32> -> vector<32x32xf32>
    %74 = arith.addf %71, %73 : vector<32x32xf32>
    %75 = vector.broadcast %6 : vector<1x32xf32> to vector<32x32xf32>
    %76 = arith.addf %74, %75 : vector<32x32xf32>
    %77 = math.tanh %76 : vector<32x32xf32>
    %78 = vector.extract_strided_slice %7 {offsets = [0, 0], sizes = [32, 32], strides = [1, 1]} : vector<64x32xbf16> to vector<32x32xbf16>
    %cst_37 = arith.constant dense<0.000000e+00> : vector<32x32xf32>
    %79 = tpu.matmul %68, %78, %cst_37 {dimension_numbers = #tpu.dot_dimension_numbers<[1], [0], [0], [1], [0, 0, 1, 1], [], []>} : vector<32x32xbf16>, vector<32x32xbf16>, vector<32x32xf32> -> vector<32x32xf32>
    %80 = vector.extract_strided_slice %7 {offsets = [32, 0], sizes = [32, 32], strides = [1, 1]} : vector<64x32xbf16> to vector<32x32xbf16>
    %cst_38 = arith.constant dense<0.000000e+00> : vector<32x32xf32>
    %81 = tpu.matmul %69, %80, %cst_38 {dimension_numbers = #tpu.dot_dimension_numbers<[1], [0], [0], [1], [0, 0, 1, 1], [], []>} : vector<32x32xbf16>, vector<32x32xbf16>, vector<32x32xf32> -> vector<32x32xf32>
    %82 = arith.addf %79, %81 : vector<32x32xf32>
    %83 = vector.broadcast %8 : vector<1x32xf32> to vector<32x32xf32>
    %84 = arith.addf %82, %83 : vector<32x32xf32>
    %85 = arith.negf %84 : vector<32x32xf32>
    %86 = math.exp %85 : vector<32x32xf32>
    %cst_39 = arith.constant 1.000000e+00 : f32
    %87 = vector.broadcast %cst_39 : f32 to vector<32x32xf32>
    %88 = arith.addf %87, %86 : vector<32x32xf32>
    %89 = arith.divf %87, %88 : vector<32x32xf32>
    %90 = arith.mulf %66, %89 : vector<32x32xf32>
    %cst_40 = arith.constant 1.000000e+00 : f32
    %91 = vector.broadcast %cst_40 : f32 to vector<32x32xf32>
    %92 = arith.subf %91, %89 : vector<32x32xf32>
    %93 = arith.mulf %77, %92 : vector<32x32xf32>
    %94 = arith.addf %90, %93 : vector<32x32xf32>
    %95 = vector.shape_cast %94 : vector<32x32xf32> to vector<4x8x32xf32>
    %96 = arith.mulf %95, %95 : vector<4x8x32xf32>
    %cst_41 = arith.constant dense<0.000000e+00> : vector<4x8xf32>
    %97 = vector.multi_reduction <add>, %96, %cst_41 [2] : vector<4x8x32xf32> to vector<4x8xf32>
    %98 = vector.shape_cast %97 : vector<4x8xf32> to vector<4x8x1xf32>
    %99 = math.sqrt %98 : vector<4x8x1xf32>
    %cst_42 = arith.constant 9.99999993E-9 : f32
    %100 = vector.broadcast %cst_42 : f32 to vector<4x8x1xf32>
    %101 = arith.addf %99, %100 : vector<4x8x1xf32>
    %102 = tpu.reciprocal %101 {approx = true} : vector<4x8x1xf32> -> vector<4x8x1xf32>
    %103 = vector.broadcast %102 : vector<4x8x1xf32> to vector<4x8x32xf32>
    %104 = arith.mulf %95, %103 : vector<4x8x32xf32>
    %105 = arith.truncf %104 : vector<4x8x32xf32> to vector<4x8x32xbf16>
    "tpu.trace_start"() <{level = 10 : i32, message = "bld,brd->blr"}> : () -> ()
    %cst_43 = arith.constant dense<0.000000e+00> : vector<4x8x8xf32>
    %106 = tpu.matmul %105, %0, %cst_43 {dimension_numbers = #tpu.dot_dimension_numbers<[2], [2], [1], [1], [0, 0, 0, 1, 1, 1], [0], [0]>} : vector<4x8x32xbf16>, vector<4x8x32xbf16>, vector<4x8x8xf32> -> vector<4x8x8xf32>
    %cst_44 = arith.constant 0.000000e+00 : f32
    "tpu.trace_stop"() : () -> ()
    %107 = vector.broadcast %cst_44 : f32 to vector<4x8x8xf32>
    %108 = arith.cmpf ogt, %106, %107 : vector<4x8x8xf32>
    %cst_45 = arith.constant 1.000000e-01 : f32
    %109 = vector.broadcast %cst_45 : f32 to vector<4x8x8xf32>
    %110 = arith.mulf %109, %106 : vector<4x8x8xf32>
    %111 = arith.select %108, %106, %110 : vector<4x8x8xi1>, vector<4x8x8xf32>
    %112 = arith.mulf %111, %111 : vector<4x8x8xf32>
    %cst_46 = arith.constant dense<0.000000e+00> : vector<4x8xf32>
    %113 = vector.multi_reduction <add>, %112, %cst_46 [1] : vector<4x8x8xf32> to vector<4x8xf32>
    %114 = vector.shape_cast %113 : vector<4x8xf32> to vector<4x1x8xf32>
    %115 = math.sqrt %114 : vector<4x1x8xf32>
    %cst_47 = arith.constant 9.99999993E-9 : f32
    %116 = vector.broadcast %cst_47 : f32 to vector<4x1x8xf32>
    %117 = arith.addf %115, %116 : vector<4x1x8xf32>
    %118 = tpu.reciprocal %117 {approx = true} : vector<4x1x8xf32> -> vector<4x1x8xf32>
    %119 = vector.broadcast %118 : vector<4x1x8xf32> to vector<4x8x8xf32>
    %120 = arith.mulf %111, %119 : vector<4x8x8xf32>
    %cst_48 = arith.constant 4.000000e+00 : f32
    %121 = vector.broadcast %cst_48 : f32 to vector<4x8x8xf32>
    %122 = arith.mulf %120, %121 : vector<4x8x8xf32>
    %123 = math.exp %122 : vector<4x8x8xf32>
    %cst_49 = arith.constant dense<0.000000e+00> : vector<4x8xf32>
    %124 = vector.multi_reduction <add>, %123, %cst_49 [2] : vector<4x8x8xf32> to vector<4x8xf32>
    %125 = vector.shape_cast %124 : vector<4x8xf32> to vector<4x8x1xf32>
    %126 = tpu.reciprocal %125 {approx = true} : vector<4x8x1xf32> -> vector<4x8x1xf32>
    %127 = vector.broadcast %126 : vector<4x8x1xf32> to vector<4x8x8xf32>
    %128 = arith.mulf %123, %127 : vector<4x8x8xf32>
    %129 = arith.truncf %128 : vector<4x8x8xf32> to vector<4x8x8xbf16>
    "tpu.trace_start"() <{level = 10 : i32, message = "blr,brd->bld"}> : () -> ()
    %cst_50 = arith.constant dense<0.000000e+00> : vector<4x8x32xf32>
    %130 = tpu.matmul %129, %0, %cst_50 {dimension_numbers = #tpu.dot_dimension_numbers<[2], [1], [1], [2], [0, 0, 0, 1, 1, 2], [0], [0]>} : vector<4x8x8xbf16>, vector<4x8x32xbf16>, vector<4x8x32xf32> -> vector<4x8x32xf32>
    "tpu.trace_stop"() : () -> ()
    %131 = vector.shape_cast %4 : vector<8x32xf32> to vector<1x8x32xf32>
    %132 = vector.broadcast %131 : vector<1x8x32xf32> to vector<4x8x32xf32>
    %133 = arith.mulf %132, %130 : vector<4x8x32xf32>
    %cst_51 = arith.constant dense<0.000000e+00> : vector<4x8xf32>
    %134 = vector.multi_reduction <add>, %133, %cst_51 [2] : vector<4x8x32xf32> to vector<4x8xf32>
    %135 = arith.mulf %130, %130 : vector<4x8x32xf32>
    %cst_52 = arith.constant dense<0.000000e+00> : vector<4x8xf32>
    %136 = vector.multi_reduction <add>, %135, %cst_52 [2] : vector<4x8x32xf32> to vector<4x8xf32>
    %137 = math.sqrt %136 : vector<4x8xf32>
    %138 = vector.shape_cast %15 : vector<8xf32> to vector<1x8xf32>
    %139 = vector.broadcast %138 : vector<1x8xf32> to vector<4x8xf32>
    %140 = arith.mulf %139, %137 : vector<4x8xf32>
    %cst_53 = arith.constant 9.99999993E-9 : f32
    %141 = vector.broadcast %cst_53 : f32 to vector<4x8xf32>
    %142 = arith.maximumf %140, %141 : vector<4x8xf32>
    %143 = tpu.reciprocal %142 {approx = true} : vector<4x8xf32> -> vector<4x8xf32>
    %144 = arith.mulf %134, %143 : vector<4x8xf32>
    %cst_54 = arith.constant dense<0.000000e+00> : vector<4xf32>
    %145 = vector.multi_reduction <add>, %144, %cst_54 [1] : vector<4x8xf32> to vector<4xf32>
    %cst_55 = arith.constant 8.000000e+00 : f32
    %146 = vector.broadcast %cst_55 : f32 to vector<4xf32>
    %147 = arith.divf %145, %146 : vector<4xf32>
    %148 = vector.shape_cast %147 : vector<4xf32> to vector<1x4xf32>
    %149 = tpu.concatenate %65, %148 in 0 : vector<1x4xf32>, vector<1x4xf32> -> vector<2x4xf32>
    %c0_56 = arith.constant 0 : index
    %c0_57 = arith.constant 0 : index
    %c0_58 = arith.constant 0 : index
    %150 = vector.load %arg12[%c0_56, %c0_57, %c0_58] : memref<1x2x4xf32, #tpu.memory_space<vmem>>, vector<1x2x4xf32>
    %151 = vector.shape_cast %150 : vector<1x2x4xf32> to vector<2x4xf32>
    %152 = vector.shape_cast %149 : vector<2x4xf32> to vector<1x2x4xf32>
    tpu.vector_store %arg12[%c0_56, %c0_57, %c0_58], %152 {strides = array<i32>} : memref<1x2x4xf32, #tpu.memory_space<vmem>>, vector<1x2x4xf32>,
    %153 = vector.shape_cast %3 : vector<4x8x32xf32> to vector<32x32xf32>
    %154 = arith.truncf %153 : vector<32x32xf32> to vector<32x32xbf16>
    "tpu.trace_start"() <{level = 10 : i32, message = "nd,ld->nl"}> : () -> ()
    %cst_59 = arith.constant dense<0.000000e+00> : vector<32x8xf32>
    %155 = tpu.matmul %154, %2, %cst_59 {dimension_numbers = #tpu.dot_dimension_numbers<[1], [1], [0], [0], [0, 0, 1, 0], [], []>} : vector<32x32xbf16>, vector<8x32xbf16>, vector<32x8xf32> -> vector<32x8xf32>
    %cst_60 = arith.constant 0.000000e+00 : f32
    "tpu.trace_stop"() : () -> ()
    %156 = vector.broadcast %cst_60 : f32 to vector<32x8xf32>
    %157 = arith.cmpf ogt, %155, %156 : vector<32x8xf32>
    %cst_61 = arith.constant 1.000000e-01 : f32
    %158 = vector.broadcast %cst_61 : f32 to vector<32x8xf32>
    %159 = arith.mulf %158, %155 : vector<32x8xf32>
    %160 = arith.select %157, %155, %159 : vector<32x8xi1>, vector<32x8xf32>
    %161 = vector.shape_cast %160 : vector<32x8xf32> to vector<4x8x8xf32>
    %162 = arith.mulf %161, %161 : vector<4x8x8xf32>
    %cst_62 = arith.constant dense<0.000000e+00> : vector<4x8xf32>
    %163 = vector.multi_reduction <add>, %162, %cst_62 [1] : vector<4x8x8xf32> to vector<4x8xf32>
    %164 = vector.shape_cast %163 : vector<4x8xf32> to vector<4x1x8xf32>
    %165 = math.sqrt %164 : vector<4x1x8xf32>
    %cst_63 = arith.constant 9.99999993E-9 : f32
    %166 = vector.broadcast %cst_63 : f32 to vector<4x1x8xf32>
    %167 = arith.addf %165, %166 : vector<4x1x8xf32>
    %168 = tpu.reciprocal %167 {approx = true} : vector<4x1x8xf32> -> vector<4x1x8xf32>
    %169 = vector.broadcast %168 : vector<4x1x8xf32> to vector<4x8x8xf32>
    %170 = arith.mulf %161, %169 : vector<4x8x8xf32>
    %cst_64 = arith.constant 4.000000e+00 : f32
    %171 = vector.broadcast %cst_64 : f32 to vector<4x8x8xf32>
    %172 = arith.mulf %170, %171 : vector<4x8x8xf32>
    %173 = math.exp %172 : vector<4x8x8xf32>
    %cst_65 = arith.constant dense<0.000000e+00> : vector<4x8xf32>
    %174 = vector.multi_reduction <add>, %173, %cst_65 [2] : vector<4x8x8xf32> to vector<4x8xf32>
    %175 = vector.shape_cast %174 : vector<4x8xf32> to vector<4x8x1xf32>
    %176 = tpu.reciprocal %175 {approx = true} : vector<4x8x1xf32> -> vector<4x8x1xf32>
    %177 = vector.broadcast %176 : vector<4x8x1xf32> to vector<4x8x8xf32>
    %178 = arith.mulf %173, %177 : vector<4x8x8xf32>
    %179 = vector.shape_cast %178 : vector<4x8x8xf32> to vector<32x8xf32>
    %180 = arith.truncf %179 : vector<32x8xf32> to vector<32x8xbf16>
    %cst_66 = arith.constant dense<0.000000e+00> : vector<32x32xf32>
    %181 = tpu.matmul %180, %2, %cst_66 {dimension_numbers = #tpu.dot_dimension_numbers<[1], [0], [0], [1], [0, 0, 1, 1], [], []>} : vector<32x8xbf16>, vector<8x32xbf16>, vector<32x32xf32> -> vector<32x32xf32>
    %182 = vector.shape_cast %181 : vector<32x32xf32> to vector<4x8x32xf32>
    %183 = arith.mulf %3, %182 : vector<4x8x32xf32>
    %cst_67 = arith.constant dense<0.000000e+00> : vector<4x8xf32>
    %184 = vector.multi_reduction <add>, %183, %cst_67 [2] : vector<4x8x32xf32> to vector<4x8xf32>
    %185 = arith.mulf %182, %182 : vector<4x8x32xf32>
    %cst_68 = arith.constant dense<0.000000e+00> : vector<4x8xf32>
    %186 = vector.multi_reduction <add>, %185, %cst_68 [2] : vector<4x8x32xf32> to vector<4x8xf32>
    %187 = math.sqrt %186 : vector<4x8xf32>
    %188 = arith.mulf %18, %187 : vector<4x8xf32>
    %cst_69 = arith.constant 9.99999993E-9 : f32
    %189 = vector.broadcast %cst_69 : f32 to vector<4x8xf32>
    %190 = arith.maximumf %188, %189 : vector<4x8xf32>
    %191 = tpu.reciprocal %190 {approx = true} : vector<4x8xf32> -> vector<4x8xf32>
    %192 = arith.mulf %184, %191 : vector<4x8xf32>
    %cst_70 = arith.constant dense<0.000000e+00> : vector<4xf32>
    %193 = vector.multi_reduction <add>, %192, %cst_70 [1] : vector<4x8xf32> to vector<4xf32>
    %cst_71 = arith.constant 8.000000e+00 : f32
    %194 = vector.broadcast %cst_71 : f32 to vector<4xf32>
    %195 = arith.divf %193, %194 : vector<4xf32>
    %196 = vector.shape_cast %195 : vector<4xf32> to vector<1x4xf32>
    %197 = vector.shape_cast %3 : vector<4x8x32xf32> to vector<32x32xf32>
    %198 = vector.shape_cast %182 : vector<4x8x32xf32> to vector<32x32xf32>
    %199 = arith.truncf %197 : vector<32x32xf32> to vector<32x32xbf16>
    %200 = arith.truncf %198 : vector<32x32xf32> to vector<32x32xbf16>
    %201 = vector.extract_strided_slice %9 {offsets = [0, 0], sizes = [32, 32], strides = [1, 1]} : vector<64x32xbf16> to vector<32x32xbf16>
    %cst_72 = arith.constant dense<0.000000e+00> : vector<32x32xf32>
    %202 = tpu.matmul %199, %201, %cst_72 {dimension_numbers = #tpu.dot_dimension_numbers<[1], [0], [0], [1], [0, 0, 1, 1], [], []>} : vector<32x32xbf16>, vector<32x32xbf16>, vector<32x32xf32> -> vector<32x32xf32>
    %203 = vector.extract_strided_slice %9 {offsets = [32, 0], sizes = [32, 32], strides = [1, 1]} : vector<64x32xbf16> to vector<32x32xbf16>
    %cst_73 = arith.constant dense<0.000000e+00> : vector<32x32xf32>
    %204 = tpu.matmul %200, %203, %cst_73 {dimension_numbers = #tpu.dot_dimension_numbers<[1], [0], [0], [1], [0, 0, 1, 1], [], []>} : vector<32x32xbf16>, vector<32x32xbf16>, vector<32x32xf32> -> vector<32x32xf32>
    %205 = arith.addf %202, %204 : vector<32x32xf32>
    %206 = vector.broadcast %10 : vector<1x32xf32> to vector<32x32xf32>
    %207 = arith.addf %205, %206 : vector<32x32xf32>
    %208 = math.tanh %207 : vector<32x32xf32>
    %209 = vector.extract_strided_slice %11 {offsets = [0, 0], sizes = [32, 32], strides = [1, 1]} : vector<64x32xbf16> to vector<32x32xbf16>
    %cst_74 = arith.constant dense<0.000000e+00> : vector<32x32xf32>
    %210 = tpu.matmul %199, %209, %cst_74 {dimension_numbers = #tpu.dot_dimension_numbers<[1], [0], [0], [1], [0, 0, 1, 1], [], []>} : vector<32x32xbf16>, vector<32x32xbf16>, vector<32x32xf32> -> vector<32x32xf32>
    %211 = vector.extract_strided_slice %11 {offsets = [32, 0], sizes = [32, 32], strides = [1, 1]} : vector<64x32xbf16> to vector<32x32xbf16>
    %cst_75 = arith.constant dense<0.000000e+00> : vector<32x32xf32>
    %212 = tpu.matmul %200, %211, %cst_75 {dimension_numbers = #tpu.dot_dimension_numbers<[1], [0], [0], [1], [0, 0, 1, 1], [], []>} : vector<32x32xbf16>, vector<32x32xbf16>, vector<32x32xf32> -> vector<32x32xf32>
    %213 = arith.addf %210, %212 : vector<32x32xf32>
    %214 = vector.broadcast %12 : vector<1x32xf32> to vector<32x32xf32>
    %215 = arith.addf %213, %214 : vector<32x32xf32>
    %216 = arith.negf %215 : vector<32x32xf32>
    %217 = math.exp %216 : vector<32x32xf32>
    %cst_76 = arith.constant 1.000000e+00 : f32
    %218 = vector.broadcast %cst_76 : f32 to vector<32x32xf32>
    %219 = arith.addf %218, %217 : vector<32x32xf32>
    %220 = arith.divf %218, %219 : vector<32x32xf32>
    %221 = arith.mulf %197, %220 : vector<32x32xf32>
    %cst_77 = arith.constant 1.000000e+00 : f32
    %222 = vector.broadcast %cst_77 : f32 to vector<32x32xf32>
    %223 = arith.subf %222, %220 : vector<32x32xf32>
    %224 = arith.mulf %208, %223 : vector<32x32xf32>
    %225 = arith.addf %221, %224 : vector<32x32xf32>
    %226 = vector.shape_cast %225 : vector<32x32xf32> to vector<4x8x32xf32>
    %227 = arith.mulf %226, %226 : vector<4x8x32xf32>
    %cst_78 = arith.constant dense<0.000000e+00> : vector<4x8xf32>
    %228 = vector.multi_reduction <add>, %227, %cst_78 [2] : vector<4x8x32xf32> to vector<4x8xf32>
    %229 = vector.shape_cast %228 : vector<4x8xf32> to vector<4x8x1xf32>
    %230 = math.sqrt %229 : vector<4x8x1xf32>
    %cst_79 = arith.constant 9.99999993E-9 : f32
    %231 = vector.broadcast %cst_79 : f32 to vector<4x8x1xf32>
    %232 = arith.addf %230, %231 : vector<4x8x1xf32>
    %233 = tpu.reciprocal %232 {approx = true} : vector<4x8x1xf32> -> vector<4x8x1xf32>
    %234 = vector.broadcast %233 : vector<4x8x1xf32> to vector<4x8x32xf32>
    %235 = arith.mulf %226, %234 : vector<4x8x32xf32>
    %236 = vector.shape_cast %235 : vector<4x8x32xf32> to vector<32x32xf32>
    %237 = arith.truncf %236 : vector<32x32xf32> to vector<32x32xbf16>
    "tpu.trace_start"() <{level = 10 : i32, message = "nd,ld->nl"}> : () -> ()
    %cst_80 = arith.constant dense<0.000000e+00> : vector<32x8xf32>
    %238 = tpu.matmul %237, %2, %cst_80 {dimension_numbers = #tpu.dot_dimension_numbers<[1], [1], [0], [0], [0, 0, 1, 0], [], []>} : vector<32x32xbf16>, vector<8x32xbf16>, vector<32x8xf32> -> vector<32x8xf32>
    %cst_81 = arith.constant 0.000000e+00 : f32
    "tpu.trace_stop"() : () -> ()
    %239 = vector.broadcast %cst_81 : f32 to vector<32x8xf32>
    %240 = arith.cmpf ogt, %238, %239 : vector<32x8xf32>
    %cst_82 = arith.constant 1.000000e-01 : f32
    %241 = vector.broadcast %cst_82 : f32 to vector<32x8xf32>
    %242 = arith.mulf %241, %238 : vector<32x8xf32>
    %243 = arith.select %240, %238, %242 : vector<32x8xi1>, vector<32x8xf32>
    %244 = vector.shape_cast %243 : vector<32x8xf32> to vector<4x8x8xf32>
    %245 = arith.mulf %244, %244 : vector<4x8x8xf32>
    %cst_83 = arith.constant dense<0.000000e+00> : vector<4x8xf32>
    %246 = vector.multi_reduction <add>, %245, %cst_83 [1] : vector<4x8x8xf32> to vector<4x8xf32>
    %247 = vector.shape_cast %246 : vector<4x8xf32> to vector<4x1x8xf32>
    %248 = math.sqrt %247 : vector<4x1x8xf32>
    %cst_84 = arith.constant 9.99999993E-9 : f32
    %249 = vector.broadcast %cst_84 : f32 to vector<4x1x8xf32>
    %250 = arith.addf %248, %249 : vector<4x1x8xf32>
    %251 = tpu.reciprocal %250 {approx = true} : vector<4x1x8xf32> -> vector<4x1x8xf32>
    %252 = vector.broadcast %251 : vector<4x1x8xf32> to vector<4x8x8xf32>
    %253 = arith.mulf %244, %252 : vector<4x8x8xf32>
    %cst_85 = arith.constant 4.000000e+00 : f32
    %254 = vector.broadcast %cst_85 : f32 to vector<4x8x8xf32>
    %255 = arith.mulf %253, %254 : vector<4x8x8xf32>
    %256 = math.exp %255 : vector<4x8x8xf32>
    %cst_86 = arith.constant dense<0.000000e+00> : vector<4x8xf32>
    %257 = vector.multi_reduction <add>, %256, %cst_86 [2] : vector<4x8x8xf32> to vector<4x8xf32>
    %258 = vector.shape_cast %257 : vector<4x8xf32> to vector<4x8x1xf32>
    %259 = tpu.reciprocal %258 {approx = true} : vector<4x8x1xf32> -> vector<4x8x1xf32>
    %260 = vector.broadcast %259 : vector<4x8x1xf32> to vector<4x8x8xf32>
    %261 = arith.mulf %256, %260 : vector<4x8x8xf32>
    %262 = vector.shape_cast %261 : vector<4x8x8xf32> to vector<32x8xf32>
    %263 = arith.truncf %262 : vector<32x8xf32> to vector<32x8xbf16>
    %cst_87 = arith.constant dense<0.000000e+00> : vector<32x32xf32>
    %264 = tpu.matmul %263, %2, %cst_87 {dimension_numbers = #tpu.dot_dimension_numbers<[1], [0], [0], [1], [0, 0, 1, 1], [], []>} : vector<32x8xbf16>, vector<8x32xbf16>, vector<32x32xf32> -> vector<32x32xf32>
    %265 = vector.shape_cast %264 : vector<32x32xf32> to vector<4x8x32xf32>
    %266 = arith.mulf %3, %265 : vector<4x8x32xf32>
    %cst_88 = arith.constant dense<0.000000e+00> : vector<4x8xf32>
    %267 = vector.multi_reduction <add>, %266, %cst_88 [2] : vector<4x8x32xf32> to vector<4x8xf32>
    %268 = arith.mulf %265, %265 : vector<4x8x32xf32>
    %cst_89 = arith.constant dense<0.000000e+00> : vector<4x8xf32>
    %269 = vector.multi_reduction <add>, %268, %cst_89 [2] : vector<4x8x32xf32> to vector<4x8xf32>
    %270 = math.sqrt %269 : vector<4x8xf32>
    %271 = arith.mulf %18, %270 : vector<4x8xf32>
    %cst_90 = arith.constant 9.99999993E-9 : f32
    %272 = vector.broadcast %cst_90 : f32 to vector<4x8xf32>
    %273 = arith.maximumf %271, %272 : vector<4x8xf32>
    %274 = tpu.reciprocal %273 {approx = true} : vector<4x8xf32> -> vector<4x8xf32>
    %275 = arith.mulf %267, %274 : vector<4x8xf32>
    %cst_91 = arith.constant dense<0.000000e+00> : vector<4xf32>
    %276 = vector.multi_reduction <add>, %275, %cst_91 [1] : vector<4x8xf32> to vector<4xf32>
    %cst_92 = arith.constant 8.000000e+00 : f32
    %277 = vector.broadcast %cst_92 : f32 to vector<4xf32>
    %278 = arith.divf %276, %277 : vector<4xf32>
    %279 = vector.shape_cast %278 : vector<4xf32> to vector<1x4xf32>
    %280 = tpu.concatenate %196, %279 in 0 : vector<1x4xf32>, vector<1x4xf32> -> vector<2x4xf32>
    %c0_93 = arith.constant 0 : index
    %c0_94 = arith.constant 0 : index
    %c0_95 = arith.constant 0 : index
    %281 = vector.load %arg13[%c0_93, %c0_94, %c0_95] : memref<1x2x4xf32, #tpu.memory_space<vmem>>, vector<1x2x4xf32>
    %282 = vector.shape_cast %281 : vector<1x2x4xf32> to vector<2x4xf32>
    %283 = vector.shape_cast %280 : vector<2x4xf32> to vector<1x2x4xf32>
    tpu.vector_store %arg13[%c0_93, %c0_94, %c0_95], %283 {strides = array<i32>} : memref<1x2x4xf32, #tpu.memory_space<vmem>>, vector<1x2x4xf32>,
    return
  }
  func.func @transform_0(%arg0: i32, %arg1: i32) -> (i32, i32, i32) {
    %c0_i32 = arith.constant 0 : i32
    %c0_i32_0 = arith.constant 0 : i32
    %c0_i32_1 = arith.constant 0 : i32
    return %arg1, %c0_i32, %c0_i32_0 : i32, i32, i32
  }
  func.func @transform_1(%arg0: i32, %arg1: i32) -> (i32, i32, i32) {
    %c0_i32 = arith.constant 0 : i32
    %c0_i32_0 = arith.constant 0 : i32
    %c0_i32_1 = arith.constant 0 : i32
    return %arg0, %c0_i32, %c0_i32_0 : i32, i32, i32
  }
  func.func @transform_2(%arg0: i32, %arg1: i32) -> (i32, i32) {
    %c0_i32 = arith.constant 0 : i32
    %c0_i32_0 = arith.constant 0 : i32
    %c0_i32_1 = arith.constant 0 : i32
    return %c0_i32, %c0_i32_0 : i32, i32
  }
  func.func @transform_3(%arg0: i32, %arg1: i32) -> (i32, i32) {
    %c0_i32 = arith.constant 0 : i32
    %c0_i32_0 = arith.constant 0 : i32
    %c0_i32_1 = arith.constant 0 : i32
    return %c0_i32, %c0_i32_0 : i32, i32
  }
  func.func @transform_4(%arg0: i32, %arg1: i32) -> (i32, i32) {
    %c0_i32 = arith.constant 0 : i32
    %c0_i32_0 = arith.constant 0 : i32
    %c0_i32_1 = arith.constant 0 : i32
    return %c0_i32, %c0_i32_0 : i32, i32
  }
  func.func @transform_5(%arg0: i32, %arg1: i32) -> (i32, i32) {
    %c0_i32 = arith.constant 0 : i32
    %c0_i32_0 = arith.constant 0 : i32
    %c0_i32_1 = arith.constant 0 : i32
    return %c0_i32, %c0_i32_0 : i32, i32
  }
  func.func @transform_6(%arg0: i32, %arg1: i32) -> (i32, i32) {
    %c0_i32 = arith.constant 0 : i32
    %c0_i32_0 = arith.constant 0 : i32
    %c0_i32_1 = arith.constant 0 : i32
    return %c0_i32, %c0_i32_0 : i32, i32
  }
  func.func @transform_7(%arg0: i32, %arg1: i32) -> (i32, i32) {
    %c0_i32 = arith.constant 0 : i32
    %c0_i32_0 = arith.constant 0 : i32
    %c0_i32_1 = arith.constant 0 : i32
    return %c0_i32, %c0_i32_0 : i32, i32
  }
  func.func @transform_8(%arg0: i32, %arg1: i32) -> (i32, i32) {
    %c0_i32 = arith.constant 0 : i32
    %c0_i32_0 = arith.constant 0 : i32
    %c0_i32_1 = arith.constant 0 : i32
    return %c0_i32, %c0_i32_0 : i32, i32
  }
  func.func @transform_9(%arg0: i32, %arg1: i32) -> (i32, i32) {
    %c0_i32 = arith.constant 0 : i32
    %c0_i32_0 = arith.constant 0 : i32
    %c0_i32_1 = arith.constant 0 : i32
    return %c0_i32, %c0_i32_0 : i32, i32
  }
  func.func @transform_10(%arg0: i32, %arg1: i32) -> (i32, i32, i32) {
    %c0_i32 = arith.constant 0 : i32
    %c0_i32_0 = arith.constant 0 : i32
    return %arg0, %c0_i32, %arg1 : i32, i32, i32
  }
  func.func @transform_11(%arg0: i32, %arg1: i32) -> (i32, i32, i32) {
    %c0_i32 = arith.constant 0 : i32
    %c0_i32_0 = arith.constant 0 : i32
    return %arg0, %c0_i32, %arg1 : i32, i32, i32
  }
}

</mosaic_0001>

<bundles_post_ra>
// kernel: tpu_custom_call.1
= control target key start
LH: loop header
LB: loop body
LE: loop exit
PB: predicated region body
PF: predicated region fallthrough
CT: control target
= control target key end

     0   :  { %s5267_s0 = inlined_call_operand.vmem [shape: bf16[4,8,32], index: 0, kind: input, shape index: {}]   ;;  %s5268_s1 = inlined_call_operand.vmem [shape: bf16[4,8,32], index: 1, kind: input, shape index: {}]   ;;  %s5269_s2 = inlined_call_operand.vmem [shape: bf16[64,32], index: 2, kind: input, shape index: {}]   ;;  %s5270_s3 = inlined_call_operand.vmem [shape: f32[1,32], index: 3, kind: input, shape index: {}]   ;;  %s5271_s4 = inlined_call_operand.vmem [shape: bf16[64,32], index: 4, kind: input, shape index: {}]   ;;  %s5272_s5 = inlined_call_operand.vmem [shape: f32[1,32], index: 5, kind: input, shape index: {}]   ;;  %s5273_s6 = inlined_call_operand.vmem [shape: bf16[64,32], index: 6, kind: input, shape index: {}]   ;;  %s5274_s7 = inlined_call_operand.vmem [shape: f32[1,32], index: 7, kind: input, shape index: {}]   ;;  %s5275_s8 = inlined_call_operand.vmem [shape: bf16[64,32], index: 8, kind: input, shape index: {}]   ;;  %s5276_s9 = inlined_call_operand.vmem [shape: f32[1,32], index: 9, kind: input, shape index: {}]   ;;  %s5277_s10 = inlined_call_operand.hbm [shape: f32[4,2,4], index: 10, kind: output, shape index: {0}]   ;;  %s5278_s11 = inlined_call_operand.hbm [shape: f32[4,2,4], index: 11, kind: output, shape index: {1}]  }
   0x1   :  { %5280 = sst [smem:[#allocation8_spill]] %s5267_s0 }
   0x2   :  { %5281 = sst [smem:[#allocation9_spill]] %s5268_s1 }
   0x3   :  { %5282 = sst [smem:[#allocation10_spill]] %s5269_s2 }
   0x4   :  { %5283 = sst [smem:[#allocation11_spill]] %s5270_s3 }
   0x5   :  { %17 = vsyncpa [#allocation3], 0 }
   0x6   :  { %19 = vsyncpa [#allocation3 + $0x1], 0 }
   0x7   :  { %20 = vsyncpa [#allocation5], 0 }
   0x8   :  { %22 = vsyncpa [#allocation5 + $0x1], 0  ;;  %s4202_s17 = smov 0   ;;  %s4204_s18 = smov 0  }
   0x9   :  { %s4206_s19 = smov 0   ;;  %s4208_s20 = smov 0  }
   0xa   :  { %s4210_s21 = smov 0   ;;  %s4212_s22 = smov 0  }
   0xb LB: > { %s3292_s23 = sadd.s32 4294967295, %s4136_s22   ;;  %s3293_s24 = sadd.s32 4294967294, %s4136_s22   ;;  %s4136_s22 = sphi %s4212_s22, %s28_s22   ;;  %s4132_s21 = sphi %s4210_s21, %s5296_s21   ;;  %s4128_s20 = sphi %s4208_s20, %s5295_s20   ;;  %s4124_s19 = sphi %s4206_s19, %s5294_s19   ;;  %s4120_s18 = sphi %s4204_s18, %s5293_s18   ;;  %s4116_s17 = sphi %s4202_s17, %s5292_s17  }
   0xc   : > { %s40_s25 = sadd.s32 1, %s4132_s21  ;;  %s269_s26 = sadd.s32 1, %s4124_s19 }
   0xd   : > { %p42_p0 = scmp.ge.s32.totalorder %s40_s25, 4  ;;  %p279_p1 = scmp.ne.s32.totalorder %s4124_s19, %s4120_s18 }
   0xe   : > { %p280_p2 = scmp.eq.s32.totalorder %s3292_s23, 3  ;;  %p285_p3 = scmp.ne.s32.totalorder %s4120_s18, %s4116_s17 }
   0xf   : > { %s5298_s25 = smov (%p42_p0, %s40_s25), 0  ;;  %p286_p5 = scmp.eq.s32.totalorder %s3293_s24, 3 }
  0x10   : > { %p4242_p4 = por %p280_p2, %p279_p1  ;;  %s264_s28 = ssub.s32 %s4132_s21, %s5298_s25 }
  0x11   : > { %p3297_p6 = scmp.ge.s32.totalorder %s4136_s22, 1  ;;  %p267_p7 = scmp.eq.s32.totalorder %s264_s28, 0 }
  0x12   : > { %p4249_p8 = por %p286_p5, %p285_p3  ;;  %p372_p9 = scmp.lt.s32.totalorder %s4136_s22, 5 }
  0x13   : > { %s4255_s30 = scalar_select %p267_p7, %s4124_s19, %s269_s26  }
  0x14   : > { %p373_p10 = pnand %p3297_p6, %p372_p9 }
  0x15   : > { %s5286_s0 = sld [smem:[#allocation8_spill]] (!%p373_p10)  ;;  %vm479_vm0 = vcmask (!%p373_p10), 261120   ;;  %v4138_v2 = vmov (!%p373_p10), 0.0   ;;  %p427_p11 = scmp.lt.s32.totalorder (!%p373_p10), %s4128_s20, 3  ;;  %vm4139_vm1 = vmmov (!%p373_p10), 0   ;;  %vm726_vm4 = vcmask (!%p373_p10), 64512  }
  0x16   : > { %376 = sbr.rel (%p373_p10) target bundleno = 3704 (0xe78), region = 60  ;;  %3454 = vmatprep.subr.bf16.mxu0 (!%p373_p10), %v4138_v2  ;;  %3460 = vmatprep.subr.bf16.mxu1 (!%p373_p10), %v4138_v2  ;;  %s5287_s1 = sld [smem:[#allocation9_spill]] (!%p373_p10)  ;;  %vm834_vm15 = vcmask (!%p373_p10), 1043456  }
  0x17   : > { %3456 = vmatprep.mubr.msk.bf16.mxu0 (!%p373_p10), %vm4139_vm1, %v4138_v2  ;;  %3462 = vmatprep.mubr.msk.bf16.mxu1 (!%p373_p10), %vm4139_vm1, %v4138_v2  ;;  %s5288_s2 = sld [smem:[#allocation10_spill]] (!%p373_p10)  ;;  %s5289_s3 = sld [smem:[#allocation11_spill]] (!%p373_p10) }
  0x18   : > { %s5279_s13 = sshll.u32 (!%p373_p10), %s4128_s20, 5  ;;  %s4140_s24 = smov (!%p373_p10), [#allocation2]  }
  0x19   : > { %s5176_s26 = scalar_lea.hbm (!%p373_p10), %s5277_s10, %s5279_s13  ;;  %s4030_s13 = sshll.u32 (!%p373_p10), %s4140_s24, 4  ;;  %s4031_s13 = int_to_ptr.vmem [resolvable:$false] %s4030_s13 }
  0x1b   : > { %v4260_v0 = vld [vmem:[%s5286_s0] sm:$0xf] (!%p373_p10)  ;;  %v4265_v1 = vld [vmem:[%s5286_s0 + $0x4] sm:$0xf] (!%p373_p10)  ;;  %v4281_v5 = vld [vmem:[%s5286_s0 + $0x8] sm:$0xf] (!%p373_p10) }
  0x1c   : > { %v4271_v3 = vsel (!%p373_p10), %vm479_vm0, %v4260_v0, 0  ;;  %v4275_v4 = vsel (!%p373_p10), %vm479_vm0, %v4265_v1, 0  ;;  %v4288_v6 = vld [vmem:[%s5286_s0 + $0xc] sm:$0xf] (!%p373_p10)  ;;  %v4297_v7 = vsel (!%p373_p10), %vm479_vm0, %v4281_v5, 0 }
  0x1d   : > { %3455 = vmatpush3.bf16.xpose.msra.mxu0 %v4271_v3  ;;  %3461 = vmatpush3.bf16.xpose.msra.mxu1 %v4275_v4  ;;  %s428_s28 = scalar_select %p427_p11, %s4128_s20, 3  ;;  %v4303_v8 = vsel %vm479_vm0, %v4288_v6, 0 }
  0x1e   : > { %3466 = vmatprep.subr.bf16.mxu0 %v4138_v2  ;;  %3472 = vmatprep.subr.bf16.mxu1 %v4138_v2 }
  0x1f   : > { %s3300_s12 = sshll.u32 %s428_s28, 2 }
  0x20   : > { %s4308_s15 = scalar_lea.vmem %s5287_s1, %s3300_s12  ;;  %s5165_s12 = sand.u32 1, %s4120_s18  }
  0x21   : > { %v4311_v9 = vld [vmem:[%s4308_s15] sm:$0xf]  ;;  %s3143_s1 = scalar_lea.sflag [#allocation3], %s5165_s12 }
  0x22   : > { %v4315_v10 = vcombine.low %v4311_v9, %v4311_v9 }
  0x24   : > { %3457 = vmatmul.mubr.msk.bf16.vlgmr.msra.gmra.mrb[0].mxu0 %vm479_vm0, %v4315_v10  ;;  %3463 = vmatmul.mubr.msk.bf16.vlgmr.msra.gmra.mrb[0].mxu1 %vm479_vm0, %v4315_v10 }
  0x25   : > { %3467 = vmatpush3.bf16.xpose.msra.mxu0 %v4297_v7  ;;  %3473 = vmatpush3.bf16.xpose.msra.mxu1 %v4303_v8 }
  0x26   : > { %3468 = vmatprep.mubr.msk.bf16.mxu0 %vm4139_vm1, %v4138_v2  ;;  %3474 = vmatprep.mubr.msk.bf16.mxu1 %vm4139_vm1, %v4138_v2 }
  0x27   : > { %3478 = vmatprep.subr.bf16.mxu0 %v4138_v2  ;;  %3484 = vmatprep.subr.bf16.mxu1 %v4138_v2 }
  0x2c   : > { %3469 = vmatmul.mubr.msk.bf16.vlgmr.msra.gmra.mrb[4].mxu0 %vm479_vm0, %v4315_v10  ;;  %3475 = vmatmul.mubr.msk.bf16.vlgmr.msra.gmra.mrb[4].mxu1 %vm479_vm0, %v4315_v10 }
  0x2d   : > { %3480 = vmatprep.mubr.msk.bf16.mxu0 %vm4139_vm1, %v4138_v2  ;;  %3486 = vmatprep.mubr.msk.bf16.mxu1 %vm4139_vm1, %v4138_v2 }
  0xf7   : > { %v575_v11 = vpop.f32.mrb[0].mxu0  ;;  %v618_v12 = vpop.f32.mrb[0].mxu1 }
  0xf8   : > { %vm710_vm2 = vcmp.gt.f32.partialorder %v575_v11, 0.0  ;;  %v714_v13 = vmul.f32 0.1, %v575_v11  ;;  %vm711_vm3 = vcmp.gt.f32.partialorder %v618_v12, 0.0  ;;  %v715_v14 = vmul.f32 0.1, %v618_v12 }
  0xf9   : > { %v3458_v15 = vpop.f32.mrb[1].mxu0  ;;  %v3464_v16 = vpop.f32.mrb[1].mxu1 }
  0xfa   : > { %v4337_v17 = vsel %vm710_vm2, %v575_v11, %v714_v13  ;;  %v4339_v18 = vsel %vm711_vm3, %v618_v12, %v715_v14  ;;  %v578_v19 = vpop.f32.mrb[2].mxu0  ;;  %v621_v20 = vpop.f32.mrb[2].mxu1 }
  0xfb   : > { %v722_v21 = vmul.f32 %v4337_v17, %v4337_v17  ;;  %v723_v22 = vmul.f32 %v4339_v18, %v4339_v18  ;;  %v3459_v23 = vpop.f32.mrb[3].mxu0  ;;  %v3465_v24 = vpop.f32.mrb[3].mxu1 }
  0xfd   : > { %v727_v25 = vsel %vm726_vm4, %v722_v21, 0.0  ;;  %v734_v26 = vsel %vm726_vm4, %v723_v22, 0.0 }
  0xfe   : > { %v728_v27 = vrot.slane %v727_v25, 4  ;;  %v735_v28 = vrot.slane %v734_v26, 4 }
  0xff   : > { %v661_v29 = vpop.f32.mrb[4].mxu0  ;;  %v704_v30 = vpop.f32.mrb[4].mxu1 }
 0x100   : > { %v729_v31 = vadd.f32 %v728_v27, %v727_v25  ;;  %v736_v32 = vadd.f32 %v735_v28, %v734_v26  ;;  %vm712_vm5 = vcmp.gt.f32.partialorder %v661_v29, 0.0  ;;  %v716_v33 = vmul.f32 0.1, %v661_v29  ;;  %v3470_v34 = vpop.f32.mrb[5].mxu0  ;;  %v3476_v35 = vpop.f32.mrb[5].mxu1 }
 0x101   : > { %vm713_vm6 = vcmp.gt.f32.partialorder %v704_v30, 0.0  ;;  %v717_v36 = vmul.f32 0.1, %v704_v30  ;;  %v664_v37 = vpop.f32.mrb[6].mxu0  ;;  %v707_v38 = vpop.f32.mrb[6].mxu1 }
 0x102   : > { %v730_v39 = vrot.slane %v729_v31, 2  ;;  %v737_v40 = vrot.slane %v736_v32, 2  ;;  %v4347_v41 = vsel %vm712_vm5, %v661_v29, %v716_v33  ;;  %v3471_v42 = vpop.f32.mrb[7].mxu0  ;;  %v3477_v43 = vpop.f32.mrb[7].mxu1 }
 0x103   : > { %v724_v44 = vmul.f32 %v4347_v41, %v4347_v41  ;;  %v4351_v45 = vsel %vm713_vm6, %v704_v30, %v717_v36 }
 0x104   : > { %v731_v46 = vadd.f32 %v730_v39, %v729_v31  ;;  %v738_v47 = vadd.f32 %v737_v40, %v736_v32  ;;  %v725_v48 = vmul.f32 %v4351_v45, %v4351_v45 }
 0x105   : > { %v741_v49 = vsel %vm726_vm4, %v724_v44, 0.0 }
 0x106   : > { %v732_v50 = vrot.slane %v731_v46, 1  ;;  %v739_v51 = vrot.slane %v738_v47, 1  ;;  %v742_v52 = vrot.slane %v741_v49, 4  ;;  %v748_v53 = vsel %vm726_vm4, %v725_v48, 0.0 }
 0x107   : > { %v749_v54 = vrot.slane %v748_v53, 4 }
 0x108   : > { %v733_v55 = vadd.f32 %v732_v50, %v731_v46  ;;  %v740_v56 = vadd.f32 %v739_v51, %v738_v47  ;;  %v743_v57 = vadd.f32 %v742_v52, %v741_v49 }
 0x109   : > { %v750_v58 = vadd.f32 %v749_v54, %v748_v53 }
 0x10a   : > { %3739 = vrsqrt.f32 %v733_v55  ;;  %v744_v59 = vrot.slane %v743_v57, 2  ;;  %vm757_vm7 = vcmp.eq.f32.partialorder %v733_v55, inf  ;;  %v760_v19 = vand.u32 2147483648, %v733_v55 }
 0x10b   : > { %3741 = vrsqrt.f32 %v740_v56  ;;  %v751_v60 = vrot.slane %v750_v58, 2  ;;  %vm759_vm8 = vcmp.eq.f32.partialorder %v733_v55, 0.0  ;;  %vm764_vm9 = vcmp.eq.f32.partialorder %v740_v56, inf }
 0x10c   : > { %v745_v61 = vadd.f32 %v744_v59, %v743_v57  ;;  %v767_v22 = vand.u32 2147483648, %v740_v56  ;;  %vm766_vm10 = vcmp.eq.f32.partialorder %v740_v56, 0.0 }
 0x10d   : > { %v752_v62 = vadd.f32 %v751_v60, %v750_v58 }
 0x10e   : > { %v746_v63 = vrot.slane %v745_v61, 1 }
 0x10f   : > { %v753_v11 = vrot.slane %v752_v62, 1 }
 0x110   : > { %v747_v12 = vadd.f32 %v746_v63, %v745_v61  ;;  %v4373_v63 = vsel %vm834_vm15, %v4265_v1, 0 }
 0x111   : > { %v754_v13 = vadd.f32 %v753_v11, %v752_v62  ;;  %v4367_v62 = vsel %vm834_vm15, %v4260_v0, 0  ;;  %3485 = vmatpush3.bf16.msra.mxu1 %v4373_v63 }
 0x112   : > { %3743 = vrsqrt.f32 %v747_v12  ;;  %vm771_vm11 = vcmp.eq.f32.partialorder %v747_v12, inf  ;;  %v774_v31 = vand.u32 2147483648, %v747_v12  ;;  %vm773_vm12 = vcmp.eq.f32.partialorder %v747_v12, 0.0  ;;  %3479 = vmatpush3.bf16.msra.mxu0 %v4367_v62  ;;  %3496 = vmatprep.subr.bf16.mxu1 %v4138_v2 }
 0x113   : > { %3745 = vrsqrt.f32 %v754_v13  ;;  %vm778_vm13 = vcmp.eq.f32.partialorder %v754_v13, inf  ;;  %v781_v34 = vand.u32 2147483648, %v754_v13  ;;  %vm780_vm14 = vcmp.eq.f32.partialorder %v754_v13, 0.0  ;;  %3490 = vmatprep.subr.bf16.mxu0 %v4138_v2 }
 0x114   : > { %v3740_v14 = vpop.eup %3739 }
 0x115   : > { %v3742_v15 = vpop.eup %3741  ;;  %v756_v16 = vmul.f32 %v3740_v14, %v733_v55 }
 0x116   : > { %v763_v20 = vmul.f32 %v3742_v15, %v740_v56 }
 0x117   : > { %v758_v21 = vsel %vm757_vm7, %v733_v55, %v756_v16 }
 0x118   : > { %v761_v23 = vsel %vm759_vm8, %v760_v19, %v758_v21  ;;  %v765_v24 = vsel %vm764_vm9, %v740_v56, %v763_v20  ;;  %v4379_v19 = vsel %vm834_vm15, %v4281_v5, 0 }
 0x119   : > { %v783_v25 = vadd.f32 1e-08, %v761_v23  ;;  %v768_v26 = vsel %vm766_vm10, %v767_v22, %v765_v24  ;;  %v4387_v22 = vsel %vm834_vm15, %v4288_v6, 0  ;;  %v3722_v6 = vld [vmem:[%s5288_s2 + $0x10] sm:$0xff]  }
 0x11a   : > { %v784_v27 = vadd.f32 1e-08, %v768_v26 }
 0x11b   : > { %3747 = vrcp.f32 %v783_v25 }
 0x11c   : > { %3749 = vrcp.f32 %v784_v27  ;;  %v3744_v28 = vpop.eup %3743 }
 0x11d   : > { %v3746_v29 = vpop.eup %3745  ;;  %v770_v30 = vmul.f32 %v3744_v28, %v747_v12  ;;  %v3723_v28 = vld [vmem:[%s5271_s4 + $0x10] sm:$0xff]  }
 0x11e   : > { %v777_v32 = vmul.f32 %v3746_v29, %v754_v13  ;;  %v3724_v29 = vld [vmem:[%s5288_s2 + $0x18] sm:$0xff]  }
 0x11f   : > { %v772_v33 = vsel %vm771_vm11, %v747_v12, %v770_v30  ;;  %v3725_v30 = vld [vmem:[%s5271_s4 + $0x18] sm:$0xff]  }
 0x120   : > { %v775_v35 = vsel %vm773_vm12, %v774_v31, %v772_v33  ;;  %v779_v36 = vsel %vm778_vm13, %v754_v13, %v777_v32  ;;  %v3726_v31 = vld [vmem:[%s5271_s4] sm:$0xff]  }
 0x121   : > { %v785_v37 = vadd.f32 1e-08, %v775_v35  ;;  %v782_v38 = vsel %vm780_vm14, %v781_v34, %v779_v36  ;;  %v3727_v32 = vld [vmem:[%s5288_s2] sm:$0xff]  }
 0x122   : > { %v786_v39 = vadd.f32 1e-08, %v782_v38 }
 0x123   : > { %3751 = vrcp.f32 %v785_v37 }
 0x124   : > { %3753 = vrcp.f32 %v786_v39 }
 0x125   : > { %v3748_v40 = vpop.eup %3747 }
 0x126   : > { %v3750_v42 = vpop.eup %3749  ;;  %v791_v43 = vmul.f32 %v3748_v40, %v4337_v17 }
 0x127   : > { %v792_v44 = vmul.f32 %v3750_v42, %v4339_v18 }
 0x128   : > { %v795_v46 = vmul.f32 4.0, %v791_v43 }
 0x129   : > { %v796_v47 = vmul.f32 4.0, %v792_v44 }
 0x12a   : > { %v799_v48 = vmul.f32 1.442695, %v795_v46 }
 0x12b   : > { %v801_v49 = vmul.f32 1.442695, %v796_v47 }
 0x12c   : > { %3755 = vpow2.f32 %v799_v48 }
 0x12d   : > { %3757 = vpow2.f32 %v801_v49  ;;  %v3752_v50 = vpop.eup %3751 }
 0x12e   : > { %v3754_v51 = vpop.eup %3753  ;;  %v793_v52 = vmul.f32 %v3752_v50, %v4347_v41 }
 0x12f   : > { %v794_v53 = vmul.f32 %v3754_v51, %v4351_v45  ;;  %v3728_v51 = vld [vmem:[%s5271_s4 + $0x8] sm:$0xff]  }
 0x130   : > { %v797_v54 = vmul.f32 4.0, %v793_v52  ;;  %v3729_v52 = vld [vmem:[%s5288_s2 + $0x8] sm:$0xff]   ;;  %s4032_s2 = scalar_lea.vmem %s4031_s13, 64 }
 0x131   : > { %v798_v55 = vmul.f32 4.0, %v794_v53 }
 0x132   : > { %v803_v56 = vmul.f32 1.442695, %v797_v54 }
 0x133   : > { %v805_v57 = vmul.f32 1.442695, %v798_v55  ;;  %v3327_v55 = vld [vmem:[%s5272_s5] ss:$0 sm:$0xff] }
 0x134   : > { %3759 = vpow2.f32 %v803_v56 }
 0x135   : > { %3761 = vpow2.f32 %v805_v57 }
 0x136   : > { %v3756_v17 = vpop.eup %3755 }
 0x137   : > { %v807_v18 = vsel %vm726_vm4, %v3756_v17, 0.0  ;;  %v3758_v58 = vpop.eup %3757 }
 0x138   : > { %808 = vadd.xlane.f32.xlu0 %v807_v18  ;;  %v810_v59 = vsel %vm726_vm4, %v3758_v58, 0.0 }
 0x13c   : > { %811 = vadd.xlane.f32.xlu0 %v810_v59 }
 0x13e   : > { %v3760_v60 = vpop.eup %3759 }
 0x13f   : > { %v813_v61 = vsel %vm726_vm4, %v3760_v60, 0.0  ;;  %v3762_v41 = vpop.eup %3761 }
 0x140   : > { %814 = vadd.xlane.f32.xlu1 %v813_v61  ;;  %v816_v45 = vsel %vm726_vm4, %v3762_v41, 0.0 }
 0x144   : > { %817 = vadd.xlane.f32.xlu1 %v816_v45 }
 0x1c5   : > { %v809_v11 = vpop.xlane.xlu0 %808 }
 0x1c6   : > { %3763 = vrcp.f32 %v809_v11 }
 0x1c9   : > { %v812_v12 = vpop.xlane.xlu0 %811 }
 0x1ca   : > { %3765 = vrcp.f32 %v812_v12 }
 0x1cd   : > { %v815_v13 = vpop.xlane.xlu1 %814 }
 0x1ce   : > { %3767 = vrcp.f32 %v815_v13 }
 0x1d0   : > { %v3764_v14 = vpop.eup %3763 }
 0x1d1   : > { %v823_v0 = vmul.f32 %v3764_v14, %v3756_v17  ;;  %v818_v15 = vpop.xlane.xlu1 %817  ;;  %v3318_v14 = vld [vmem:[%s5289_s3] ss:$0 sm:$0xff] }
 0x1d2   : > { %3769 = vrcp.f32 %v818_v15 }
 0x1d3   : > { %v827_v16 = vpack.c.bf16 %v823_v0, %v823_v0 }
 0x1d4   : > { %v3766_v1 = vpop.eup %3765 }
 0x1d5   : > { %v824_v20 = vmul.f32 %v3766_v1, %v3758_v58  ;;  %3481 = vmatmul.mubr.msk.bf16.vlgmr.msra.gmra.mrb[8].mxu0 %vm726_vm4, %v827_v16 }
 0x1d6   : > { %3491 = vmatpush3.bf16.msra.mxu0 %v4379_v19  ;;  %3492 = vmatprep.mubr.msk.bf16.mxu0 %vm4139_vm1, %v4138_v2 }
 0x1d7   : > { %v828_v21 = vpack.c.bf16 %v824_v20, %v824_v20  ;;  %3502 = vmatprep.subr.bf16.mxu0 %v3722_v6 }
 0x1d8   : > { %v3768_v23 = vpop.eup %3767 }
 0x1d9   : > { %3487 = vmatmul.mubr.msk.bf16.vlgmr.msra.gmra.mrb[8].mxu1 %vm726_vm4, %v828_v21  ;;  %v825_v5 = vmul.f32 %v3768_v23, %v3760_v60 }
 0x1da   : > { %3497 = vmatpush3.bf16.msra.mxu1 %v4387_v22  ;;  %3498 = vmatprep.mubr.msk.bf16.mxu1 %vm4139_vm1, %v4138_v2 }
 0x1db   : > { %v829_v24 = vpack.c.bf16 %v825_v5, %v825_v5  ;;  %3518 = vmatprep.subr.bf16.mxu1 %v3723_v28 }
 0x1dc   : > { %v3770_v25 = vpop.eup %3769 }
 0x1dd   : > { %v826_v26 = vmul.f32 %v3770_v25, %v3762_v41  ;;  %3493 = vmatmul.mubr.msk.bf16.vlgmr.msra.gmra.mrb[12].mxu0 %vm726_vm4, %v829_v24 }
 0x1de   : > { %3503 = vmatpush3.bf16.msra.mxu0 %v3722_v6 }
 0x1df   : > { %v830_v27 = vpack.c.bf16 %v826_v26, %v826_v26  ;;  %3504 = vmatprep.subr.bf16.mxu0 %v3724_v29 }
 0x1e1   : > { %3499 = vmatmul.mubr.msk.bf16.vlgmr.msra.gmra.mrb[12].mxu1 %vm726_vm4, %v830_v27 }
 0x1e2   : > { %3519 = vmatpush3.bf16.msra.mxu1 %v3723_v28  ;;  %3505 = vmatpush3.bf16.msra.mxu0 %v3724_v29 }
 0x1e3   : > { %3520 = vmatprep.subr.bf16.mxu1 %v3725_v30  ;;  %3510 = vmatprep.subr.bf16.mxu0 %v3727_v32 }
 0x1e6   : > { %3521 = vmatpush3.bf16.msra.mxu1 %v3725_v30  ;;  %v4460_v30 = vunpack.c.l.bf16 %v4311_v9 }
 0x1e7   : > { %3526 = vmatprep.subr.bf16.mxu1 %v3726_v31 }
 0x2a8   : > { %v4413_v33 = vpop.f32.mrb[8].mxu0 }
 0x2a9   : > { %v3482_v34 = vpop.f32.mrb[9].mxu0 }
 0x2aa   : > { %v874_v35 = vpop.f32.mrb[10].mxu0 }
 0x2ab   : > { %v3483_v36 = vpop.f32.mrb[11].mxu0 }
 0x2ac   : > { %v4415_v37 = vpop.f32.mrb[8].mxu1 }
 0x2ad   : > { %v1123_v38 = vpack.c.bf16 %v4415_v37, %v4413_v33  ;;  %v3488_v39 = vpop.f32.mrb[9].mxu1 }
 0x2ae   : > { %v919_v40 = vpop.f32.mrb[10].mxu1 }
 0x2af   : > { %v3489_v42 = vpop.f32.mrb[11].mxu1  ;;  %3506 = vmatprep.mubr.msk.bf16.mxu0 %vm479_vm0, %v1123_v38  ;;  %3522 = vmatprep.mubr.msk.bf16.mxu1 %vm479_vm0, %v1123_v38 }
 0x2b0   : > { %v4421_v43 = vpop.f32.mrb[12].mxu0 }
 0x2b1   : > { %v3494_v44 = vpop.f32.mrb[13].mxu0 }
 0x2b2   : > { %v964_v46 = vpop.f32.mrb[14].mxu0 }
 0x2b3   : > { %v3495_v47 = vpop.f32.mrb[15].mxu0 }
 0x2b4   : > { %v4423_v48 = vpop.f32.mrb[12].mxu1 }
 0x2b5   : > { %v1124_v49 = vpack.c.bf16 %v4423_v48, %v4421_v43  ;;  %v3500_v50 = vpop.f32.mrb[13].mxu1 }
 0x2b6   : > { %v1009_v53 = vpop.f32.mrb[14].mxu1 }
 0x2b7   : > { %v3501_v54 = vpop.f32.mrb[15].mxu1  ;;  %3507 = vmatmul.mubr.msk.bf16.vlgmr.msra.gmra.mrb[16].mxu0 %vm479_vm0, %v1124_v49  ;;  %3523 = vmatmul.mubr.msk.bf16.vlgmr.msra.gmra.mrb[16].mxu1 %vm479_vm0, %v1124_v49 }
 0x2b8   : > { %3527 = vmatpush3.bf16.msra.mxu1 %v3726_v31  ;;  %3511 = vmatpush3.bf16.msra.mxu0 %v3727_v32 }
 0x2b9   : > { %3528 = vmatprep.subr.bf16.mxu1 %v3728_v51  ;;  %3512 = vmatprep.subr.bf16.mxu0 %v3729_v52 }
 0x2ba   : > { %3514 = vmatprep.mubr.msk.bf16.mxu0 %vm479_vm0, %v4315_v10  ;;  %3530 = vmatprep.mubr.msk.bf16.mxu1 %vm479_vm0, %v4315_v10 }
 0x2bc   : > { %3529 = vmatpush3.bf16.msra.mxu1 %v3728_v51  ;;  %3513 = vmatpush3.bf16.msra.mxu0 %v3729_v52 }
 0x2bd   : > { %3534 = vmatprep.subr.bf16.mxu0 %v4138_v2  ;;  %3540 = vmatprep.subr.bf16.mxu1 %v4138_v2 }
 0x2c3   : > { %3515 = vmatmul.mubr.msk.bf16.vlgmr.msra.gmra.mrb[16].mxu0 %vm479_vm0, %v4315_v10  ;;  %3531 = vmatmul.mubr.msk.bf16.vlgmr.msra.gmra.mrb[16].mxu1 %vm479_vm0, %v4315_v10 }
 0x2c4   : > { %3536 = vmatprep.mubr.msk.bf16.mxu0 %vm4139_vm1, %v4138_v2  ;;  %3542 = vmatprep.mubr.msk.bf16.mxu1 %vm4139_vm1, %v4138_v2 }
 0x2c5   : > { %3535 = vmatpush3.bf16.xpose.msra.mxu0 %v4271_v3  ;;  %3541 = vmatpush3.bf16.xpose.msra.mxu1 %v4275_v4 }
 0x2c6   : > { %3546 = vmatprep.subr.bf16.mxu0 %v4138_v2  ;;  %3552 = vmatprep.subr.bf16.mxu1 %v4138_v2 }
 0x396   : > { %v3516_v56 = vpop.f32.mrb[16].mxu0  ;;  %v3532_v10 = vpop.f32.mrb[16].mxu1 }
 0x397   : > { %v1397_v57 = vadd.f32 %v3532_v10, %v3327_v55  ;;  %v1238_v17 = vpop.f32.mrb[17].mxu0  ;;  %v1374_v18 = vpop.f32.mrb[17].mxu1  ;;  %v1261_v0 = vadd.f32 %v3516_v56, %v3318_v14 }
 0x398   : > { %v1395_v58 = vadd.f32 %v3327_v55, %v1374_v18  ;;  %v3517_v59 = vpop.f32.mrb[18].mxu0  ;;  %v3533_v60 = vpop.f32.mrb[18].mxu1  ;;  %v1259_v20 = vadd.f32 %v3318_v14, %v1238_v17 }
 0x399   : > { %v3330_v61 = vmul.f32 -1.442695, %v1397_v57  ;;  %v1398_v3 = vadd.f32 %v3533_v60, %v3327_v55  ;;  %v1241_v41 = vpop.f32.mrb[19].mxu0  ;;  %v1377_v4 = vpop.f32.mrb[19].mxu1  ;;  %v1262_v5 = vadd.f32 %v3517_v59, %v3318_v14 }
 0x39a   : > { %v3328_v45 = vmul.f32 -1.442695, %v1395_v58  ;;  %v1396_v11 = vadd.f32 %v3327_v55, %v1377_v4  ;;  %v1260_v26 = vadd.f32 %v3318_v14, %v1241_v41 }
 0x39b   : > { %3771 = vpow2.f32 %v3330_v61  ;;  %v3331_v12 = vmul.f32 -1.442695, %v1398_v3 }
 0x39c   : > { %3773 = vpow2.f32 %v3328_v45  ;;  %v3329_v13 = vmul.f32 -1.442695, %v1396_v11 }
 0x39d   : > { %3775 = vpow2.f32 %v3331_v12 }
 0x39e   : > { %3777 = vpow2.f32 %v3329_v13 }
 0x39f   : > { %3779 = vtanh.f32 %v1261_v0 }
 0x3a5   : > { %v3772_v15 = vpop.eup %3771 }
 0x3a6   : > { %v3774_v16 = vpop.eup %3773  ;;  %v1413_v1 = vadd.f32 1.0, %v3772_v15 }
 0x3a7   : > { %v1411_v21 = vadd.f32 1.0, %v3774_v16  ;;  %v3776_v23 = vpop.eup %3775 }
 0x3a8   : > { %3781 = vrcp.f32 %v1413_v1  ;;  %v1414_v24 = vadd.f32 1.0, %v3776_v23  ;;  %v3778_v25 = vpop.eup %3777 }
 0x3a9   : > { %3783 = vrcp.f32 %v1411_v21  ;;  %v1412_v27 = vadd.f32 1.0, %v3778_v25  ;;  %v3780_v6 = vpop.eup %3779 }
 0x3aa   : > { %3785 = vtanh.f32 %v1259_v20 }
 0x3ab   : > { %3787 = vrcp.f32 %v1414_v24 }
 0x3ac   : > { %3789 = vtanh.f32 %v1262_v5 }
 0x3ad   : > { %3791 = vrcp.f32 %v1412_v27 }
 0x3ae   : > { %3793 = vtanh.f32 %v1260_v26 }
 0x3b2   : > { %v3782_v28 = vpop.eup %3781 }
 0x3b3   : > { %v3784_v29 = vpop.eup %3783  ;;  %v1429_v31 = vsub.f32 1.0, %v3782_v28  ;;  %v1425_v36 = vmul.f32 %v3782_v28, %v4460_v30 }
 0x3b4   : > { %v3786_v32 = vpop.eup %3785  ;;  %v1427_v34 = vsub.f32 1.0, %v3784_v29  ;;  %v1423_v40 = vmul.f32 %v3784_v29, %v4460_v30 }
 0x3b5   : > { %v3788_v35 = vpop.eup %3787  ;;  %v1433_v38 = vmul.f32 %v3780_v6, %v1429_v31 }
 0x3b6   : > { %v3790_v39 = vpop.eup %3789  ;;  %v1431_v42 = vmul.f32 %v3786_v32, %v1427_v34  ;;  %v1430_v44 = vsub.f32 1.0, %v3788_v35  ;;  %v1426_v9 = vmul.f32 %v3788_v35, %v4460_v30 }
 0x3b7   : > { %v3792_v46 = vpop.eup %3791  ;;  %v4464_v47 = vadd.f32 %v1433_v38, %v1425_v36 }
 0x3b8   : > { %v4466_v49 = vadd.f32 %v1431_v42, %v1423_v40  ;;  %v1434_v50 = vmul.f32 %v3790_v39, %v1430_v44  ;;  %v1428_v51 = vsub.f32 1.0, %v3792_v46  ;;  %v3794_v52 = vpop.eup %3793  ;;  %v1424_v56 = vmul.f32 %v3792_v46, %v4460_v30 }
 0x3b9   : > { %v1441_v53 = vmul.f32 %v4464_v47, %v4464_v47 }
 0x3ba   : > { %v1439_v54 = vmul.f32 %v4466_v49, %v4466_v49  ;;  %v4473_v55 = vadd.f32 %v1434_v50, %v1426_v9  ;;  %v1432_v10 = vmul.f32 %v3794_v52, %v1428_v51 }
 0x3bb   : > { %v1449_v57 = vsel %vm479_vm0, %v1441_v53, 0.0 }
 0x3bc   : > { %1450 = vadd.xlane.f32.xlu1 %v1449_v57  ;;  %v1443_v17 = vsel %vm479_vm0, %v1439_v54, 0.0  ;;  %v1442_v18 = vmul.f32 %v4473_v55, %v4473_v55  ;;  %v1436_v58 = vadd.f32 %v1432_v10, %v1424_v56 }
 0x3bd   : > { %1444 = vadd.xlane.f32.xlu0 %v1443_v17 }
 0x3be   : > { %v1440_v59 = vmul.f32 %v1436_v58, %v1436_v58  ;;  %v1452_v60 = vsel %vm479_vm0, %v1442_v18, 0.0 }
 0x3c0   : > { %1453 = vadd.xlane.f32.xlu1 %v1452_v60  ;;  %v1446_v61 = vsel %vm479_vm0, %v1440_v59, 0.0 }
 0x3c1   : > { %1447 = vadd.xlane.f32.xlu0 %v1446_v61 }
 0x449   : > { %v1451_v3 = vpop.xlane.xlu1 %1450 }
 0x44a   : > { %3795 = vrsqrt.f32 %v1451_v3  ;;  %v1445_v41 = vpop.xlane.xlu0 %1444  ;;  %vm1471_vm2 = vcmp.eq.f32.partialorder %v1451_v3, inf  ;;  %v1474_v14 = vand.u32 2147483648, %v1451_v3  ;;  %vm1473_vm3 = vcmp.eq.f32.partialorder %v1451_v3, 0.0 }
 0x44b   : > { %3797 = vrsqrt.f32 %v1445_v41  ;;  %vm1457_vm5 = vcmp.eq.f32.partialorder %v1445_v41, inf  ;;  %v1460_v16 = vand.u32 2147483648, %v1445_v41  ;;  %vm1459_vm6 = vcmp.eq.f32.partialorder %v1445_v41, 0.0 }
 0x44d   : > { %v1454_v4 = vpop.xlane.xlu1 %1453 }
 0x44e   : > { %3799 = vrsqrt.f32 %v1454_v4  ;;  %v1448_v45 = vpop.xlane.xlu0 %1447  ;;  %vm1478_vm7 = vcmp.eq.f32.partialorder %v1454_v4, inf  ;;  %v1481_v26 = vand.u32 2147483648, %v1454_v4  ;;  %vm1480_vm9 = vcmp.eq.f32.partialorder %v1454_v4, 0.0 }
 0x44f   : > { %3801 = vrsqrt.f32 %v1448_v45  ;;  %vm1464_vm8 = vcmp.eq.f32.partialorder %v1448_v45, inf  ;;  %v1467_v29 = vand.u32 2147483648, %v1448_v45  ;;  %vm1466_vm10 = vcmp.eq.f32.partialorder %v1448_v45, 0.0 }
 0x454   : > { %v3796_v11 = vpop.eup %3795 }
 0x455   : > { %v3798_v12 = vpop.eup %3797  ;;  %v1470_v13 = vmul.f32 %v3796_v11, %v1451_v3 }
 0x456   : > { %v1456_v0 = vmul.f32 %v3798_v12, %v1445_v41 }
 0x457   : > { %v1472_v15 = vsel %vm1471_vm2, %v1451_v3, %v1470_v13 }
 0x458   : > { %v3800_v1 = vpop.eup %3799  ;;  %v1475_v20 = vsel %vm1473_vm3, %v1474_v14, %v1472_v15  ;;  %v1458_v21 = vsel %vm1457_vm5, %v1445_v41, %v1456_v0 }
 0x459   : > { %v3802_v23 = vpop.eup %3801  ;;  %v1461_v5 = vsel %vm1459_vm6, %v1460_v16, %v1458_v21  ;;  %v1477_v24 = vmul.f32 %v3800_v1, %v1454_v4  ;;  %v1485_v6 = vadd.f32 1e-08, %v1475_v20 }
 0x45a   : > { %v1483_v25 = vadd.f32 1e-08, %v1461_v5  ;;  %v1463_v27 = vmul.f32 %v3802_v23, %v1448_v45 }
 0x45b   : > { %v1479_v28 = vsel %vm1478_vm7, %v1454_v4, %v1477_v24 }
 0x45c   : > { %3803 = vrcp.f32 %v1483_v25  ;;  %v1465_v31 = vsel %vm1464_vm8, %v1448_v45, %v1463_v27  ;;  %v1482_v32 = vsel %vm1480_vm9, %v1481_v26, %v1479_v28 }
 0x45d   : > { %v1468_v34 = vsel %vm1466_vm10, %v1467_v29, %v1465_v31  ;;  %3805 = vrcp.f32 %v1485_v6  ;;  %v1486_v36 = vadd.f32 1e-08, %v1482_v32 }
 0x45e   : > { %v1484_v35 = vadd.f32 1e-08, %v1468_v34 }
 0x460   : > { %3807 = vrcp.f32 %v1484_v35 }
 0x461   : > { %3809 = vrcp.f32 %v1486_v36 }
 0x466   : > { %v3804_v38 = vpop.eup %3803 }
 0x467   : > { %v1491_v39 = vmul.f32 %v3804_v38, %v4466_v49  ;;  %v3806_v40 = vpop.eup %3805 }
 0x468   : > { %v1493_v50 = vmul.f32 %v3806_v40, %v4464_v47 }
 0x469   : > { %v1495_v42 = vpack.c.bf16 %v1491_v39, %v1491_v39 }
 0x46a   : > { %v3808_v44 = vpop.eup %3807  ;;  %v1497_v49 = vpack.c.bf16 %v1493_v50, %v1493_v50 }
 0x46b   : > { %3537 = vmatmul.mubr.msk.bf16.vlgmr.msra.gmra.mrb[20].mxu0 %vm479_vm0, %v1495_v42  ;;  %v1492_v46 = vmul.f32 %v3808_v44, %v1436_v58  ;;  %v3810_v51 = vpop.eup %3809 }
 0x46c   : > { %3547 = vmatpush3.bf16.xpose.msra.mxu0 %v4297_v7  ;;  %3548 = vmatprep.mubr.msk.bf16.mxu0 %vm4139_vm1, %v4138_v2  ;;  %v1494_v52 = vmul.f32 %v3810_v51, %v4473_v55 }
 0x46d   : > { %v1496_v9 = vpack.c.bf16 %v1492_v46, %v1492_v46  ;;  %3558 = vmatprep.subr.bf16.mxu0 %v4138_v2 }
 0x46e   : > { %v1498_v7 = vpack.c.bf16 %v1494_v52, %v1494_v52 }
 0x46f   : > { %3543 = vmatmul.mubr.msk.bf16.vlgmr.msra.gmra.mrb[20].mxu1 %vm479_vm0, %v1496_v9 }
 0x470   : > { %3553 = vmatpush3.bf16.xpose.msra.mxu1 %v4303_v8  ;;  %3554 = vmatprep.mubr.msk.bf16.mxu1 %vm4139_vm1, %v4138_v2 }
 0x471   : > { %3564 = vmatprep.subr.bf16.mxu1 %v4138_v2 }
 0x473   : > { %3549 = vmatmul.mubr.msk.bf16.vlgmr.msra.gmra.mrb[24].mxu0 %vm479_vm0, %v1497_v49 }
 0x474   : > { %3559 = vmatpush3.bf16.msra.mxu0 %v4367_v62  ;;  %3560 = vmatprep.mubr.msk.bf16.mxu0 %vm4139_vm1, %v4138_v2 }
 0x475   : > { %3570 = vmatprep.subr.bf16.mxu0 %v4138_v2 }
 0x477   : > { %3555 = vmatmul.mubr.msk.bf16.vlgmr.msra.gmra.mrb[24].mxu1 %vm479_vm0, %v1498_v7 }
 0x478   : > { %3565 = vmatpush3.bf16.msra.mxu1 %v4373_v63  ;;  %3566 = vmatprep.mubr.msk.bf16.mxu1 %vm4139_vm1, %v4138_v2 }
 0x479   : > { %3576 = vmatprep.subr.bf16.mxu1 %v4138_v2 }
 0x53e   : > { %v1536_v8 = vpop.f32.mrb[20].mxu0 }
 0x53f   : > { %vm1671_vm11 = vcmp.gt.f32.partialorder %v1536_v8, 0.0  ;;  %v1675_v47 = vmul.f32 0.1, %v1536_v8  ;;  %v3538_v53 = vpop.f32.mrb[21].mxu0 }
 0x540   : > { %v1539_v62 = vpop.f32.mrb[22].mxu0 }
 0x541   : > { %v4505_v54 = vsel %vm1671_vm11, %v1536_v8, %v1675_v47  ;;  %v3539_v55 = vpop.f32.mrb[23].mxu0 }
 0x542   : > { %v1683_v56 = vmul.f32 %v4505_v54, %v4505_v54  ;;  %v1579_v10 = vpop.f32.mrb[20].mxu1 }
 0x543   : > { %vm1672_vm12 = vcmp.gt.f32.partialorder %v1579_v10, 0.0  ;;  %v1676_v57 = vmul.f32 0.1, %v1579_v10  ;;  %v3544_v63 = vpop.f32.mrb[21].mxu1 }
 0x544   : > { %v1687_v17 = vsel %vm726_vm4, %v1683_v56, 0.0  ;;  %v1582_v18 = vpop.f32.mrb[22].mxu1 }
 0x545   : > { %v1688_v58 = vrot.slane %v1687_v17, 4  ;;  %v4510_v59 = vsel %vm1672_vm12, %v1579_v10, %v1676_v57  ;;  %v3545_v60 = vpop.f32.mrb[23].mxu1 }
 0x546   : > { %v1684_v61 = vmul.f32 %v4510_v59, %v4510_v59  ;;  %v1622_v3 = vpop.f32.mrb[24].mxu0 }
 0x547   : > { %v1689_v41 = vadd.f32 %v1688_v58, %v1687_v17  ;;  %vm1673_vm13 = vcmp.gt.f32.partialorder %v1622_v3, 0.0  ;;  %v1677_v4 = vmul.f32 0.1, %v1622_v3  ;;  %v3550_v45 = vpop.f32.mrb[25].mxu0 }
 0x548   : > { %v1694_v11 = vsel %vm726_vm4, %v1684_v61, 0.0  ;;  %v1625_v12 = vpop.f32.mrb[26].mxu0 }
 0x549   : > { %v1690_v13 = vrot.slane %v1689_v41, 2  ;;  %v1695_v14 = vrot.slane %v1694_v11, 4  ;;  %v4515_v0 = vsel %vm1673_vm13, %v1622_v3, %v1677_v4  ;;  %v3551_v15 = vpop.f32.mrb[27].mxu0 }
 0x54a   : > { %v1685_v16 = vmul.f32 %v4515_v0, %v4515_v0  ;;  %v1665_v1 = vpop.f32.mrb[24].mxu1 }
 0x54b   : > { %v1691_v20 = vadd.f32 %v1690_v13, %v1689_v41  ;;  %v1696_v21 = vadd.f32 %v1695_v14, %v1694_v11  ;;  %vm1674_vm14 = vcmp.gt.f32.partialorder %v1665_v1, 0.0  ;;  %v1678_v23 = vmul.f32 0.1, %v1665_v1  ;;  %v3556_v5 = vpop.f32.mrb[25].mxu1 }
 0x54c   : > { %v1701_v24 = vsel %vm726_vm4, %v1685_v16, 0.0  ;;  %v1668_v25 = vpop.f32.mrb[26].mxu1 }
 0x54d   : > { %v1692_v26 = vrot.slane %v1691_v20, 1  ;;  %v1697_v27 = vrot.slane %v1696_v21, 2  ;;  %v1702_v6 = vrot.slane %v1701_v24, 4  ;;  %v4520_v28 = vsel %vm1674_vm14, %v1665_v1, %v1678_v23  ;;  %v3557_v29 = vpop.f32.mrb[27].mxu1 }
 0x54e   : > { %v1686_v31 = vmul.f32 %v4520_v28, %v4520_v28 }
 0x54f   : > { %v1693_v32 = vadd.f32 %v1692_v26, %v1691_v20  ;;  %v1698_v34 = vadd.f32 %v1697_v27, %v1696_v21  ;;  %v1703_v35 = vadd.f32 %v1702_v6, %v1701_v24 }
 0x550   : > { %v1708_v36 = vsel %vm726_vm4, %v1686_v31, 0.0 }
 0x551   : > { %3811 = vrsqrt.f32 %v1693_v32  ;;  %v1699_v38 = vrot.slane %v1698_v34, 1  ;;  %v1704_v39 = vrot.slane %v1703_v35, 2  ;;  %v1709_v40 = vrot.slane %v1708_v36, 4 }
 0x552   : > { %vm1717_vm2 = vcmp.eq.f32.partialorder %v1693_v32, inf  ;;  %v1720_v47 = vand.u32 2147483648, %v1693_v32  ;;  %vm1719_vm3 = vcmp.eq.f32.partialorder %v1693_v32, 0.0 }
 0x553   : > { %v1700_v42 = vadd.f32 %v1699_v38, %v1698_v34  ;;  %v1705_v44 = vadd.f32 %v1704_v39, %v1703_v35  ;;  %v1710_v46 = vadd.f32 %v1709_v40, %v1708_v36 }
 0x555   : > { %3813 = vrsqrt.f32 %v1700_v42  ;;  %v1706_v9 = vrot.slane %v1705_v44, 1  ;;  %v1711_v50 = vrot.slane %v1710_v46, 2  ;;  %vm1724_vm5 = vcmp.eq.f32.partialorder %v1700_v42, inf }
 0x556   : > { %v1727_v63 = vand.u32 2147483648, %v1700_v42  ;;  %vm1726_vm6 = vcmp.eq.f32.partialorder %v1700_v42, 0.0 }
 0x557   : > { %v1707_v51 = vadd.f32 %v1706_v9, %v1705_v44  ;;  %v1712_v49 = vadd.f32 %v1711_v50, %v1710_v46 }
 0x559   : > { %3815 = vrsqrt.f32 %v1707_v51  ;;  %v1713_v8 = vrot.slane %v1712_v49, 1  ;;  %vm1731_vm7 = vcmp.eq.f32.partialorder %v1707_v51, inf  ;;  %v1734_v3 = vand.u32 2147483648, %v1707_v51 }
 0x55a   : > { %vm1733_vm8 = vcmp.eq.f32.partialorder %v1707_v51, 0.0 }
 0x55b   : > { %v3812_v52 = vpop.eup %3811  ;;  %v1714_v62 = vadd.f32 %v1713_v8, %v1712_v49 }
 0x55c   : > { %v1716_v7 = vmul.f32 %v3812_v52, %v1693_v32 }
 0x55d   : > { %3817 = vrsqrt.f32 %v1714_v62  ;;  %vm1738_vm9 = vcmp.eq.f32.partialorder %v1714_v62, inf  ;;  %v1741_v14 = vand.u32 2147483648, %v1714_v62  ;;  %vm1740_vm10 = vcmp.eq.f32.partialorder %v1714_v62, 0.0 }
 0x55e   : > { %v1718_v53 = vsel %vm1717_vm2, %v1693_v32, %v1716_v7 }
 0x55f   : > { %v1721_v55 = vsel %vm1719_vm3, %v1720_v47, %v1718_v53  ;;  %v3814_v56 = vpop.eup %3813  ;;  %v4538_v47 = vld [vmem:[%s4308_s15] sm:$0xf]  ;;  %s3298_s15 = sshll.u32 %s5165_s12, 1 }
 0x560   : > { %v1743_v10 = vadd.f32 1e-08, %v1721_v55  ;;  %v1723_v57 = vmul.f32 %v3814_v56, %v1700_v42  ;;  %v4554_v56 = vld [vmem:[%s5286_s0 + $0x4] sm:$0xf]  ;;  %s413_s14 = scalar_lea.vmem [#allocation2], %s3298_s15  ;;  %s5182_s28 = scalar_lea.vmem [#allocation4], %s3298_s15 }
 0x561   : > { %s3162_s16 = sshll.u32 %s413_s14, 4  ;;  %s5178_s16 = int_to_ptr.vmem [resolvable:$true] %s3162_s16 }
 0x562   : > { %3819 = vrcp.f32 %v1743_v10  ;;  %v1725_v17 = vsel %vm1724_vm5, %v1700_v42, %v1723_v57  ;;  %s4026_s23 = scalar_lea.vmem %s5178_s16, 32  ;;  %p4033_p1 = scmp.lt.s32.totalorder %s5178_s16, %s4031_s13 }
 0x563   : > { %v1728_v18 = vsel %vm1726_vm6, %v1727_v63, %v1725_v17  ;;  %v3816_v58 = vpop.eup %3815  ;;  %p4027_p12 = scmp.ne.s32.totalorder %s5178_s16, %s4026_s23  ;;  %p4034_p2 = scmp.lt.s32.totalorder %s4032_s2, %s4026_s23 }
 0x564   : > { %v1744_v60 = vadd.f32 1e-08, %v1728_v18  ;;  %v1730_v61 = vmul.f32 %v3816_v58, %v1707_v51  ;;  %v4573_v18 = vld [vmem:[%s5286_s0 + $0x8] sm:$0xf]  ;;  %v4578_v58 = vld [vmem:[%s5286_s0 + $0xc] sm:$0xf] }
 0x565   : > { %p4028_p13 = pnand %p4027_p12, %p4242_p4  ;;  %p4035_p3 = por %p4034_p2, %p4033_p1 }
 0x566   : > { %3821 = vrcp.f32 %v1744_v60  ;;  %v1732_v41 = vsel %vm1731_vm7, %v1707_v51, %v1730_v61  ;;  %v4582_v60 = vcombine.low %v4573_v18, %v4578_v58 }
 0x567   : > { %v1735_v4 = vsel %vm1733_vm8, %v1734_v3, %v1732_v41  ;;  %v3818_v45 = vpop.eup %3817  ;;  %p4029_p0 = pneg %p4028_p13 }
 0x568   : > { %v1745_v11 = vadd.f32 1e-08, %v1735_v4  ;;  %v1737_v12 = vmul.f32 %v3818_v45, %v1714_v62 }
 0x569   : > { %p4036_p5 = pnand %p4035_p3, %p4029_p0 }
 0x56a   : > { %3823 = vrcp.f32 %v1745_v11  ;;  %v1739_v16 = vsel %vm1738_vm9, %v1714_v62, %v1737_v12 }
 0x56b   : > { %v1742_v1 = vsel %vm1740_vm10, %v1741_v14, %v1739_v16 }
 0x56c   : > { %v3820_v13 = vpop.eup %3819  ;;  %v1746_v21 = vadd.f32 1e-08, %v1742_v1 }
 0x56d   : > { %v1751_v15 = vmul.f32 %v3820_v13, %v4505_v54 }
 0x56e   : > { %3825 = vrcp.f32 %v1746_v21 }
 0x56f   : > { %v1755_v20 = vmul.f32 4.0, %v1751_v15 }
 0x570   : > { %v3822_v23 = vpop.eup %3821 }
 0x571   : > { %v1759_v5 = vmul.f32 1.442695, %v1755_v20  ;;  %v1752_v24 = vmul.f32 %v3822_v23, %v4510_v59 }
 0x573   : > { %3827 = vpow2.f32 %v1759_v5  ;;  %v1756_v25 = vmul.f32 4.0, %v1752_v24 }
 0x574   : > { %v3824_v26 = vpop.eup %3823 }
 0x575   : > { %v1761_v27 = vmul.f32 1.442695, %v1756_v25  ;;  %v1753_v6 = vmul.f32 %v3824_v26, %v4515_v0 }
 0x577   : > { %3829 = vpow2.f32 %v1761_v27  ;;  %v1757_v29 = vmul.f32 4.0, %v1753_v6 }
 0x578   : > { %v3826_v31 = vpop.eup %3825 }
 0x579   : > { %v1763_v54 = vmul.f32 1.442695, %v1757_v29  ;;  %v1754_v32 = vmul.f32 %v3826_v31, %v4520_v28 }
 0x57b   : > { %3831 = vpow2.f32 %v1763_v54  ;;  %v1758_v35 = vmul.f32 4.0, %v1754_v32 }
 0x57d   : > { %v3828_v34 = vpop.eup %3827  ;;  %v1765_v38 = vmul.f32 1.442695, %v1758_v35 }
 0x57e   : > { %v1767_v36 = vsel %vm726_vm4, %v3828_v34, 0.0 }
 0x57f   : > { %1768 = vadd.xlane.f32.xlu0 %v1767_v36  ;;  %3833 = vpow2.f32 %v1765_v38 }
 0x581   : > { %v3830_v59 = vpop.eup %3829 }
 0x582   : > { %v1770_v39 = vsel %vm726_vm4, %v3830_v59, 0.0 }
 0x583   : > { %1771 = vadd.xlane.f32.xlu0 %v1770_v39 }
 0x585   : > { %v3832_v40 = vpop.eup %3831 }
 0x586   : > { %v1773_v0 = vsel %vm726_vm4, %v3832_v40, 0.0 }
 0x587   : > { %1774 = vadd.xlane.f32.xlu1 %v1773_v0 }
 0x589   : > { %v3834_v42 = vpop.eup %3833 }
 0x58a   : > { %v1776_v44 = vsel %vm726_vm4, %v3834_v42, 0.0 }
 0x58b   : > { %1777 = vadd.xlane.f32.xlu1 %v1776_v44 }
 0x60c   : > { %v1769_v28 = vpop.xlane.xlu0 %1768 }
 0x60d   : > { %3835 = vrcp.f32 %v1769_v28 }
 0x610   : > { %v1772_v46 = vpop.xlane.xlu0 %1771 }
 0x611   : > { %3837 = vrcp.f32 %v1772_v46 }
 0x614   : > { %v1775_v9 = vpop.xlane.xlu1 %1774 }
 0x615   : > { %3839 = vrcp.f32 %v1775_v9 }
 0x617   : > { %v3836_v50 = vpop.eup %3835 }
 0x618   : > { %v1783_v51 = vmul.f32 %v3836_v50, %v3828_v34  ;;  %v1778_v52 = vpop.xlane.xlu1 %1777 }
 0x619   : > { %3841 = vrcp.f32 %v1778_v52 }
 0x61a   : > { %v1787_v49 = vpack.c.bf16 %v1783_v51, %v1783_v51 }
 0x61b   : > { %v3838_v7 = vpop.eup %3837 }
 0x61c   : > { %3561 = vmatmul.mubr.msk.bf16.vlgmr.msra.gmra.mrb[28].mxu0 %vm726_vm4, %v1787_v49  ;;  %v1784_v8 = vmul.f32 %v3838_v7, %v3830_v59 }
 0x61d   : > { %3571 = vmatpush3.bf16.msra.mxu0 %v4379_v19  ;;  %3572 = vmatprep.mubr.msk.bf16.mxu0 %vm4139_vm1, %v4138_v2  ;;  %v4549_v19 = vld [vmem:[%s5286_s0] sm:$0xf] }
 0x61e   : > { %3654 = vmatprep.subr.msk.bf16.mxu0 %vm479_vm0, %v4538_v47  ;;  %v1788_v53 = vpack.c.bf16 %v1784_v8, %v1784_v8  ;;  %v4558_v10 = vcombine.low %v4549_v19, %v4554_v56 }
 0x61f   : > { %v3840_v62 = vpop.eup %3839 }
 0x620   : > { %3567 = vmatmul.mubr.msk.bf16.vlgmr.msra.gmra.mrb[28].mxu1 %vm726_vm4, %v1788_v53  ;;  %v1785_v55 = vmul.f32 %v3840_v62, %v3832_v40 }
 0x621   : > { %3577 = vmatpush3.bf16.msra.mxu1 %v4387_v22  ;;  %3578 = vmatprep.mubr.msk.bf16.mxu1 %vm4139_vm1, %v4138_v2  ;;  %v4564_v2 = vsel %vm479_vm0, %v4538_v47, 0 }
 0x622   : > { %3655 = vmatprep.subr.msk.bf16.mxu1 %vm834_vm15, %v4538_v47  ;;  %v1789_v22 = vpack.c.bf16 %v1785_v55, %v1785_v55 }
 0x623   : > { %v3842_v57 = vpop.eup %3841 }
 0x624   : > { %3573 = vmatmul.mubr.msk.bf16.vlgmr.msra.gmra.mrb[32].mxu0 %vm726_vm4, %v1789_v22  ;;  %v1786_v63 = vmul.f32 %v3842_v57, %v3834_v42 }
 0x625   : > { %3584 = vmatprep.mubr.msk.bf16.mxu0 %vm479_vm0, %v4558_v10 }
 0x626   : > { %3583 = vmatpush3.bf16.xpose.msra.mxu0 %v4564_v2  ;;  %v1790_v17 = vpack.c.bf16 %v1786_v63, %v1786_v63 }
 0x628   : > { %3579 = vmatmul.mubr.msk.bf16.vlgmr.msra.gmra.mrb[32].mxu1 %vm726_vm4, %v1790_v17 }
 0x62d   : > { %3585 = vmatmul.mubr.msk.bf16.vlgmr.msra.gmra.mrb[36].mxu0 %vm479_vm0, %v4582_v60 }
 0x6ef   : > { %v4587_v61 = vpop.f32.mrb[28].mxu0 }
 0x6f0   : > { %v3562_v3 = vpop.f32.mrb[29].mxu0 }
 0x6f1   : > { %v1831_v41 = vpop.f32.mrb[30].mxu0 }
 0x6f2   : > { %v3563_v4 = vpop.f32.mrb[31].mxu0 }
 0x6f3   : > { %v4589_v45 = vpop.f32.mrb[28].mxu1 }
 0x6f4   : > { %v3568_v11 = vpop.f32.mrb[29].mxu1 }
 0x6f5   : > { %v1874_v12 = vpop.f32.mrb[30].mxu1 }
 0x6f6   : > { %v3569_v13 = vpop.f32.mrb[31].mxu1 }
 0x6f7   : > { %v4591_v14 = vpop.f32.mrb[32].mxu0 }
 0x6f8   : > { %v3574_v15 = vpop.f32.mrb[33].mxu0 }
 0x6f9   : > { %v1917_v16 = vpop.f32.mrb[34].mxu0 }
 0x6fa   : > { %v3575_v1 = vpop.f32.mrb[35].mxu0 }
 0x6fb   : > { %v4593_v20 = vpop.f32.mrb[32].mxu1 }
 0x6fc   : > { %v3580_v21 = vpop.f32.mrb[33].mxu1 }
 0x6fd   : > { %v1960_v23 = vpop.f32.mrb[34].mxu1 }
 0x6fe   : > { %v3581_v5 = vpop.f32.mrb[35].mxu1 }
 0x700   : > { %v3586_v24 = vpop.f32.mrb[36].mxu0 }
 0x701   : > { %vm2145_vm1 = vcmp.gt.f32.partialorder %v3586_v24, 0.0  ;;  %v2149_v25 = vmul.f32 0.1, %v3586_v24  ;;  %v2128_v26 = vpop.f32.mrb[37].mxu0 }
 0x702   : > { %vm2143_vm11 = vcmp.gt.f32.partialorder %v2128_v26, 0.0  ;;  %v2147_v27 = vmul.f32 0.1, %v2128_v26  ;;  %v3587_v6 = vpop.f32.mrb[38].mxu0 }
 0x703   : > { %v4595_v29 = vsel %vm2145_vm1, %v3586_v24, %v2149_v25  ;;  %vm2146_vm12 = vcmp.gt.f32.partialorder %v3587_v6, 0.0  ;;  %v2150_v31 = vmul.f32 0.1, %v3587_v6  ;;  %v2131_v54 = vpop.f32.mrb[39].mxu0 }
 0x704   : > { %v2157_v32 = vmul.f32 %v4595_v29, %v4595_v29  ;;  %v4599_v34 = vsel %vm2143_vm11, %v2128_v26, %v2147_v27  ;;  %vm2144_vm13 = vcmp.gt.f32.partialorder %v2131_v54, 0.0  ;;  %v2148_v35 = vmul.f32 0.1, %v2131_v54 }
 0x705   : > { %v2155_v36 = vmul.f32 %v4599_v34, %v4599_v34  ;;  %v4603_v38 = vsel %vm2146_vm12, %v3587_v6, %v2150_v31 }
 0x706   : > { %v2173_v59 = vsel %vm726_vm4, %v2157_v32, 0.0  ;;  %v2158_v39 = vmul.f32 %v4603_v38, %v4603_v38  ;;  %v4608_v40 = vsel %vm2144_vm13, %v2131_v54, %v2148_v35 }
 0x707   : > { %v2174_v0 = vrot.slane %v2173_v59, 4  ;;  %v2159_v42 = vsel %vm726_vm4, %v2155_v36, 0.0  ;;  %v2156_v44 = vmul.f32 %v4608_v40, %v4608_v40 }
 0x708   : > { %v2160_v28 = vrot.slane %v2159_v42, 4  ;;  %v2180_v46 = vsel %vm726_vm4, %v2158_v39, 0.0 }
 0x709   : > { %v2175_v9 = vadd.f32 %v2174_v0, %v2173_v59  ;;  %v2181_v50 = vrot.slane %v2180_v46, 4  ;;  %v2166_v51 = vsel %vm726_vm4, %v2156_v44, 0.0 }
 0x70a   : > { %v2161_v49 = vadd.f32 %v2160_v28, %v2159_v42  ;;  %v2167_v52 = vrot.slane %v2166_v51, 4 }
 0x70b   : > { %v2176_v7 = vrot.slane %v2175_v9, 2  ;;  %v2182_v8 = vadd.f32 %v2181_v50, %v2180_v46 }
 0x70c   : > { %v2162_v53 = vrot.slane %v2161_v49, 2  ;;  %v2168_v62 = vadd.f32 %v2167_v52, %v2166_v51 }
 0x70d   : > { %v2177_v55 = vadd.f32 %v2176_v7, %v2175_v9  ;;  %v2183_v22 = vrot.slane %v2182_v8, 2 }
 0x70e   : > { %v2163_v57 = vadd.f32 %v2162_v53, %v2161_v49  ;;  %v2169_v63 = vrot.slane %v2168_v62, 2 }
 0x70f   : > { %v2178_v17 = vrot.slane %v2177_v55, 1  ;;  %v2184_v3 = vadd.f32 %v2183_v22, %v2182_v8 }
 0x710   : > { %v2164_v41 = vrot.slane %v2163_v57, 1  ;;  %v2170_v4 = vadd.f32 %v2169_v63, %v2168_v62 }
 0x711   : > { %v2179_v11 = vadd.f32 %v2178_v17, %v2177_v55  ;;  %v2185_v12 = vrot.slane %v2184_v3, 1 }
 0x712   : > { %v2165_v13 = vadd.f32 %v2164_v41, %v2163_v57  ;;  %v2171_v15 = vrot.slane %v2170_v4, 1 }
 0x713   : > { %3843 = vrsqrt.f32 %v2179_v11  ;;  %v2186_v16 = vadd.f32 %v2185_v12, %v2184_v3  ;;  %vm2203_vm14 = vcmp.eq.f32.partialorder %v2179_v11, inf  ;;  %v2206_v24 = vand.u32 2147483648, %v2179_v11 }
 0x714   : > { %3845 = vrsqrt.f32 %v2165_v13  ;;  %v2172_v1 = vadd.f32 %v2171_v15, %v2170_v4  ;;  %vm2205_vm2 = vcmp.eq.f32.partialorder %v2179_v11, 0.0  ;;  %vm2189_vm3 = vcmp.eq.f32.partialorder %v2165_v13, inf }
 0x715   : > { %3847 = vrsqrt.f32 %v2186_v16  ;;  %v2192_v27 = vand.u32 2147483648, %v2165_v13  ;;  %vm2191_vm5 = vcmp.eq.f32.partialorder %v2165_v13, 0.0  ;;  %vm2210_vm6 = vcmp.eq.f32.partialorder %v2186_v16, inf }
 0x716   : > { %3849 = vrsqrt.f32 %v2172_v1  ;;  %vm2212_vm7 = vcmp.eq.f32.partialorder %v2186_v16, 0.0  ;;  %v2213_v0 = vand.u32 2147483648, %v2186_v16  ;;  %vm2196_vm8 = vcmp.eq.f32.partialorder %v2172_v1, inf }
 0x717   : > { %v2199_v28 = vand.u32 2147483648, %v2172_v1  ;;  %vm2198_vm9 = vcmp.eq.f32.partialorder %v2172_v1, 0.0 }
 0x71d   : > { %v3844_v21 = vpop.eup %3843 }
 0x71e   : > { %v3846_v23 = vpop.eup %3845  ;;  %v2202_v5 = vmul.f32 %v3844_v21, %v2179_v11 }
 0x71f   : > { %v2188_v25 = vmul.f32 %v3846_v23, %v2165_v13  ;;  %v3848_v6 = vpop.eup %3847  ;;  %v2267_v23 = vsel %vm834_vm15, %v4538_v47, 0 }
 0x720   : > { %v2204_v26 = vsel %vm2203_vm14, %v2179_v11, %v2202_v5  ;;  %v3850_v32 = vpop.eup %3849  ;;  %v2209_v59 = vmul.f32 %v3848_v6, %v2186_v16  ;;  %3589 = vmatpush3.bf16.msra.mxu1 %v2267_v23  ;;  %v3731_v5 = vld [vmem:[%s5273_s6 + $0x10] sm:$0xff]  }
 0x721   : > { %v2207_v31 = vsel %vm2205_vm2, %v2206_v24, %v2204_v26  ;;  %v2190_v54 = vsel %vm2189_vm3, %v2165_v13, %v2188_v25  ;;  %v2195_v42 = vmul.f32 %v3850_v32, %v2172_v1  ;;  %v3732_v24 = vld [vmem:[%s5275_s8 + $0x10] sm:$0xff]   ;;  %3594 = vmatprep.subr.bf16.mxu0 %v3731_v5 }
 0x722   : > { %v2217_v35 = vadd.f32 1e-08, %v2207_v31  ;;  %v2193_v36 = vsel %vm2191_vm5, %v2192_v27, %v2190_v54  ;;  %v2211_v44 = vsel %vm2210_vm6, %v2186_v16, %v2209_v59  ;;  %3610 = vmatprep.subr.bf16.mxu1 %v3732_v24  ;;  %3595 = vmatpush3.bf16.msra.mxu0 %v3731_v5 }
 0x723   : > { %v2215_v39 = vadd.f32 1e-08, %v2193_v36  ;;  %v2214_v46 = vsel %vm2212_vm7, %v2213_v0, %v2211_v44  ;;  %v2197_v9 = vsel %vm2196_vm8, %v2172_v1, %v2195_v42 }
 0x724   : > { %3851 = vrcp.f32 %v2217_v35  ;;  %v2218_v50 = vadd.f32 1e-08, %v2214_v46  ;;  %v2200_v51 = vsel %vm2198_vm9, %v2199_v28, %v2197_v9  ;;  %v3733_v28 = vld [vmem:[%s5273_s6 + $0x18] sm:$0xff]   ;;  %v3735_v9 = vld [vmem:[%s5275_s8] sm:$0xff]  }
 0x725   : > { %3853 = vrcp.f32 %v2215_v39  ;;  %v2216_v49 = vadd.f32 1e-08, %v2200_v51  ;;  %v3734_v46 = vld [vmem:[%s5275_s8 + $0x18] sm:$0xff]   ;;  %3596 = vmatprep.subr.bf16.mxu0 %v3733_v28 }
 0x726   : > { %3855 = vrcp.f32 %v2218_v50  ;;  %3597 = vmatpush3.bf16.msra.mxu0 %v3733_v28  ;;  %v3736_v50 = vld [vmem:[%s5273_s6] sm:$0xff]  }
 0x727   : > { %3857 = vrcp.f32 %v2216_v49  ;;  %3602 = vmatprep.subr.bf16.mxu0 %v3736_v50 }
 0x72e   : > { %v3852_v52 = vpop.eup %3851 }
 0x72f   : > { %v3854_v7 = vpop.eup %3853  ;;  %v2225_v8 = vmul.f32 %v3852_v52, %v4595_v29 }
 0x730   : > { %v2223_v53 = vmul.f32 %v3854_v7, %v4599_v34  ;;  %v3856_v55 = vpop.eup %3855 }
 0x731   : > { %v2229_v62 = vmul.f32 4.0, %v2225_v8  ;;  %v3858_v57 = vpop.eup %3857  ;;  %v2226_v63 = vmul.f32 %v3856_v55, %v4603_v38  ;;  %v3738_v55 = vld [vmem:[%s5273_s6 + $0x8] sm:$0xff]  }
 0x732   : > { %v2227_v22 = vmul.f32 4.0, %v2223_v53  ;;  %v2224_v41 = vmul.f32 %v3858_v57, %v4608_v40 }
 0x733   : > { %v2235_v17 = vmul.f32 1.442695, %v2229_v62  ;;  %v2230_v4 = vmul.f32 4.0, %v2226_v63  ;;  %v3737_v62 = vld [vmem:[%s5275_s8 + $0x8] sm:$0xff]  }
 0x734   : > { %v2231_v3 = vmul.f32 1.442695, %v2227_v22  ;;  %v2228_v11 = vmul.f32 4.0, %v2224_v41 }
 0x735   : > { %v2237_v12 = vmul.f32 1.442695, %v2230_v4 }
 0x736   : > { %3859 = vpow2.f32 %v2231_v3  ;;  %v2233_v13 = vmul.f32 1.442695, %v2228_v11 }
 0x737   : > { %3861 = vpow2.f32 %v2235_v17 }
 0x738   : > { %3863 = vpow2.f32 %v2233_v13 }
 0x739   : > { %3865 = vpow2.f32 %v2237_v12 }
 0x740   : > { %v3860_v29 = vpop.eup %3859 }
 0x741   : > { %v2239_v34 = vsel %vm726_vm4, %v3860_v29, 0.0  ;;  %v3862_v15 = vpop.eup %3861 }
 0x742   : > { %2240 = vadd.xlane.f32.xlu0 %v2239_v34  ;;  %v3864_v16 = vpop.eup %3863  ;;  %v2245_v1 = vsel %vm726_vm4, %v3862_v15, 0.0 }
 0x743   : > { %v2242_v38 = vsel %vm726_vm4, %v3864_v16, 0.0  ;;  %v3866_v21 = vpop.eup %3865 }
 0x744   : > { %2243 = vadd.xlane.f32.xlu1 %v2242_v38  ;;  %v2248_v40 = vsel %vm726_vm4, %v3866_v21, 0.0 }
 0x746   : > { %2246 = vadd.xlane.f32.xlu0 %v2245_v1 }
 0x748   : > { %2249 = vadd.xlane.f32.xlu1 %v2248_v40 }
 0x7cf   : > { %v2241_v25 = vpop.xlane.xlu0 %2240 }
 0x7d0   : > { %3867 = vrcp.f32 %v2241_v25 }
 0x7d1   : > { %v2244_v26 = vpop.xlane.xlu1 %2243 }
 0x7d2   : > { %3869 = vrcp.f32 %v2244_v26 }
 0x7d3   : > { %v2247_v27 = vpop.xlane.xlu0 %2246 }
 0x7d4   : > { %3871 = vrcp.f32 %v2247_v27 }
 0x7d5   : > { %v2250_v6 = vpop.xlane.xlu1 %2249 }
 0x7d6   : > { %3873 = vrcp.f32 %v2250_v6 }
 0x7da   : > { %v3868_v31 = vpop.eup %3867 }
 0x7db   : > { %v2255_v32 = vmul.f32 %v3868_v31, %v3860_v29 }
 0x7dc   : > { %v3870_v54 = vpop.eup %3869 }
 0x7dd   : > { %v2256_v35 = vmul.f32 %v3870_v54, %v3864_v16  ;;  %v3354_v16 = vld [vmem:[%s5274_s7] ss:$0 sm:$0xff] }
 0x7de   : > { %v3872_v36 = vpop.eup %3871 }
 0x7df   : > { %v2259_v59 = vpack.c.bf16 %v2256_v35, %v2255_v32  ;;  %v2257_v0 = vmul.f32 %v3872_v36, %v3862_v15  ;;  %v4687_v36 = vunpack.c.l.bf16 %v4573_v18 }
 0x7e0   : > { %v3874_v39 = vpop.eup %3873 }
 0x7e1   : > { %v2258_v42 = vmul.f32 %v3874_v39, %v3866_v21  ;;  %3590 = vmatprep.mubr.msk.bf16.mxu1 %vm726_vm4, %v2259_v59 }
 0x7e3   : > { %v2260_v44 = vpack.c.bf16 %v2258_v42, %v2257_v0  ;;  %v4690_v0 = vunpack.c.l.bf16 %v4549_v19 }
 0x7e5   : > { %3591 = vmatmul.mubr.msk.bf16.vlgmr.msra.gmra.mrb[36].mxu1 %vm726_vm4, %v2260_v44 }
 0x7e6   : > { %3611 = vmatpush3.bf16.msra.mxu1 %v3732_v24 }
 0x7e7   : > { %3612 = vmatprep.subr.bf16.mxu1 %v3734_v46 }
 0x7ea   : > { %3613 = vmatpush3.bf16.msra.mxu1 %v3734_v46 }
 0x7eb   : > { %3618 = vmatprep.subr.bf16.mxu1 %v3735_v9 }
 0x8b8   : > { %v4645_v51 = vpop.f32.mrb[36].mxu1 }
 0x8b9   : > { %v4647_v49 = vpop.f32.mrb[37].mxu1 }
 0x8ba   : > { %v4649_v52 = vpop.f32.mrb[38].mxu1 }
 0x8bb   : > { %v2423_v7 = vpack.c.bf16 %v4649_v52, %v4645_v51  ;;  %v4653_v8 = vpop.f32.mrb[39].mxu1 }
 0x8bc   : > { %v2422_v53 = vpack.c.bf16 %v4653_v8, %v4647_v49 }
 0x8be   : > { %3598 = vmatprep.mubr.msk.bf16.mxu0 %vm479_vm0, %v2422_v53  ;;  %3614 = vmatprep.mubr.msk.bf16.mxu1 %vm479_vm0, %v2422_v53 }
 0x8bf   : > { %3599 = vmatmul.mubr.msk.bf16.vlgmr.msra.gmra.mrb[40].mxu0 %vm479_vm0, %v2423_v7  ;;  %3615 = vmatmul.mubr.msk.bf16.vlgmr.msra.gmra.mrb[40].mxu1 %vm479_vm0, %v2423_v7 }
 0x8c0   : > { %3619 = vmatpush3.bf16.msra.mxu1 %v3735_v9  ;;  %3603 = vmatpush3.bf16.msra.mxu0 %v3736_v50  ;;  %v4694_v50 = vunpack.c.l.bf16 %v4578_v58 }
 0x8c1   : > { %3620 = vmatprep.subr.bf16.mxu1 %v3737_v62  ;;  %3604 = vmatprep.subr.bf16.mxu0 %v3738_v55 }
 0x8c2   : > { %3606 = vmatprep.mubr.msk.bf16.mxu0 %vm479_vm0, %v4558_v10  ;;  %3622 = vmatprep.mubr.msk.bf16.mxu1 %vm479_vm0, %v4558_v10  ;;  %v3363_v10 = vld [vmem:[%s5276_s9] ss:$0 sm:$0xff] }
 0x8c4   : > { %3621 = vmatpush3.bf16.msra.mxu1 %v3737_v62  ;;  %3605 = vmatpush3.bf16.msra.mxu0 %v3738_v55  ;;  %v4698_v55 = vunpack.c.l.bf16 %v4554_v56 }
 0x8c5   : > { %3656 = vmatprep.subr.msk.bf16.mxu0 %vm479_vm0, %v4538_v47  ;;  %3657 = vmatprep.subr.msk.bf16.mxu1 %vm834_vm15, %v4538_v47 }
 0x8cb   : > { %3607 = vmatmul.mubr.msk.bf16.vlgmr.msra.gmra.mrb[40].mxu0 %vm479_vm0, %v4582_v60  ;;  %3623 = vmatmul.mubr.msk.bf16.vlgmr.msra.gmra.mrb[40].mxu1 %vm479_vm0, %v4582_v60 }
 0x8cc   : > { %3633 = vmatpush3.bf16.msra.mxu1 %v2267_v23 }
 0x8cd   : > { %3627 = vmatpush3.bf16.xpose.msra.mxu0 %v4564_v2 }
 0x99e   : > { %v3608_v22 = vpop.f32.mrb[40].mxu0  ;;  %v3624_v57 = vpop.f32.mrb[40].mxu1 }
 0x99f   : > { %v2696_v63 = vadd.f32 %v3624_v57, %v3363_v10  ;;  %v2537_v17 = vpop.f32.mrb[41].mxu0  ;;  %v2673_v3 = vpop.f32.mrb[41].mxu1  ;;  %v2560_v38 = vadd.f32 %v3608_v22, %v3354_v16 }
 0x9a0   : > { %v2694_v41 = vadd.f32 %v3363_v10, %v2673_v3  ;;  %v3609_v47 = vpop.f32.mrb[42].mxu0  ;;  %v3625_v4 = vpop.f32.mrb[42].mxu1  ;;  %v2558_v23 = vadd.f32 %v3354_v16, %v2537_v17 }
 0x9a1   : > { %v3366_v11 = vmul.f32 -1.442695, %v2696_v63  ;;  %v2697_v12 = vadd.f32 %v3625_v4, %v3363_v10  ;;  %v2540_v13 = vpop.f32.mrb[43].mxu0  ;;  %v2676_v29 = vpop.f32.mrb[43].mxu1  ;;  %v2561_v25 = vadd.f32 %v3609_v47, %v3354_v16 }
 0x9a2   : > { %v3364_v60 = vmul.f32 -1.442695, %v2694_v41  ;;  %v2695_v34 = vadd.f32 %v3363_v10, %v2676_v29  ;;  %v2559_v6 = vadd.f32 %v3354_v16, %v2540_v13 }
 0x9a3   : > { %3875 = vpow2.f32 %v3366_v11  ;;  %v3367_v2 = vmul.f32 -1.442695, %v2697_v12 }
 0x9a4   : > { %3877 = vpow2.f32 %v3364_v60  ;;  %v3365_v15 = vmul.f32 -1.442695, %v2695_v34 }
 0x9a5   : > { %3879 = vpow2.f32 %v3367_v2 }
 0x9a6   : > { %3881 = vpow2.f32 %v3365_v15 }
 0x9a7   : > { %3883 = vtanh.f32 %v2560_v38 }
 0x9ad   : > { %v3876_v1 = vpop.eup %3875 }
 0x9ae   : > { %v3878_v21 = vpop.eup %3877  ;;  %v2712_v40 = vadd.f32 1.0, %v3876_v1 }
 0x9af   : > { %v2710_v5 = vadd.f32 1.0, %v3878_v21  ;;  %v3880_v24 = vpop.eup %3879 }
 0x9b0   : > { %3885 = vrcp.f32 %v2712_v40  ;;  %v2713_v26 = vadd.f32 1.0, %v3880_v24  ;;  %v3882_v27 = vpop.eup %3881 }
 0x9b1   : > { %3887 = vrcp.f32 %v2710_v5  ;;  %v2711_v31 = vadd.f32 1.0, %v3882_v27  ;;  %v3884_v54 = vpop.eup %3883 }
 0x9b2   : > { %3889 = vtanh.f32 %v2558_v23 }
 0x9b3   : > { %3891 = vrcp.f32 %v2713_v26 }
 0x9b4   : > { %3893 = vtanh.f32 %v2561_v25 }
 0x9b5   : > { %3895 = vrcp.f32 %v2711_v31 }
 0x9b6   : > { %3897 = vtanh.f32 %v2559_v6 }
 0x9ba   : > { %v3886_v32 = vpop.eup %3885 }
 0x9bb   : > { %v3888_v35 = vpop.eup %3887  ;;  %v2728_v59 = vsub.f32 1.0, %v3886_v32  ;;  %v2724_v28 = vmul.f32 %v3886_v32, %v4687_v36 }
 0x9bc   : > { %v3890_v39 = vpop.eup %3889  ;;  %v2726_v42 = vsub.f32 1.0, %v3888_v35  ;;  %v2722_v7 = vmul.f32 %v3888_v35, %v4690_v0 }
 0x9bd   : > { %v3892_v44 = vpop.eup %3891  ;;  %v2732_v46 = vmul.f32 %v3884_v54, %v2728_v59 }
 0x9be   : > { %v3894_v9 = vpop.eup %3893  ;;  %v2730_v53 = vmul.f32 %v3890_v39, %v2726_v42  ;;  %v2729_v62 = vsub.f32 1.0, %v3892_v44  ;;  %v2725_v57 = vmul.f32 %v3892_v44, %v4694_v50 }
 0x9bf   : > { %v3896_v18 = vpop.eup %3895  ;;  %v4700_v10 = vadd.f32 %v2732_v46, %v2724_v28 }
 0x9c0   : > { %v4702_v19 = vadd.f32 %v2730_v53, %v2722_v7  ;;  %v2727_v22 = vsub.f32 1.0, %v3896_v18  ;;  %v2733_v63 = vmul.f32 %v3894_v9, %v2729_v62  ;;  %v3898_v17 = vpop.eup %3897  ;;  %v2723_v3 = vmul.f32 %v3896_v18, %v4698_v55 }
 0x9c1   : > { %v2740_v11 = vmul.f32 %v4700_v10, %v4700_v10 }
 0x9c2   : > { %v2738_v58 = vmul.f32 %v4702_v19, %v4702_v19  ;;  %v2731_v41 = vmul.f32 %v3898_v17, %v2727_v22  ;;  %v4708_v47 = vadd.f32 %v2733_v63, %v2725_v57 }
 0x9c3   : > { %v2748_v29 = vsel %vm479_vm0, %v2740_v11, 0.0 }
 0x9c4   : > { %v2742_v56 = vsel %vm479_vm0, %v2738_v58, 0.0  ;;  %v2735_v4 = vadd.f32 %v2731_v41, %v2723_v3  ;;  %v2741_v60 = vmul.f32 %v4708_v47, %v4708_v47 }
 0x9c5   : > { %2743 = vadd.xlane.f32.xlu0 %v2742_v56 }
 0x9c6   : > { %v2739_v12 = vmul.f32 %v2735_v4, %v2735_v4  ;;  %v2751_v34 = vsel %vm479_vm0, %v2741_v60, 0.0 }
 0x9c8   : > { %v2745_v13 = vsel %vm479_vm0, %v2739_v12, 0.0 }
 0x9c9   : > { %2746 = vadd.xlane.f32.xlu1 %v2745_v13  ;;  %2749 = vadd.xlane.f32.xlu0 %v2748_v29 }
 0x9cd   : > { %2752 = vadd.xlane.f32.xlu1 %v2751_v34 }
 0xa52   : > { %v2744_v2 = vpop.xlane.xlu0 %2743 }
 0xa53   : > { %3899 = vrsqrt.f32 %v2744_v2  ;;  %vm2756_vm15 = vcmp.eq.f32.partialorder %v2744_v2, inf  ;;  %v2759_v40 = vand.u32 2147483648, %v2744_v2  ;;  %vm2758_vm10 = vcmp.eq.f32.partialorder %v2744_v2, 0.0 }
 0xa56   : > { %v2747_v15 = vpop.xlane.xlu1 %2746  ;;  %v2750_v16 = vpop.xlane.xlu0 %2749 }
 0xa57   : > { %3901 = vrsqrt.f32 %v2747_v15  ;;  %vm2763_vm1 = vcmp.eq.f32.partialorder %v2747_v15, inf  ;;  %v2766_v6 = vand.u32 2147483648, %v2747_v15  ;;  %vm2765_vm11 = vcmp.eq.f32.partialorder %v2747_v15, 0.0 }
 0xa58   : > { %3903 = vrsqrt.f32 %v2750_v16  ;;  %vm2770_vm12 = vcmp.eq.f32.partialorder %v2750_v16, inf  ;;  %v2773_v32 = vand.u32 2147483648, %v2750_v16  ;;  %vm2772_vm13 = vcmp.eq.f32.partialorder %v2750_v16, 0.0 }
 0xa5a   : > { %v2753_v38 = vpop.xlane.xlu1 %2752 }
 0xa5b   : > { %3905 = vrsqrt.f32 %v2753_v38  ;;  %vm2777_vm14 = vcmp.eq.f32.partialorder %v2753_v38, inf  ;;  %v2780_v9 = vand.u32 2147483648, %v2753_v38  ;;  %vm2779_vm2 = vcmp.eq.f32.partialorder %v2753_v38, 0.0 }
 0xa5d   : > { %v3900_v1 = vpop.eup %3899 }
 0xa5e   : > { %v2755_v21 = vmul.f32 %v3900_v1, %v2744_v2 }
 0xa60   : > { %v2757_v23 = vsel %vm2756_vm15, %v2744_v2, %v2755_v21 }
 0xa61   : > { %v3902_v5 = vpop.eup %3901  ;;  %v2760_v24 = vsel %vm2758_vm10, %v2759_v40, %v2757_v23 }
 0xa62   : > { %v3904_v25 = vpop.eup %3903  ;;  %v2782_v26 = vadd.f32 1e-08, %v2760_v24  ;;  %v2762_v27 = vmul.f32 %v3902_v5, %v2747_v15 }
 0xa63   : > { %v2769_v31 = vmul.f32 %v3904_v25, %v2750_v16 }
 0xa64   : > { %v2764_v54 = vsel %vm2763_vm1, %v2747_v15, %v2762_v27  ;;  %3907 = vrcp.f32 %v2782_v26 }
 0xa65   : > { %v3906_v35 = vpop.eup %3905  ;;  %v2767_v59 = vsel %vm2765_vm11, %v2766_v6, %v2764_v54  ;;  %v2771_v39 = vsel %vm2770_vm12, %v2750_v16, %v2769_v31 }
 0xa66   : > { %v2783_v42 = vadd.f32 1e-08, %v2767_v59  ;;  %v2774_v44 = vsel %vm2772_vm13, %v2773_v32, %v2771_v39  ;;  %v2776_v28 = vmul.f32 %v3906_v35, %v2753_v38 }
 0xa67   : > { %v2784_v46 = vadd.f32 1e-08, %v2774_v44 }
 0xa68   : > { %3909 = vrcp.f32 %v2783_v42  ;;  %v2778_v7 = vsel %vm2777_vm14, %v2753_v38, %v2776_v28 }
 0xa69   : > { %v2781_v53 = vsel %vm2779_vm2, %v2780_v9, %v2778_v7  ;;  %3911 = vrcp.f32 %v2784_v46 }
 0xa6a   : > { %v2785_v62 = vadd.f32 1e-08, %v2781_v53 }
 0xa6c   : > { %3913 = vrcp.f32 %v2785_v62 }
 0xa6e   : > { %v3908_v18 = vpop.eup %3907 }
 0xa6f   : > { %v2790_v57 = vmul.f32 %v3908_v18, %v4702_v19 }
 0xa72   : > { %v3910_v22 = vpop.eup %3909 }
 0xa73   : > { %v2791_v63 = vmul.f32 %v3910_v22, %v2735_v4  ;;  %v3912_v17 = vpop.eup %3911 }
 0xa74   : > { %v2792_v41 = vmul.f32 %v3912_v17, %v4700_v10 }
 0xa75   : > { %v2794_v58 = vpack.c.bf16 %v2791_v63, %v2790_v57 }
 0xa76   : > { %v3914_v3 = vpop.eup %3913 }
 0xa77   : > { %3628 = vmatprep.mubr.msk.bf16.mxu0 %vm479_vm0, %v2794_v58  ;;  %v2793_v56 = vmul.f32 %v3914_v3, %v4708_v47 }
 0xa79   : > { %v2795_v11 = vpack.c.bf16 %v2793_v56, %v2792_v41 }
 0xa7b   : > { %3629 = vmatmul.mubr.msk.bf16.vlgmr.msra.gmra.mrb[44].mxu0 %vm479_vm0, %v2795_v11 }
 0xb4e   : > { %v3630_v12 = vpop.f32.mrb[44].mxu0 }
 0xb4f   : > { %vm2853_vm3 = vcmp.gt.f32.partialorder %v3630_v12, 0.0  ;;  %v2857_v13 = vmul.f32 0.1, %v3630_v12  ;;  %v2836_v29 = vpop.f32.mrb[45].mxu0 }
 0xb50   : > { %vm2851_vm5 = vcmp.gt.f32.partialorder %v2836_v29, 0.0  ;;  %v2855_v60 = vmul.f32 0.1, %v2836_v29  ;;  %v3631_v19 = vpop.f32.mrb[46].mxu0 }
 0xb51   : > { %v4723_v4 = vsel %vm2853_vm3, %v3630_v12, %v2857_v13  ;;  %vm2854_vm6 = vcmp.gt.f32.partialorder %v3631_v19, 0.0  ;;  %v2858_v34 = vmul.f32 0.1, %v3631_v19  ;;  %v2839_v2 = vpop.f32.mrb[47].mxu0 }
 0xb52   : > { %v2865_v10 = vmul.f32 %v4723_v4, %v4723_v4  ;;  %v4727_v15 = vsel %vm2851_vm5, %v2836_v29, %v2855_v60  ;;  %vm2852_vm7 = vcmp.gt.f32.partialorder %v2839_v2, 0.0  ;;  %v2856_v47 = vmul.f32 0.1, %v2839_v2 }
 0xb53   : > { %v2863_v16 = vmul.f32 %v4727_v15, %v4727_v15  ;;  %v4731_v38 = vsel %vm2854_vm6, %v3631_v19, %v2858_v34 }
 0xb54   : > { %v2881_v1 = vsel %vm726_vm4, %v2865_v10, 0.0  ;;  %v2866_v21 = vmul.f32 %v4731_v38, %v4731_v38  ;;  %v4736_v40 = vsel %vm2852_vm7, %v2839_v2, %v2856_v47 }
 0xb55   : > { %v2882_v23 = vrot.slane %v2881_v1, 4  ;;  %v2867_v5 = vsel %vm726_vm4, %v2863_v16, 0.0  ;;  %v2864_v24 = vmul.f32 %v4736_v40, %v4736_v40 }
 0xb56   : > { %v2868_v25 = vrot.slane %v2867_v5, 4  ;;  %v2888_v26 = vsel %vm726_vm4, %v2866_v21, 0.0 }
 0xb57   : > { %v2883_v27 = vadd.f32 %v2882_v23, %v2881_v1  ;;  %v2889_v6 = vrot.slane %v2888_v26, 4  ;;  %v2874_v31 = vsel %vm726_vm4, %v2864_v24, 0.0 }
 0xb58   : > { %v2869_v54 = vadd.f32 %v2868_v25, %v2867_v5  ;;  %v2875_v32 = vrot.slane %v2874_v31, 4 }
 0xb59   : > { %v2884_v35 = vrot.slane %v2883_v27, 2  ;;  %v2890_v59 = vadd.f32 %v2889_v6, %v2888_v26 }
 0xb5a   : > { %v2870_v39 = vrot.slane %v2869_v54, 2  ;;  %v2876_v42 = vadd.f32 %v2875_v32, %v2874_v31 }
 0xb5b   : > { %v2885_v44 = vadd.f32 %v2884_v35, %v2883_v27  ;;  %v2891_v28 = vrot.slane %v2890_v59, 2 }
 0xb5c   : > { %v2871_v46 = vadd.f32 %v2870_v39, %v2869_v54  ;;  %v2877_v9 = vrot.slane %v2876_v42, 2 }
 0xb5d   : > { %v2886_v7 = vrot.slane %v2885_v44, 1  ;;  %v2892_v53 = vadd.f32 %v2891_v28, %v2890_v59 }
 0xb5e   : > { %v2872_v62 = vrot.slane %v2871_v46, 1  ;;  %v2878_v18 = vadd.f32 %v2877_v9, %v2876_v42 }
 0xb5f   : > { %v2887_v22 = vadd.f32 %v2886_v7, %v2885_v44  ;;  %v2893_v57 = vrot.slane %v2892_v53, 1 }
 0xb60   : > { %v2873_v63 = vadd.f32 %v2872_v62, %v2871_v46  ;;  %v2879_v17 = vrot.slane %v2878_v18, 1 }
 0xb61   : > { %3915 = vrsqrt.f32 %v2887_v22  ;;  %v2894_v58 = vadd.f32 %v2893_v57, %v2892_v53  ;;  %vm2911_vm8 = vcmp.eq.f32.partialorder %v2887_v22, inf  ;;  %v2914_v12 = vand.u32 2147483648, %v2887_v22 }
 0xb62   : > { %3917 = vrsqrt.f32 %v2873_v63  ;;  %v2880_v3 = vadd.f32 %v2879_v17, %v2878_v18  ;;  %vm2913_vm9 = vcmp.eq.f32.partialorder %v2887_v22, 0.0  ;;  %vm2897_vm15 = vcmp.eq.f32.partialorder %v2873_v63, inf }
 0xb63   : > { %3919 = vrsqrt.f32 %v2894_v58  ;;  %v2900_v60 = vand.u32 2147483648, %v2873_v63  ;;  %vm2899_vm10 = vcmp.eq.f32.partialorder %v2873_v63, 0.0  ;;  %vm2918_vm1 = vcmp.eq.f32.partialorder %v2894_v58, inf }
 0xb64   : > { %3921 = vrsqrt.f32 %v2880_v3  ;;  %vm2920_vm11 = vcmp.eq.f32.partialorder %v2894_v58, 0.0  ;;  %v2921_v23 = vand.u32 2147483648, %v2894_v58  ;;  %vm2904_vm12 = vcmp.eq.f32.partialorder %v2880_v3, inf }
 0xb65   : > { %v2907_v25 = vand.u32 2147483648, %v2880_v3  ;;  %vm2906_vm13 = vcmp.eq.f32.partialorder %v2880_v3, 0.0 }
 0xb6b   : > { %v3916_v41 = vpop.eup %3915 }
 0xb6c   : > { %v3918_v56 = vpop.eup %3917  ;;  %v2910_v11 = vmul.f32 %v3916_v41, %v2887_v22 }
 0xb6d   : > { %v2896_v13 = vmul.f32 %v3918_v56, %v2873_v63  ;;  %v3920_v19 = vpop.eup %3919 }
 0xb6e   : > { %v2912_v29 = vsel %vm2911_vm8, %v2887_v22, %v2910_v11  ;;  %v3922_v10 = vpop.eup %3921  ;;  %v2917_v1 = vmul.f32 %v3920_v19, %v2894_v58  ;;  %v490_v11 = vmul.f32 %v4690_v0, %v4690_v0  ;;  %v1028_v19 = vmul.f32 %v4413_v33, %v4413_v33 }
 0xb6f   : > { %v2915_v34 = vsel %vm2913_vm9, %v2914_v12, %v2912_v29  ;;  %v2898_v2 = vsel %vm2897_vm15, %v2873_v63, %v2896_v13  ;;  %v2903_v5 = vmul.f32 %v3922_v10, %v2880_v3  ;;  %v491_v12 = vmul.f32 %v4698_v55, %v4698_v55 }
 0xb70   : > { %v2925_v47 = vadd.f32 1e-08, %v2915_v34  ;;  %v2901_v16 = vsel %vm2899_vm10, %v2900_v60, %v2898_v2  ;;  %v2919_v24 = vsel %vm2918_vm1, %v2894_v58, %v2917_v1  ;;  %v494_v29 = vsel %vm479_vm0, %v490_v11, 0.0 }
 0xb71   : > { %v2923_v21 = vadd.f32 1e-08, %v2901_v16  ;;  %v2922_v26 = vsel %vm2920_vm11, %v2921_v23, %v2919_v24  ;;  %v2905_v27 = vsel %vm2904_vm12, %v2880_v3, %v2903_v5  ;;  %v497_v60 = vsel %vm479_vm0, %v491_v12, 0.0 }
 0xb72   : > { %3923 = vrcp.f32 %v2925_v47  ;;  %v2926_v6 = vadd.f32 1e-08, %v2922_v26  ;;  %v2908_v31 = vsel %vm2906_vm13, %v2907_v25, %v2905_v27  ;;  %v1029_v34 = vmul.f32 %v4415_v37, %v4415_v37 }
 0xb73   : > { %3925 = vrcp.f32 %v2923_v21  ;;  %v2924_v54 = vadd.f32 1e-08, %v2908_v31  ;;  %v1979_v2 = vmul.f32 %v4587_v61, %v4587_v61  ;;  %v1980_v10 = vmul.f32 %v4589_v45, %v4589_v45 }
 0xb74   : > { %3927 = vrcp.f32 %v2926_v6  ;;  %v1032_v47 = vsel %vm479_vm0, %v1028_v19, 0.0  ;;  %v1035_v16 = vsel %vm479_vm0, %v1029_v34, 0.0  ;;  %v2334_v23 = vmul.f32 %v4647_v49, %v4647_v49 }
 0xb75   : > { %3929 = vrcp.f32 %v2924_v54  ;;  %v1983_v1 = vsel %vm479_vm0, %v1979_v2, 0.0  ;;  %v1986_v21 = vsel %vm479_vm0, %v1980_v10, 0.0  ;;  %v2335_v5 = vmul.f32 %v4653_v8, %v4653_v8 }
 0xb76   : > { %v492_v24 = vmul.f32 %v4687_v36, %v4687_v36  ;;  %v2338_v25 = vsel %vm479_vm0, %v2334_v23, 0.0  ;;  %v1030_v27 = vmul.f32 %v4421_v43, %v4421_v43  ;;  %v1981_v31 = vmul.f32 %v4591_v14, %v4591_v14 }
 0xb77   : > { %v2341_v26 = vsel %vm479_vm0, %v2335_v5, 0.0  ;;  %v1013_v23 = vmul.f32 %v4415_v37, %v4460_v30  ;;  %v1963_v5 = vmul.f32 %v4587_v61, %v4460_v30  ;;  %v2319_v61 = vmul.f32 %v4653_v8, %v4698_v55 }
 0xb78   : > { %v500_v6 = vsel %vm479_vm0, %v492_v24, 0.0  ;;  %v1038_v54 = vsel %vm479_vm0, %v1030_v27, 0.0  ;;  %v2318_v27 = vmul.f32 %v4647_v49, %v4690_v0 }
 0xb7c   : > { %v3924_v32 = vpop.eup %3923 }
 0xb7d   : > { %v3926_v35 = vpop.eup %3925  ;;  %v2933_v59 = vmul.f32 %v3924_v32, %v4723_v4  ;;  %v2336_v32 = vmul.f32 %v4645_v51, %v4645_v51 }
 0xb7e   : > { %v2931_v39 = vmul.f32 %v3926_v35, %v4727_v15  ;;  %v3928_v44 = vpop.eup %3927  ;;  %v493_v35 = vmul.f32 %v4694_v50, %v4694_v50 }
 0xb7f   : > { %v2937_v42 = vmul.f32 4.0, %v2933_v59  ;;  %v3930_v46 = vpop.eup %3929  ;;  %v2934_v9 = vmul.f32 %v3928_v44, %v4731_v38  ;;  %v478_v38 = vmul.f32 %v4460_v30, %v4460_v30  ;;  %v1989_v59 = vsel %vm479_vm0, %v1981_v31, 0.0 }
 0xb80   : > { %v2935_v28 = vmul.f32 4.0, %v2931_v39  ;;  %v2932_v62 = vmul.f32 %v3930_v46, %v4736_v40  ;;  %v2344_v39 = vsel %vm479_vm0, %v2336_v32, 0.0  ;;  %v503_v44 = vsel %vm479_vm0, %v493_v35, 0.0 }
 0xb81   : > { %v2943_v7 = vmul.f32 1.442695, %v2937_v42  ;;  %v2938_v18 = vmul.f32 4.0, %v2934_v9  ;;  %v480_v56 = vsel %vm479_vm0, %v478_v38, 0.0  ;;  %v1031_v42 = vmul.f32 %v4423_v48, %v4423_v48 }
 0xb82   : > { %v2939_v53 = vmul.f32 1.442695, %v2935_v28  ;;  %v2936_v22 = vmul.f32 4.0, %v2932_v62  ;;  %v1982_v28 = vmul.f32 %v4593_v20, %v4593_v20  ;;  %v2337_v9 = vmul.f32 %v4649_v52, %v4649_v52 }
 0xb83   : > { %v2945_v57 = vmul.f32 1.442695, %v2938_v18  ;;  %v1041_v46 = vsel %vm479_vm0, %v1031_v42, 0.0  ;;  %v2322_v31 = vsel %vm479_vm0, %v2318_v27, 0.0  ;;  %v1014_v32 = vmul.f32 %v4421_v43, %v4460_v30 }
 0xb84   : > { %3931 = vpow2.f32 %v2939_v53  ;;  %v2941_v63 = vmul.f32 1.442695, %v2936_v22  ;;  %v1992_v53 = vsel %vm479_vm0, %v1982_v28, 0.0  ;;  %v1015_v42 = vmul.f32 %v4423_v48, %v4460_v30 }
 0xb85   : > { %3933 = vpow2.f32 %v2943_v7  ;;  %v2347_v7 = vsel %vm479_vm0, %v2337_v9, 0.0 }
 0xb86   : > { %3935 = vpow2.f32 %v2941_v63 }
 0xb87   : > { %3937 = vpow2.f32 %v2945_v57 }
 0xb8e   : > { %v4747_v4 = vpop.eup %3931 }
 0xb8f   : > { %v2947_v15 = vsel %vm726_vm4, %v4747_v4, 0.0  ;;  %v4751_v17 = vpop.eup %3933 }
 0xb90   : > { %2948 = vadd.xlane.f32.xlu0 %v2947_v15  ;;  %v4755_v40 = vpop.eup %3935  ;;  %v2953_v3 = vsel %vm726_vm4, %v4751_v17, 0.0 }
 0xb91   : > { %v2950_v58 = vsel %vm726_vm4, %v4755_v40, 0.0  ;;  %v4761_v41 = vpop.eup %3937 }
 0xb92   : > { %2951 = vadd.xlane.f32.xlu1 %v2950_v58  ;;  %v2956_v13 = vsel %vm726_vm4, %v4761_v41, 0.0 }
 0xb94   : > { %2954 = vadd.xlane.f32.xlu0 %v2953_v3 }
 0xb96   : > { %2957 = vadd.xlane.f32.xlu1 %v2956_v13 }
 0xb98   : > { %481 = vadd.xlane.f32.xlu0 %v480_v56 }
 0xb9a   : > { %495 = vadd.xlane.f32.xlu1 %v494_v29 }
 0xb9c   : > { %498 = vadd.xlane.f32.xlu0 %v497_v60 }
 0xb9e   : > { %1033 = vadd.xlane.f32.xlu1 %v1032_v47 }
 0xba0   : > { %1036 = vadd.xlane.f32.xlu0 %v1035_v16 }
 0xba2   : > { %1984 = vadd.xlane.f32.xlu1 %v1983_v1  ;;  %v1012_v1 = vmul.f32 %v4413_v33, %v4460_v30  ;;  %v1967_v33 = vsel %vm479_vm0, %v1963_v5, 0.0 }
 0xba4   : > { %1987 = vadd.xlane.f32.xlu0 %v1986_v21  ;;  %v1016_v24 = vsel %vm479_vm0, %v1012_v1, 0.0 }
 0xba6   : > { %2339 = vadd.xlane.f32.xlu1 %v2338_v25  ;;  %v1964_v25 = vmul.f32 %v4589_v45, %v4460_v30  ;;  %v1965_v45 = vmul.f32 %v4591_v14, %v4460_v30  ;;  %v1966_v14 = vmul.f32 %v4593_v20, %v4460_v30 }
 0xba8   : > { %2342 = vadd.xlane.f32.xlu0 %v2341_v26  ;;  %v1019_v26 = vsel %vm479_vm0, %v1013_v23, 0.0  ;;  %v1970_v37 = vsel %vm479_vm0, %v1964_v25, 0.0  ;;  %v1973_v35 = vsel %vm479_vm0, %v1965_v45, 0.0  ;;  %v1976_v28 = vsel %vm479_vm0, %v1966_v14, 0.0 }
 0xbaa   : > { %501 = vadd.xlane.f32.xlu1 %v500_v6 }
 0xbac   : > { %1039 = vadd.xlane.f32.xlu0 %v1038_v54  ;;  %v2325_v54 = vsel %vm479_vm0, %v2319_v61, 0.0 }
 0xbae   : > { %1990 = vadd.xlane.f32.xlu1 %v1989_v59  ;;  %v2320_v59 = vmul.f32 %v4645_v51, %v4687_v36  ;;  %v1025_v51 = vsel %vm479_vm0, %v1015_v42, 0.0 }
 0xbb0   : > { %2345 = vadd.xlane.f32.xlu0 %v2344_v39  ;;  %v2328_v43 = vsel %vm479_vm0, %v2320_v59, 0.0 }
 0xbb2   : > { %1042 = vadd.xlane.f32.xlu1 %v1041_v46 }
 0xbb4   : > { %504 = vadd.xlane.f32.xlu0 %v503_v44 }
 0xbb6   : > { %2348 = vadd.xlane.f32.xlu1 %v2347_v7 }
 0xbb8   : > { %1993 = vadd.xlane.f32.xlu0 %v1992_v53 }
 0xc1d   : > { %v2949_v62 = vpop.xlane.xlu0 %2948 }
 0xc1e   : > { %3939 = vrcp.f32 %v2949_v62 }
 0xc1f   : > { %v2952_v18 = vpop.xlane.xlu1 %2951 }
 0xc20   : > { %3941 = vrcp.f32 %v2952_v18 }
 0xc21   : > { %v2955_v22 = vpop.xlane.xlu0 %2954 }
 0xc22   : > { %3943 = vrcp.f32 %v2955_v22 }
 0xc23   : > { %v2958_v57 = vpop.xlane.xlu1 %2957 }
 0xc24   : > { %3945 = vrcp.f32 %v2958_v57 }
 0xc25   : > { %v4868_v30 = vpop.xlane.xlu0 %481 }
 0xc26   : > { %3947 = vrsqrt.f32 %v4868_v30 }
 0xc27   : > { %v4872_v7 = vpop.xlane.xlu1 %495 }
 0xc28   : > { %v3940_v63 = vpop.eup %3939  ;;  %vm508_vm14 = vcmp.eq.f32.partialorder %v4872_v7, inf  ;;  %vm510_vm2 = vcmp.eq.f32.partialorder %v4872_v7, 0.0 }
 0xc29   : > { %v2963_v58 = vmul.f32 %v3940_v63, %v4747_v4 }
 0xc2a   : > { %v3942_v15 = vpop.eup %3941 }
 0xc2b   : > { %v2964_v38 = vmul.f32 %v3942_v15, %v4755_v40 }
 0xc2c   : > { %v3944_v3 = vpop.eup %3943 }
 0xc2d   : > { %v2967_v11 = vpack.c.bf16 %v2964_v38, %v2963_v58  ;;  %v2965_v13 = vmul.f32 %v3944_v3, %v4751_v17 }
 0xc2e   : > { %v3946_v56 = vpop.eup %3945 }
 0xc2f   : > { %v2966_v12 = vmul.f32 %v3946_v56, %v4761_v41  ;;  %3634 = vmatprep.mubr.msk.bf16.mxu1 %vm726_vm4, %v2967_v11 }
 0xc30   : > { %v3948_v38 = vpop.eup %3947 }
 0xc31   : > { %v2968_v29 = vpack.c.bf16 %v2966_v12, %v2965_v13  ;;  %v488_v12 = vand.u32 2147483648, %v4868_v30  ;;  %v511_v13 = vand.u32 2147483648, %v4872_v7 }
 0xc33   : > { %3635 = vmatmul.mubr.msk.bf16.vlgmr.msra.gmra.mrb[44].mxu1 %vm726_vm4, %v2968_v29  ;;  %vm487_vm4 = vcmp.eq.f32.partialorder %v4868_v30, 0.0 }
 0xd06   : > { %v3636_v60 = vpop.f32.mrb[44].mxu1 }
 0xd07   : > { %v3042_v19 = vmul.f32 %v3636_v60, %v3636_v60  ;;  %v3009_v34 = vpop.f32.mrb[45].mxu1  ;;  %v3026_v8 = vmul.f32 %v3636_v60, %v4687_v36  ;;  %v2321_v36 = vmul.f32 %v4649_v52, %v4694_v50  ;;  %v4876_v52 = vpop.xlane.xlu1 %1033 }
 0xd08   : > { %v3637_v2 = vpop.f32.mrb[46].mxu1  ;;  %v3040_v10 = vmul.f32 %v3009_v34, %v3009_v34  ;;  %v3024_v6 = vmul.f32 %v3009_v34, %v4690_v0  ;;  %v1022_v0 = vsel %vm479_vm0, %v1014_v32, 0.0  ;;  %3949 = vrsqrt.f32 %v4876_v52 }
 0xd09   : > { %v3043_v40 = vmul.f32 %v3637_v2, %v3637_v2  ;;  %v3012_v47 = vpop.f32.mrb[47].mxu1  ;;  %v3050_v4 = vsel %vm479_vm0, %v3042_v19, 0.0  ;;  %v3034_v39 = vsel %vm479_vm0, %v3026_v8, 0.0  ;;  %v3027_v20 = vmul.f32 %v3637_v2, %v4694_v50 }
 0xd0a   : > { %3051 = vadd.xlane.f32.xlu1 %v3050_v4  ;;  %v3041_v16 = vmul.f32 %v3012_v47, %v3012_v47  ;;  %v3044_v17 = vsel %vm479_vm0, %v3040_v10, 0.0  ;;  %v3028_v49 = vsel %vm479_vm0, %v3024_v6, 0.0  ;;  %v3025_v44 = vmul.f32 %v3012_v47, %v4698_v55  ;;  %v4870_v55 = vpop.xlane.xlu0 %498 }
 0xd0b   : > { %v3053_v41 = vsel %vm479_vm0, %v3043_v40, 0.0  ;;  %v2331_v9 = vsel %vm479_vm0, %v2321_v36, 0.0  ;;  %v3037_v48 = vsel %vm479_vm0, %v3027_v20, 0.0  ;;  %v4880_v62 = vpop.xlane.xlu1 %1984  ;;  %vm515_vm3 = vcmp.eq.f32.partialorder %v4870_v55, inf }
 0xd0c   : > { %3054 = vadd.xlane.f32.xlu0 %v3053_v41  ;;  %v3047_v21 = vsel %vm479_vm0, %v3041_v16, 0.0  ;;  %v3031_v46 = vsel %vm479_vm0, %v3025_v44, 0.0  ;;  %vm485_vm0 = vcmp.eq.f32.partialorder %v4868_v30, inf  ;;  %vm517_vm5 = vcmp.eq.f32.partialorder %v4870_v55, 0.0 }
 0xd0d   : > { %v518_v60 = vand.u32 2147483648, %v4870_v55  ;;  %v484_v34 = vmul.f32 %v3948_v38, %v4868_v30  ;;  %vm1046_vm6 = vcmp.eq.f32.partialorder %v4876_v52, inf  ;;  %vm1048_vm7 = vcmp.eq.f32.partialorder %v4876_v52, 0.0 }
 0xd0e   : > { %3045 = vadd.xlane.f32.xlu1 %v3044_v17  ;;  %v4874_v53 = vpop.xlane.xlu0 %1036  ;;  %v1049_v40 = vand.u32 2147483648, %v4876_v52  ;;  %vm1997_vm15 = vcmp.eq.f32.partialorder %v4880_v62, inf  ;;  %vm1999_vm10 = vcmp.eq.f32.partialorder %v4880_v62, 0.0  ;;  %v2000_v1 = vand.u32 2147483648, %v4880_v62 }
 0xd0f   : > { %v4884_v22 = vpop.xlane.xlu1 %2339  ;;  %3951 = vrsqrt.f32 %v4874_v53  ;;  %vm1053_vm8 = vcmp.eq.f32.partialorder %v4874_v53, inf  ;;  %vm1055_vm9 = vcmp.eq.f32.partialorder %v4874_v53, 0.0  ;;  %v1056_v16 = vand.u32 2147483648, %v4874_v53 }
 0xd10   : > { %3048 = vadd.xlane.f32.xlu0 %v3047_v21  ;;  %3953 = vrsqrt.f32 %v4872_v7  ;;  %v486_v5 = vsel %vm485_vm0, %v4868_v30, %v484_v34  ;;  %vm2352_vm12 = vcmp.eq.f32.partialorder %v4884_v22, inf  ;;  %vm2354_vm13 = vcmp.eq.f32.partialorder %v4884_v22, 0.0 }
 0xd11   : > { %3955 = vrsqrt.f32 %v4870_v55  ;;  %v4954_v6 = vsel %vm487_vm4, %v488_v12, %v486_v5  ;;  %v2355_v8 = vand.u32 2147483648, %v4884_v22 }
 0xd12   : > { %1017 = vadd.xlane.f32.xlu1 %v1016_v24  ;;  %v4878_v50 = vpop.xlane.xlu0 %1987  ;;  %3957 = vrsqrt.f32 %v4880_v62  ;;  %v3950_v58 = vpop.eup %3949 }
 0xd13   : > { %v4894_v63 = vpop.xlane.xlu1 %501  ;;  %3959 = vrsqrt.f32 %v4878_v50  ;;  %v1045_v2 = vmul.f32 %v3950_v58, %v4876_v52  ;;  %vm2004_vm1 = vcmp.eq.f32.partialorder %v4878_v50, inf  ;;  %vm2006_vm11 = vcmp.eq.f32.partialorder %v4878_v50, 0.0 }
 0xd14   : > { %1020 = vadd.xlane.f32.xlu0 %v1019_v26  ;;  %3961 = vrsqrt.f32 %v4884_v22 }
 0xd15   : > { %v1047_v24 = vsel %vm1046_vm6, %v4876_v52, %v1045_v2 }
 0xd16   : > { %1968 = vadd.xlane.f32.xlu1 %v1967_v33  ;;  %v4882_v18 = vpop.xlane.xlu0 %2342  ;;  %v1050_v45 = vsel %vm1048_vm7, %v1049_v40, %v1047_v24 }
 0xd17   : > { %v4902_v3 = vpop.xlane.xlu1 %1990  ;;  %3963 = vrsqrt.f32 %v4882_v18  ;;  %vm2359_vm0 = vcmp.eq.f32.partialorder %v4882_v18, inf  ;;  %vm2361_vm4 = vcmp.eq.f32.partialorder %v4882_v18, 0.0  ;;  %v1072_v42 = vmul.f32 %v1050_v45, %v4954_v6 }
 0xd18   : > { %1971 = vadd.xlane.f32.xlu0 %v1970_v37  ;;  %v2007_v37 = vand.u32 2147483648, %v4878_v50  ;;  %vm2011_vm6 = vcmp.eq.f32.partialorder %v4902_v3, inf  ;;  %vm2013_vm7 = vcmp.eq.f32.partialorder %v4902_v3, 0.0 }
 0xd19   : > { %v3952_v11 = vpop.eup %3951  ;;  %v1076_v52 = vmax.f32 %v1072_v42, 1e-08 }
 0xd1a   : > { %2323 = vadd.xlane.f32.xlu1 %v2322_v31  ;;  %v4886_v57 = vpop.xlane.xlu0 %1039  ;;  %v3954_v29 = vpop.eup %3953  ;;  %v1052_v47 = vmul.f32 %v3952_v11, %v4874_v53 }
 0xd1b   : > { %v3956_v19 = vpop.eup %3955  ;;  %3965 = vrsqrt.f32 %v4886_v57  ;;  %v507_v4 = vmul.f32 %v3954_v29, %v4872_v7  ;;  %v4930_v21 = vpop.xlane.xlu1 %1042 }
 0xd1c   : > { %2326 = vadd.xlane.f32.xlu0 %v2325_v54  ;;  %v3958_v10 = vpop.eup %3957  ;;  %3967 = vrsqrt.f32 %v4902_v3  ;;  %v514_v17 = vmul.f32 %v3956_v19, %v4870_v55  ;;  %v1054_v26 = vsel %vm1053_vm8, %v4874_v53, %v1052_v47  ;;  %v1070_v40 = vand.u32 2147483648, %v4930_v21 }
 0xd1d   : > { %v3960_v41 = vpop.eup %3959  ;;  %v1996_v25 = vmul.f32 %v3958_v10, %v4880_v62  ;;  %3969 = vrsqrt.f32 %v4894_v63  ;;  %v509_v33 = vsel %vm508_vm14, %v4872_v7, %v507_v4  ;;  %vm522_vm14 = vcmp.eq.f32.partialorder %v4894_v63, inf }
 0xd1e   : > { %3029 = vadd.xlane.f32.xlu1 %v3028_v49  ;;  %v4896_v15 = vpop.xlane.xlu0 %2345  ;;  %v2003_v27 = vmul.f32 %v3960_v41, %v4878_v50  ;;  %v3962_v61 = vpop.eup %3961  ;;  %v516_v31 = vsel %vm515_vm3, %v4870_v55, %v514_v17  ;;  %v1057_v49 = vsel %vm1055_vm9, %v1056_v16, %v1054_v26  ;;  %v4976_v59 = vsel %vm510_vm2, %v511_v13, %v509_v33 }
 0xd1f   : > { %3971 = vrsqrt.f32 %v4896_v15  ;;  %v1998_v54 = vsel %vm1997_vm15, %v4880_v62, %v1996_v25  ;;  %v4986_v44 = vsel %vm517_vm5, %v518_v60, %v516_v31  ;;  %vm1060_vm2 = vcmp.eq.f32.partialorder %v4886_v57, inf }
 0xd20   : > { %1974 = vadd.xlane.f32.xlu0 %v1973_v35  ;;  %v2362_v35 = vand.u32 2147483648, %v4882_v18  ;;  %v2001_v36 = vsel %vm1999_vm10, %v2000_v1, %v1998_v54  ;;  %vm1062_vm3 = vcmp.eq.f32.partialorder %v4886_v57, 0.0  ;;  %vm524_vm5 = vcmp.eq.f32.partialorder %v4894_v63, 0.0 }
 0xd21   : > { %v3964_v32 = vpop.eup %3963  ;;  %v2023_v62 = vmul.f32 %v2001_v36, %v4954_v6  ;;  %vm2366_vm8 = vcmp.eq.f32.partialorder %v4896_v15, inf  ;;  %v2369_v13 = vand.u32 2147483648, %v4896_v15  ;;  %vm2368_vm9 = vcmp.eq.f32.partialorder %v4896_v15, 0.0 }
 0xd22   : > { %1023 = vadd.xlane.f32.xlu1 %v1022_v0  ;;  %v4904_v56 = vpop.xlane.xlu0 %504  ;;  %v4972_v0 = vpop.xlane.xlu1 %2348  ;;  %v2358_v20 = vmul.f32 %v3964_v32, %v4882_v18  ;;  %vm1067_vm15 = vcmp.eq.f32.partialorder %v4930_v21, inf  ;;  %vm1069_vm10 = vcmp.eq.f32.partialorder %v4930_v21, 0.0 }
 0xd23   : > { %v2027_v47 = vmax.f32 %v2023_v62, 1e-08 }
 0xd24   : > { %3035 = vadd.xlane.f32.xlu0 %v3034_v39  ;;  %v2005_v39 = vsel %vm2004_vm1, %v4878_v50, %v2003_v27  ;;  %v2014_v50 = vand.u32 2147483648, %v4902_v3  ;;  %v2360_v12 = vsel %vm2359_vm0, %v4882_v18, %v2358_v20  ;;  %vm529_vm1 = vcmp.eq.f32.partialorder %v4904_v56, inf }
 0xd25   : > { %v3966_v14 = vpop.eup %3965  ;;  %v2008_v30 = vsel %vm2006_vm11, %v2007_v37, %v2005_v39  ;;  %v2363_v41 = vsel %vm2361_vm4, %v2362_v35, %v2360_v12  ;;  %v532_v20 = vand.u32 2147483648, %v4904_v56  ;;  %vm2373_vm0 = vcmp.eq.f32.partialorder %v4972_v0, inf }
 0xd26   : > { %2329 = vadd.xlane.f32.xlu1 %v2328_v43  ;;  %v4932_v23 = vpop.xlane.xlu0 %1993  ;;  %v2351_v43 = vmul.f32 %v3962_v61, %v4884_v22  ;;  %v2024_v29 = vmul.f32 %v2008_v30, %v4954_v6  ;;  %vm2375_vm4 = vcmp.eq.f32.partialorder %v4972_v0, 0.0 }
 0xd27   : > { %3973 = vrsqrt.f32 %v4932_v23  ;;  %vm2018_vm11 = vcmp.eq.f32.partialorder %v4932_v23, inf  ;;  %v2021_v27 = vand.u32 2147483648, %v4932_v23 }
 0xd28   : > { %1977 = vadd.xlane.f32.xlu0 %v1976_v28  ;;  %3975 = vrsqrt.f32 %v4930_v21  ;;  %v3968_v28 = vpop.eup %3967  ;;  %v2353_v7 = vsel %vm2352_vm12, %v4884_v22, %v2351_v43  ;;  %v2028_v1 = vmax.f32 %v2024_v29, 1e-08  ;;  %vm2020_vm12 = vcmp.eq.f32.partialorder %v4932_v23, 0.0 }
 0xd29   : > { %3977 = vrsqrt.f32 %v4904_v56  ;;  %v3970_v55 = vpop.eup %3969  ;;  %v2010_v53 = vmul.f32 %v3968_v28, %v4902_v3  ;;  %v2356_v2 = vsel %vm2354_vm13, %v2355_v8, %v2353_v7  ;;  %vm531_vm13 = vcmp.eq.f32.partialorder %v4904_v56, 0.0 }
 0xd2a   : > { %1026 = vadd.xlane.f32.xlu1 %v1025_v51  ;;  %v1073_v51 = vmul.f32 %v1057_v49, %v4954_v6  ;;  %3979 = vrsqrt.f32 %v4972_v0  ;;  %v3972_v38 = vpop.eup %3971  ;;  %v521_v19 = vmul.f32 %v3970_v55, %v4894_v63  ;;  %v2378_v5 = vmul.f32 %v2356_v2, %v4976_v59 }
 0xd2b   : > { %v2012_v10 = vsel %vm2011_vm6, %v4902_v3, %v2010_v53  ;;  %3981 = vrcp.f32 %v1076_v52  ;;  %v2365_v4 = vmul.f32 %v3972_v38, %v4896_v15  ;;  %v2376_v55 = vand.u32 2147483648, %v4972_v0 }
 0xd2c   : > { %3032 = vadd.xlane.f32.xlu0 %v3031_v46  ;;  %v525_v46 = vand.u32 2147483648, %v4894_v63  ;;  %v1077_v58 = vmax.f32 %v1073_v51, 1e-08  ;;  %v523_v26 = vsel %vm522_vm14, %v4894_v63, %v521_v19  ;;  %v2015_v18 = vsel %vm2013_vm7, %v2014_v50, %v2012_v10 }
 0xd2d   : > { %v2367_v61 = vsel %vm2366_vm8, %v4896_v15, %v2365_v4  ;;  %v2382_v49 = vmax.f32 %v2378_v5, 1e-08  ;;  %v2025_v32 = vmul.f32 %v2015_v18, %v4954_v6  ;;  %v1092_v18 = vlaneseq }
 0xd2e   : > { %2332 = vadd.xlane.f32.xlu1 %v2331_v9  ;;  %v1059_v9 = vmul.f32 %v3966_v14, %v4886_v57  ;;  %3983 = vrcp.f32 %v1077_v58  ;;  %v526_v43 = vsel %vm524_vm5, %v525_v46, %v523_v26  ;;  %v2370_v42 = vsel %vm2368_vm9, %v2369_v13, %v2367_v61 }
 0xd2f   : > { %v2029_v15 = vmax.f32 %v2025_v32, 1e-08 }
 0xd30   : > { %3038 = vadd.xlane.f32.xlu0 %v3037_v48  ;;  %v1063_v48 = vand.u32 2147483648, %v4886_v57  ;;  %v1061_v34 = vsel %vm1060_vm2, %v4886_v57, %v1059_v9  ;;  %v2379_v57 = vmul.f32 %v2363_v41, %v4986_v44 }
 0xd31   : > { %v3974_v11 = vpop.eup %3973 }
 0xd32   : > { %v3976_v60 = vpop.eup %3975  ;;  %v2017_v16 = vmul.f32 %v3974_v11, %v4932_v23  ;;  %v1064_v24 = vsel %vm1062_vm3, %v1063_v48, %v1061_v34  ;;  %v2383_v39 = vmax.f32 %v2379_v57, 1e-08 }
 0xd33   : > { %v1066_v17 = vmul.f32 %v3976_v60, %v4930_v21  ;;  %v3978_v25 = vpop.eup %3977  ;;  %v1074_v3 = vmul.f32 %v1064_v24, %v4954_v6 }
 0xd34   : > { %v3980_v33 = vpop.eup %3979  ;;  %v2019_v31 = vsel %vm2018_vm11, %v4932_v23, %v2017_v16  ;;  %v528_v8 = vmul.f32 %v3978_v25, %v4904_v56  ;;  %vm1117_vm11 = vcmask 60416  }
 0xd35   : > { %v1068_v45 = vsel %vm1067_vm15, %v4930_v21, %v1066_v17  ;;  %v2372_v35 = vmul.f32 %v3980_v33, %v4972_v0  ;;  %v2022_v28 = vsel %vm2020_vm12, %v2021_v27, %v2019_v31  ;;  %v1078_v51 = vmax.f32 %v1074_v3, 1e-08  ;;  %v5078_v36 = vpop.eup %3981 }
 0xd36   : > { %v1071_v23 = vsel %vm1069_vm10, %v1070_v40, %v1068_v45  ;;  %v530_v9 = vsel %vm529_vm1, %v4904_v56, %v528_v8  ;;  %v2380_v21 = vmul.f32 %v2370_v42, %v526_v43  ;;  %v2026_v30 = vmul.f32 %v2022_v28, %v4954_v6 }
 0xd37   : > { %v2374_v48 = vsel %vm2373_vm0, %v4972_v0, %v2372_v35  ;;  %v1075_v53 = vmul.f32 %v1071_v23, %v4954_v6  ;;  %v533_v11 = vsel %vm531_vm13, %v532_v20, %v530_v9  ;;  %v1093_v28 = vand.u32 127, %v1092_v18 }
 0xd38   : > { %v5084_v46 = vpop.eup %3983  ;;  %v2377_v58 = vsel %vm2375_vm4, %v2376_v55, %v2374_v48  ;;  %v2384_v13 = vmax.f32 %v2380_v21, 1e-08  ;;  %v2030_v29 = vmax.f32 %v2026_v30, 1e-08  ;;  %vm1110_vm15 = vcmask 1041409  }
 0xd39   : > { %v1079_v2 = vmax.f32 %v1075_v53, 1e-08  ;;  %vm1112_vm10 = vcmask 1042434   ;;  %vm1114_vm1 = vcmask 1043459   ;;  %vm2079_vm12 = vcmask 1040384  }
 0xd3a   : > { %vm2081_vm13 = vcmask 25600  }
 0xd97   : > { %v5033_v22 = vpop.xlane.xlu1 %3051 }
 0xd98   : > { %3985 = vrsqrt.f32 %v5033_v22  ;;  %vm3072_vm14 = vcmp.eq.f32.partialorder %v5033_v22, inf  ;;  %v3075_v6 = vand.u32 2147483648, %v5033_v22  ;;  %vm3074_vm2 = vcmp.eq.f32.partialorder %v5033_v22, 0.0 }
 0xd99   : > { %v5047_v37 = vpop.xlane.xlu0 %3054  ;;  %3987 = vrcp.f32 %v2027_v47  ;;  %v2381_v47 = vmul.f32 %v2377_v58, %v533_v11 }
 0xd9a   : > { %3989 = vrsqrt.f32 %v5047_v37  ;;  %vm3079_vm3 = vcmp.eq.f32.partialorder %v5047_v37, inf  ;;  %v3082_v56 = vand.u32 2147483648, %v5047_v37  ;;  %vm3081_vm5 = vcmp.eq.f32.partialorder %v5047_v37, 0.0 }
 0xd9b   : > { %v5059_v54 = vpop.xlane.xlu1 %3045  ;;  %3991 = vrcp.f32 %v2028_v1  ;;  %v2385_v8 = vmax.f32 %v2381_v47, 1e-08 }
 0xd9c   : > { %3993 = vrsqrt.f32 %v5059_v54  ;;  %vm3058_vm6 = vcmp.eq.f32.partialorder %v5059_v54, inf  ;;  %v3061_v1 = vand.u32 2147483648, %v5059_v54  ;;  %vm3060_vm7 = vcmp.eq.f32.partialorder %v5059_v54, 0.0 }
 0xd9d   : > { %v5066_v14 = vpop.xlane.xlu0 %3048 }
 0xd9e   : > { %3995 = vrsqrt.f32 %v5066_v14  ;;  %vm3065_vm8 = vcmp.eq.f32.partialorder %v5066_v14, inf  ;;  %v3068_v27 = vand.u32 2147483648, %v5066_v14  ;;  %vm3067_vm9 = vcmp.eq.f32.partialorder %v5066_v14, 0.0 }
 0xd9f   : > { %v5082_v63 = vpop.xlane.xlu1 %1017  ;;  %3997 = vrcp.f32 %v2382_v49 }
 0xda0   : > { %3999 = vrcp.f32 %v2383_v39  ;;  %v1084_v55 = vmul.f32 %v5078_v36, %v5082_v63 }
 0xda1   : > { %v5092_v7 = vpop.xlane.xlu0 %1020  ;;  %4001 = vrcp.f32 %v1078_v51  ;;  %v1095_v51 = vshrl.u32 %v1092_v18, 7 }
 0xda2   : > { %v3986_v52 = vpop.eup %3985  ;;  %4003 = vrcp.f32 %v2029_v15  ;;  %v1085_v15 = vmul.f32 %v5084_v46, %v5092_v7 }
 0xda3   : > { %v5096_v62 = vpop.eup %3987  ;;  %v3071_v38 = vmul.f32 %v3986_v52, %v5033_v22  ;;  %v5099_v50 = vpop.xlane.xlu1 %1968  ;;  %4005 = vrcp.f32 %v2030_v29  ;;  %v5126_v30 = vsub.s32 %v1093_v28, %v1095_v51 }
 0xda4   : > { %v3990_v12 = vpop.eup %3989  ;;  %4007 = vrcp.f32 %v2384_v13 }
 0xda5   : > { %v3992_v0 = vpop.eup %3991  ;;  %v3073_v60 = vsel %vm3072_vm14, %v5033_v22, %v3071_v38  ;;  %v3078_v19 = vmul.f32 %v3990_v12, %v5047_v37  ;;  %v1972_v34 = vpop.xlane.xlu0 %1971  ;;  %4009 = vrcp.f32 %v1079_v2  ;;  %v1101_v58 = vrot.slane %v1085_v15, %v5126_v30 }
 0xda6   : > { %v3994_v10 = vpop.eup %3993  ;;  %v3076_v40 = vsel %vm3074_vm2, %v3075_v6, %v3073_v60  ;;  %v1097_v36 = vrot.slane %v1084_v55, %v5126_v30 }
 0xda7   : > { %v3080_v4 = vsel %vm3079_vm3, %v5047_v37, %v3078_v19  ;;  %v3057_v16 = vmul.f32 %v3994_v10, %v5059_v54  ;;  %v2324_v41 = vpop.xlane.xlu1 %2323  ;;  %v3086_v17 = vmul.f32 %v3076_v40, %v526_v43 }
 0xda8   : > { %v3996_v22 = vpop.eup %3995  ;;  %v3083_v5 = vsel %vm3081_vm5, %v3082_v56, %v3080_v4  ;;  %v1111_v4 = vsel %vm1110_vm15, %v1101_v58, %v1097_v36 }
 0xda9   : > { %v3998_v24 = vpop.eup %3997  ;;  %v3059_v25 = vsel %vm3058_vm6, %v5059_v54, %v3057_v16  ;;  %v3064_v26 = vmul.f32 %v3996_v22, %v5066_v14  ;;  %v2327_v33 = vpop.xlane.xlu0 %2326  ;;  %v3090_v57 = vmax.f32 %v3086_v17, 1e-08  ;;  %v3087_v49 = vmul.f32 %v3083_v5, %v533_v11 }
 0xdaa   : > { %v3062_v37 = vsel %vm3060_vm7, %v3061_v1, %v3059_v25  ;;  %v4000_v61 = vpop.eup %3999  ;;  %v2390_v13 = vmul.f32 %v3998_v24, %v2324_v41 }
 0xdab   : > { %v3066_v31 = vsel %vm3065_vm8, %v5066_v14, %v3064_v26  ;;  %v3084_v3 = vmul.f32 %v3062_v37, %v4976_v59  ;;  %v3030_v45 = vpop.xlane.xlu1 %3029  ;;  %v4002_v54 = vpop.eup %4001  ;;  %4011 = vrcp.f32 %v3090_v57  ;;  %v3091_v20 = vmax.f32 %v3087_v49, 1e-08 }
 0xdac   : > { %v3069_v32 = vsel %vm3067_vm9, %v3068_v27, %v3066_v31  ;;  %v4004_v35 = vpop.eup %4003  ;;  %v2036_v59 = vmul.f32 %v3992_v0, %v1972_v34  ;;  %v2391_v46 = vmul.f32 %v4000_v61, %v2327_v33  ;;  %v2401_v41 = vrot.slane %v2390_v13, %v5126_v30 }
 0xdad   : > { %v3088_v39 = vmax.f32 %v3084_v3, 1e-08  ;;  %v1975_v43 = vpop.xlane.xlu0 %1974  ;;  %v3085_v42 = vmul.f32 %v3069_v32, %v4986_v44  ;;  %v4006_v21 = vpop.eup %4005  ;;  %v2035_v44 = vmul.f32 %v5096_v62, %v5099_v50 }
 0xdae   : > { %v2037_v9 = vmul.f32 %v4004_v35, %v1975_v43  ;;  %v2050_v38 = vrot.slane %v2036_v59, %v5126_v30  ;;  %v4008_v12 = vpop.eup %4007  ;;  %v2405_v56 = vrot.slane %v2391_v46, %v5126_v30 }
 0xdaf   : > { %4013 = vrcp.f32 %v3088_v39  ;;  %v1024_v23 = vpop.xlane.xlu1 %1023  ;;  %v3089_v14 = vmax.f32 %v3085_v42, 1e-08  ;;  %v2046_v6 = vrot.slane %v2035_v44, %v5126_v30  ;;  %v4010_v50 = vpop.eup %4009 }
 0xdb0   : > { %4015 = vrcp.f32 %v2385_v8  ;;  %v1086_v53 = vmul.f32 %v4002_v54, %v1024_v23  ;;  %v2054_v7 = vrot.slane %v2037_v9, %v5126_v30 }
 0xdb1   : > { %v3036_v48 = vpop.xlane.xlu0 %3035  ;;  %4017 = vrcp.f32 %v3089_v14  ;;  %v2059_v2 = vsel %vm1110_vm15, %v2050_v38, %v2046_v6 }
 0xdb2   : > { %4019 = vrcp.f32 %v3091_v20  ;;  %v1105_v63 = vrot.slane %v1086_v53, %v5126_v30  ;;  %v2060_v47 = vsel %vm1112_vm10, %v2054_v7, %v2059_v2 }
 0xdb3   : > { %v2330_v52 = vpop.xlane.xlu1 %2329 }
 0xdb4   : > { %v2392_v29 = vmul.f32 %v4008_v12, %v2330_v52  ;;  %v1113_v33 = vsel %vm1112_vm10, %v1105_v63, %v1111_v4 }
 0xdb5   : > { %v1978_v11 = vpop.xlane.xlu0 %1977  ;;  %v4012_v60 = vpop.eup %4011 }
 0xdb6   : > { %v2038_v62 = vmul.f32 %v4006_v21, %v1978_v11  ;;  %v3098_v24 = vmul.f32 %v4012_v60, %v3036_v48  ;;  %v2409_v25 = vrot.slane %v2392_v29, %v5126_v30 }
 0xdb7   : > { %v1027_v0 = vpop.xlane.xlu1 %1026 }
 0xdb8   : > { %v2058_v19 = vrot.slane %v2038_v62, %v5126_v30  ;;  %v1087_v34 = vmul.f32 %v4010_v50, %v1027_v0  ;;  %v3115_v35 = vrot.slane %v3098_v24, %v5126_v30 }
 0xdb9   : > { %v4014_v10 = vpop.eup %4013  ;;  %v3033_v40 = vpop.xlane.xlu0 %3032 }
 0xdba   : > { %v4016_v16 = vpop.eup %4015  ;;  %v3096_v17 = vmul.f32 %v4014_v10, %v3030_v45  ;;  %v1109_v22 = vrot.slane %v1087_v34, %v5126_v30  ;;  %v2061_v1 = vsel %vm1114_vm1, %v2058_v19, %v2060_v47  ;;  %v2414_v45 = vsel %vm1110_vm15, %v2405_v56, %v2401_v41 }
 0xdbb   : > { %v4018_v5 = vpop.eup %4017  ;;  %v2333_v26 = vpop.xlane.xlu1 %2332  ;;  %v2063_v18 = vsel %vm1117_vm11, %v2061_v1, 0.0  ;;  %v2415_v39 = vsel %vm1112_vm10, %v2409_v25, %v2414_v45 }
 0xdbc   : > { %v3097_v27 = vmul.f32 %v4018_v5, %v3033_v40  ;;  %v2393_v37 = vmul.f32 %v4016_v16, %v2333_v26  ;;  %2064 = vadd.xlane.f32.xlu0 %v2063_v18  ;;  %v1115_v57 = vsel %vm1114_vm1, %v1109_v22, %v1113_v33  ;;  %v4020_v61 = vpop.eup %4019  ;;  %v3107_v49 = vrot.slane %v3096_v17, %v5126_v30 }
 0xdbd   : > { %v3039_v31 = vpop.xlane.xlu0 %3038  ;;  %v1118_v3 = vsel %vm1117_vm11, %v1115_v57, 0.0 }
 0xdbe   : > { %v3111_v54 = vrot.slane %v3097_v27, %v5126_v30  ;;  %v2413_v32 = vrot.slane %v2393_v37, %v5126_v30  ;;  %v3099_v8 = vmul.f32 %v4020_v61, %v3039_v31  ;;  %1119 = vadd.xlane.f32.xlu1 %v1118_v3 }
 0xdc0   : > { %v3119_v43 = vrot.slane %v3099_v8, %v5126_v30  ;;  %v2416_v42 = vsel %vm1114_vm1, %v2413_v32, %v2415_v39  ;;  %v3120_v28 = vsel %vm1110_vm15, %v3111_v54, %v3107_v49 }
 0xdc1   : > { %v2418_v51 = vsel %vm1117_vm11, %v2416_v42, 0.0  ;;  %v3121_v23 = vsel %vm1112_vm10, %v3115_v35, %v3120_v28 }
 0xdc2   : > { %2419 = vadd.xlane.f32.xlu1 %v2418_v51  ;;  %v3122_v14 = vsel %vm1114_vm1, %v3119_v43, %v3121_v23 }
 0xdc3   : > { %v3124_v20 = vsel %vm1117_vm11, %v3122_v14, 0.0 }
 0xdc4   : > { %3125 = vadd.xlane.f32.xlu0 %v3124_v20 }
 0xe49   : > { %v2065_v59 = vpop.xlane.xlu0 %2064 }
 0xe4a   : > { %v2066_v15 = vmul.f32 0.125, %v2065_v59 }
 0xe4b   : > { %v1120_v9 = vpop.xlane.xlu1 %1119 }
 0xe4c   : > { %v1122_v48 = vmul.f32 0.125, %v1120_v9  ;;  %v2077_v21 = vrot.slane %v2066_v15, %v5126_v30 }
 0xe4e   : > { %v2071_v44 = vrot.slane %v1122_v48, %v5126_v30 }
 0xe4f   : > { %v2420_v55 = vpop.xlane.xlu1 %2419 }
 0xe50   : > { %v2421_v53 = vmul.f32 0.125, %v2420_v55  ;;  %v2080_v52 = vsel %vm2079_vm12, %v2071_v44, %v2077_v21 }
 0xe51   : > { %v3126_v38 = vpop.xlane.xlu0 %3125  ;;  %2082 = vst.msk [vmem:[%s413_s14] sm:$0x3] %vm2081_vm13, %v2080_v52 }
 0xe52   : > { %v3127_v58 = vmul.f32 0.125, %v3126_v38 }
 0xe53   : > { %4039 = shalt.err (!%p4036_p5)
}
 0xe54   : > { %s4040_s15 = scalar_lea.hbm %s5176_s26, 32  ;;  %s4044_s24 = scalar_lea.hbm %s5277_s10, 128 }
 0xe55   : > { %p4041_p6 = scmp.ne.s32.totalorder %s5176_s26, %s4040_s15  ;;  %p4045_p10 = scmp.lt.u32.totalorder %s5176_s26, %s5277_s10 }
 0xe56   : > { %p4046_p11 = scmp.lt.u32.totalorder %s4044_s24, %s4040_s15  ;;  %p4048_p13 = scmp.lt.u32.totalorder %s4040_s15, %s5176_s26 }
 0xe57   : > { %p4042_p7 = pnand %p4041_p6, %p4242_p4 }
 0xe58   : > { %p4047_p12 = por %p4046_p11, %p4045_p10 }
 0xe59   : > { %p4043_p9 = pneg %p4042_p7 }
 0xe5a   : > { %p4049_p0 = por %p4048_p13, %p4047_p12 }
 0xe5c   : > { %p4050_p1 = pnand %p4049_p0, %p4043_p9 }
 0xe5e   : > { %4053 = shalt.err (!%p4050_p1)
}
 0xe5f   : > { %3658 = dma.vmem_to_hbm [thread:$0]  (%p4242_p4), %s5178_s16, 32, %s5176_s26, %s3143_s1   ;;  %v3132_v46 = vrot.slane %v2421_v53, %v5126_v30  ;;  %v3138_v7 = vrot.slane %v3127_v58, %v5126_v30 }
 0xe60   : > { %s5290_s0 = sshll.u32 %s4128_s20, 5  ;;  %s5291_s15 = sshll.u32 %s5182_s28, 4  ;;  %s5218_s15 = int_to_ptr.vmem [resolvable:$true] %s5291_s15 }
 0xe61   : > { %s5214_s23 = scalar_lea.hbm %s5278_s11, %s5290_s0  ;;  %v3140_v11 = vsel %vm2079_vm12, %v3132_v46, %v3138_v7  ;;  %s3148_s1 = scalar_lea.sflag [#allocation5], %s5165_s12 }
 0xe62   : > { %3141 = vst.msk [vmem:[%s5182_s28] sm:$0x3] %vm2081_vm13, %v3140_v11  ;;  %s4054_s16 = scalar_lea.vmem %s5218_s15, 32  ;;  %s4141_s20 = smov [#allocation4]  }
 0xe63   : > { %p4055_p2 = scmp.ne.s32.totalorder %s5218_s15, %s4054_s16  ;;  %s4058_s26 = sshll.u32 %s4141_s20, 4  ;;  %s4059_s26 = int_to_ptr.vmem [resolvable:$false] %s4058_s26 }
 0xe64   : > { %s4060_s14 = scalar_lea.vmem %s4059_s26, 64  ;;  %p4061_p6 = scmp.lt.s32.totalorder %s5218_s15, %s4059_s26 }
 0xe65   : > { %p4056_p3 = pnand %p4055_p2, %p4242_p4  ;;  %p4062_p7 = scmp.lt.s32.totalorder %s4060_s14, %s4054_s16 }
 0xe67   : > { %p4057_p5 = pneg %p4056_p3  ;;  %p4063_p9 = por %p4062_p7, %p4061_p6 }
 0xe69   : > { %p4064_p10 = pnand %p4063_p9, %p4057_p5 }
 0xe6b   : > { %4067 = shalt.err (!%p4064_p10)
}
 0xe6c   : > { %s4068_s12 = scalar_lea.hbm %s5214_s23, 32  ;;  %s4072_s13 = scalar_lea.hbm %s5278_s11, 128 }
 0xe6d   : > { %p4069_p11 = scmp.ne.s32.totalorder %s5214_s23, %s4068_s12  ;;  %p4073_p0 = scmp.lt.u32.totalorder %s5214_s23, %s5278_s11 }
 0xe6e   : > { %p4074_p1 = scmp.lt.u32.totalorder %s4072_s13, %s4068_s12  ;;  %p4076_p3 = scmp.lt.u32.totalorder %s4068_s12, %s5214_s23 }
 0xe6f   : > { %p4070_p12 = pnand %p4069_p11, %p4242_p4 }
 0xe70   : > { %p4075_p2 = por %p4074_p1, %p4073_p0 }
 0xe71   : > { %p4071_p13 = pneg %p4070_p12 }
 0xe72   : > { %p4077_p5 = por %p4076_p3, %p4075_p2 }
 0xe74   : > { %p4078_p6 = pnand %p4077_p5, %p4071_p13 }
 0xe76   : > { %4081 = shalt.err (!%p4078_p6)
}
 0xe77   : > { %3659 = dma.vmem_to_hbm [thread:$0]  (%p4242_p4), %s5218_s15, 32, %s5214_s23, %s3148_s1  }
 0xe78 PF: > { %p3669_p7 = scmp.ge.s32.totalorder %s4136_s22, 2  ;;  %s3188_s3 = sand.u32 1, %s4116_s17  }
 0xe79   : > { %s3189_s16 = scalar_lea.sflag [#allocation3], %s3188_s3 }
 0xe7a   : > { %p3663_p9 = pnand %p3669_p7, %p4249_p8 }
 0xe7c   : > { %4107 = dma.done.wait (!%p3663_p9), %s3189_s16, 32  }
 0xe7d   : > { %4109 = vsyncadd (!%p3663_p9), %s3189_s16, 4294967264  ;;  %s3198_s20 = scalar_lea.sflag [#allocation5], %s3188_s3 }
 0xe7e   : > { %4111 = dma.done.wait (!%p3663_p9), %s3198_s20, 32  }
 0xe7f   : > { %4113 = vsyncadd (!%p3663_p9), %s3198_s20, 4294967264  ;;  %s28_s22 = sadd.s32 1, %s4136_s22   ;;  %s5292_s17 = smov %s4120_s18 }
 0xe80   : > { %p25_p10 = scmp.ge.s32.totalorder %s28_s22, 6   ;;  %s5293_s18 = smov %s4124_s19 }
 0xe81   : > { %s5294_s19 = smov %s4255_s30  ;;  %s5295_s20 = smov %s4132_s21 }
 0xe82   : > { %s5296_s21 = smov %s5298_s25  ;;  %27 = sbr.rel (!%p25_p10) target bundleno = 11 (0xb), region = 115 }
 0xe89   :  { %3203 = vsyncpa [#allocation3], 1 }
 0xe8a   :  { %3205 = vsyncpa [#allocation3 + $0x1], 1 }
 0xe8b   :  { %3206 = vsyncpa [#allocation5], 1 }
 0xe8c   :  { %3208 = vsyncpa [#allocation5 + $0x1], 1 }

</bundles_post_ra>
